<compile_context>
chip_gen: v5e
topology: v5e:2x2
jax: 0.10.0
libtpu: 0.0.40
codegen_flags: <defaults>
</compile_context>

<pallas_src>
import numpy as np
import jax
import jax.numpy as jnp
from jax import lax
from jax.experimental import pallas as pl
from jax.experimental.pallas import tpu as pltpu


def _residual_stack_kernel(x_ref, w3_ref, w1_ref, out_ref, acc_ref, xpad_ref):
    # x_ref   : (Bt, H, W, C)       input batch block (only read at layer 0)
    # w3_ref  : (L, 9, C, Ch)       3x3 weights, tap t = dy*3 + dx, VMEM-resident
    # w1_ref  : (L, Ch, C)          1x1 weights (in, out), VMEM-resident
    # out_ref : (Bt, H, W, C)       output block (written on the last layer only)
    # acc_ref : (Bt, H, W, C) f32   running residual accumulator
    # xpad_ref: (Bt, H+2, W+2, C)   zero-bordered ReLU(x) slab (compute dtype)
    layer = pl.program_id(1)
    n_layers = pl.num_programs(1)
    Bt, H, W, C = x_ref.shape

    @pl.when(layer == 0)
    def _init():
        # f32 residual accumulator (stays f32 even for bf16 compute).
        acc_ref[...] = x_ref[...].astype(jnp.float32)
        # Zero only the 1-px halo border; the interior is rewritten every
        # layer.  Done per batch block (cheap, and megacore-safe if the
        # parallel batch axis is sharded across TensorCores).
        zrow = jnp.zeros((Bt, 1, W + 2, C), dtype=xpad_ref.dtype)
        zcol = jnp.zeros((Bt, H + 2, 1, C), dtype=xpad_ref.dtype)
        xpad_ref[:, 0:1, :, :] = zrow
        xpad_ref[:, H + 1:H + 2, :, :] = zrow
        xpad_ref[:, :, 0:1, :] = zcol
        xpad_ref[:, :, W + 1:W + 2, :] = zcol

    x = acc_ref[...]                                            # (Bt,H,W,C) f32

    # ReLU in f32, cast once to the compute dtype, store into the slab interior.
    xpad_ref[:, 1:H + 1, 1:W + 1, :] = jnp.maximum(x, 0.0).astype(xpad_ref.dtype)

    # Current layer's weights (weights stay resident across the whole grid).
    w3 = w3_ref[layer]                                          # (9, C, Ch)
    w1 = w1_ref[layer]                                          # (Ch, C)

    # 3x3 conv (pad=1) as nine shifted-input MXU matmuls, f32 accumulation.
    partials = []
    for dy in range(3):
        for dx in range(3):
            t = dy * 3 + dx
            lhs = xpad_ref[:, dy:dy + H, dx:dx + W, :].reshape(Bt * H * W, C)
            partials.append(
                jnp.dot(lhs, w3[t], preferred_element_type=jnp.float32))
    # Tree-reduce the 9 tap partial products (shorter VPU dependency chain).
    while len(partials) > 1:
        nxt = [partials[i] + partials[i + 1]
               for i in range(0, len(partials) - 1, 2)]
        if len(partials) % 2:
            nxt.append(partials[-1])
        partials = nxt
    y3 = partials[0]                                            # (Bt*H*W, Ch) f32

    # ReLU -> 1x1 conv (channel matmul) -> residual add, elementwise math in f32.
    h2 = jnp.maximum(y3, 0.0).astype(w1.dtype)
    y1 = jnp.dot(h2, w1, preferred_element_type=jnp.float32)    # (Bt*H*W, C) f32
    xnew = x + y1.reshape(Bt, H, W, C)

    @pl.when(layer < n_layers - 1)
    def _carry():
        acc_ref[...] = xnew

    @pl.when(layer == n_layers - 1)
    def _finalize():
        out_ref[...] = jnp.maximum(xnew, 0.0).astype(out_ref.dtype)


def residual_stack_pallas(x_nchw, w3_stack, w1_stack, *, compute_dtype=None,
                          batch_tile=None):
    """ResidualStack forward.

    x_nchw   : (N, C, H, W)      activations, PyTorch layout.
    w3_stack : (L, 3, 3, C, Ch)  3x3 conv weights, HWIO per layer
                                 (PyTorch OIHW (Ch,C,3,3) -> transpose(2,3,1,0)).
    w1_stack : (L, Ch, C)        1x1 conv weights as (in, out) per layer
                                 (PyTorch (C,Ch,1,1) -> weight[:, :, 0, 0].T).
    compute_dtype : dtype of the MXU matmul operands (residual chain stays f32
                    regardless).  Defaults to the weight dtype; pass
                    jnp.bfloat16 for full MXU rate on v6e/v7x.
    """
    N, C, H, W = x_nchw.shape
    L, kh, kw, Cin, Ch = w3_stack.shape
    assert (kh, kw) == (3, 3), "3x3 conv expected"
    assert Cin == C, "in_channels must match activation channels"
    assert w1_stack.shape == (L, Ch, C), \
        "residual add requires num_hiddens == in_channels"

    if compute_dtype is None:
        compute_dtype = w3_stack.dtype

    # NCHW -> NHWC (channels lane-dense; real model uses C = 128).
    # TODO(synk): for C < 128 fold W into the lane axis (or pad C) to avoid
    # mostly-empty vregs; the demo shapes are tiny so this is left as-is.
    x = jnp.transpose(x_nchw, (0, 2, 3, 1))

    # (L, 3, 3, C, Ch) -> (L, 9, C, Ch); tap t = dy*3 + dx.  Cast for the MXU.
    w3p = w3_stack.reshape(L, 9, C, Ch).astype(compute_dtype)
    w1p = w1_stack.astype(compute_dtype)

    # --- VMEM footprint / batch-tile sizing (v7x-safe: 64 MiB physical) -----
    act_bytes = x.dtype.itemsize
    cmp_bytes = jnp.dtype(compute_dtype).itemsize
    per_b = (2 * 2 * H * W * C * act_bytes          # x + out blocks, double-buffered
             + H * W * C * 4                        # f32 accumulator scratch
             + (H + 2) * (W + 2) * C * cmp_bytes)   # padded ReLU(x) slab
    w_bytes = 2 * (L * 9 * C * Ch + L * Ch * C) * cmp_bytes

    if batch_tile is None:
        budget = 40 * 1024 * 1024
        bt = int(max(1, min(N, (budget - w_bytes) // max(per_b, 1))))
        if N >= 2:
            bt = max(1, min(bt, N // 2))            # >= 2 parallel blocks (v7x: 2 TCs)
        while N % bt:                               # avoid a ragged final block
            bt -= 1
        batch_tile = bt
    assert N % batch_tile == 0

    footprint = w_bytes + per_b * batch_tile
    vmem_limit = int(min(60 * 1024 * 1024,
                         max(32 * 1024 * 1024, footprint + 8 * 1024 * 1024)))

    out = pl.pallas_call(
        _residual_stack_kernel,
        out_shape=jax.ShapeDtypeStruct((N, H, W, C), x.dtype),
        grid_spec=pltpu.PrefetchScalarGridSpec(
            num_scalar_prefetch=0,
            grid=(N // batch_tile, L),   # batch blocks outer, layers inner
            in_specs=[
                pl.BlockSpec((batch_tile, H, W, C), lambda b, l: (b, 0, 0, 0)),
                # All layers' weights resident in VMEM (constant block index
                # across the whole grid -> fetched once).
                pl.BlockSpec((L, 9, C, Ch), lambda b, l: (0, 0, 0, 0)),
                pl.BlockSpec((L, Ch, C), lambda b, l: (0, 0, 0)),
            ],
            out_specs=pl.BlockSpec((batch_tile, H, W, C),
                                   lambda b, l: (b, 0, 0, 0)),
            scratch_shapes=[
                pltpu.VMEM((batch_tile, H, W, C), jnp.float32),            # acc
                pltpu.VMEM((batch_tile, H + 2, W + 2, C), compute_dtype),  # xpad
            ],
        ),
        compiler_params=pltpu.CompilerParams(
            dimension_semantics=("parallel", "arbitrary"),
            vmem_limit_bytes=vmem_limit,
        ),
    )(x, w3p, w1p)

    return jnp.transpose(out, (0, 3, 1, 2))  # NHWC -> NCHW


def residual_stack_reference(x_nchw, w3_stack, w1_stack):
    """Pure-JAX reference (NHWC internally) mirroring the PyTorch forward."""
    x = jnp.transpose(x_nchw, (0, 2, 3, 1))
    L = w3_stack.shape[0]
    dn = ("NHWC", "HWIO", "NHWC")
    for l in range(L):
        h = jax.nn.relu(x)
        h = lax.conv_general_dilated(h, w3_stack[l], window_strides=(1, 1),
                                     padding="SAME", dimension_numbers=dn,
                                     precision=lax.Precision.HIGHEST)
        h = jax.nn.relu(h)
        h = jnp.einsum("nhwc,cd->nhwd", h, w1_stack[l],
                       precision=lax.Precision.HIGHEST)  # 1x1 conv
        x = x + h
    x = jax.nn.relu(x)
    return jnp.transpose(x, (0, 3, 1, 2))


if __name__ == "__main__":
    # Small shapes consistent with the module (in_channels == num_hiddens so
    # the residual add is well-defined, as in the original model).
    N, C, H, W = 2, 4, 16, 16         # batch, in_channels/num_hiddens, spatial
    Ch = 8                            # num_residual_hiddens
    L = 2                             # num_residual_layers

    key = jax.random.PRNGKey(0)
    kx, k3, k1 = jax.random.split(key, 3)

    x = jax.random.normal(kx, (N, C, H, W), dtype=jnp.float32)
    # Synthetic weights (HWIO for 3x3, (in, out) for 1x1).
    w3_stack = 0.1 * jax.random.normal(k3, (L, 3, 3, C, Ch), dtype=jnp.float32)
    w1_stack = 0.1 * jax.random.normal(k1, (L, Ch, C), dtype=jnp.float32)

    ref = jax.block_until_ready(residual_stack_reference(x, w3_stack, w1_stack))

    # f32 compute path: matches the reference closely.
    out_f32 = jax.block_until_ready(residual_stack_pallas(x, w3_stack, w1_stack))
    np.testing.assert_allclose(np.asarray(out_f32), np.asarray(ref),
                               rtol=1e-3, atol=1e-3)

    # bf16 MXU-operand path (f32 residual accumulator keeps the chain accurate).
    out_bf16 = jax.block_until_ready(
        residual_stack_pallas(x, w3_stack, w1_stack, compute_dtype=jnp.bfloat16))
    np.testing.assert_allclose(np.asarray(out_bf16), np.asarray(ref),
                               rtol=1e-1, atol=1e-1)

    print("KERNEL_OK")
</pallas_src>

<mosaic_0001>
module attributes {stable_mosaic.version = 11 : i64} {
  func.func @_residual_stack_kernel(%arg0: i32, %arg1: i32, %arg2: memref<1x16x16x4xf32, #tpu.memory_space<vmem>>, %arg3: memref<2x9x4x8xf32, #tpu.memory_space<vmem>>, %arg4: memref<2x8x4xf32, #tpu.memory_space<vmem>>, %arg5: memref<1x16x16x4xf32, #tpu.memory_space<vmem>>, %arg6: memref<1x16x16x4xf32, #tpu.memory_space<vmem>>, %arg7: memref<1x18x18x4xf32, #tpu.memory_space<vmem>>) attributes {dimension_semantics = [#tpu.dimension_semantics<parallel>, #tpu.dimension_semantics<arbitrary>], iteration_bounds = array<i64: 2, 2>, scalar_prefetch = 0 : i64, scratch_operands = 2 : i64, tpu.core_type = #tpu.core_type<tc>, window_params = [{transform_indices = @transform_0, window_bounds = array<i64: 1, 16, 16, 4>}, {pipeline_mode = #tpu.pipeline_mode<synchronous>, transform_indices = @transform_1, window_bounds = array<i64: 2, 9, 4, 8>}, {pipeline_mode = #tpu.pipeline_mode<synchronous>, transform_indices = @transform_2, window_bounds = array<i64: 2, 8, 4>}, {transform_indices = @transform_3, window_bounds = array<i64: 1, 16, 16, 4>}]} {
    %c0_i32 = arith.constant 0 : i32
    %0 = arith.cmpi eq, %arg1, %c0_i32 : i32
    %1 = arith.extui %0 : i1 to i32
    %c0_i32_0 = arith.constant 0 : i32
    %2 = arith.cmpi ne, %1, %c0_i32_0 : i32
    scf.if %2 {
      %c0_61 = arith.constant 0 : index
      %c0_62 = arith.constant 0 : index
      %c0_63 = arith.constant 0 : index
      %c0_64 = arith.constant 0 : index
      %77 = vector.load %arg2[%c0_61, %c0_62, %c0_63, %c0_64] : memref<1x16x16x4xf32, #tpu.memory_space<vmem>>, vector<1x16x16x4xf32>
      %c0_65 = arith.constant 0 : index
      %c0_66 = arith.constant 0 : index
      %c0_67 = arith.constant 0 : index
      %c0_68 = arith.constant 0 : index
      %78 = vector.load %arg6[%c0_65, %c0_66, %c0_67, %c0_68] : memref<1x16x16x4xf32, #tpu.memory_space<vmem>>, vector<1x16x16x4xf32>
      tpu.vector_store %arg6[%c0_65, %c0_66, %c0_67, %c0_68], %77 {strides = array<i32>} : memref<1x16x16x4xf32, #tpu.memory_space<vmem>>, vector<1x16x16x4xf32>,
      %cst_69 = arith.constant 0.000000e+00 : f32
      %79 = vector.broadcast %cst_69 : f32 to vector<1x1x18x4xf32>
      %cst_70 = arith.constant 0.000000e+00 : f32
      %80 = vector.broadcast %cst_70 : f32 to vector<1x18x1x4xf32>
      %c0_71 = arith.constant 0 : index
      %c0_72 = arith.constant 0 : index
      %c0_73 = arith.constant 0 : index
      %c0_74 = arith.constant 0 : index
      %81 = vector.load %arg7[%c0_71, %c0_72, %c0_73, %c0_74] : memref<1x18x18x4xf32, #tpu.memory_space<vmem>>, vector<1x1x18x4xf32>
      tpu.vector_store %arg7[%c0_71, %c0_72, %c0_73, %c0_74], %79 {strides = array<i32>} : memref<1x18x18x4xf32, #tpu.memory_space<vmem>>, vector<1x1x18x4xf32>,
      %c0_75 = arith.constant 0 : index
      %c17 = arith.constant 17 : index
      %c0_76 = arith.constant 0 : index
      %c0_77 = arith.constant 0 : index
      %82 = vector.load %arg7[%c0_75, %c17, %c0_76, %c0_77] : memref<1x18x18x4xf32, #tpu.memory_space<vmem>>, vector<1x1x18x4xf32>
      tpu.vector_store %arg7[%c0_75, %c17, %c0_76, %c0_77], %79 {strides = array<i32>} : memref<1x18x18x4xf32, #tpu.memory_space<vmem>>, vector<1x1x18x4xf32>,
      %c0_78 = arith.constant 0 : index
      %c0_79 = arith.constant 0 : index
      %c0_80 = arith.constant 0 : index
      %c0_81 = arith.constant 0 : index
      %83 = vector.load %arg7[%c0_78, %c0_79, %c0_80, %c0_81] : memref<1x18x18x4xf32, #tpu.memory_space<vmem>>, vector<1x18x1x4xf32>
      tpu.vector_store %arg7[%c0_78, %c0_79, %c0_80, %c0_81], %80 {strides = array<i32>} : memref<1x18x18x4xf32, #tpu.memory_space<vmem>>, vector<1x18x1x4xf32>,
      %c0_82 = arith.constant 0 : index
      %c0_83 = arith.constant 0 : index
      %c17_84 = arith.constant 17 : index
      %c0_85 = arith.constant 0 : index
      %84 = vector.load %arg7[%c0_82, %c0_83, %c17_84, %c0_85] : memref<1x18x18x4xf32, #tpu.memory_space<vmem>>, vector<1x18x1x4xf32>
      tpu.vector_store %arg7[%c0_82, %c0_83, %c17_84, %c0_85], %80 {strides = array<i32>} : memref<1x18x18x4xf32, #tpu.memory_space<vmem>>, vector<1x18x1x4xf32>,
    } else {
    }
    %c0 = arith.constant 0 : index
    %c0_1 = arith.constant 0 : index
    %c0_2 = arith.constant 0 : index
    %c0_3 = arith.constant 0 : index
    %3 = vector.load %arg6[%c0, %c0_1, %c0_2, %c0_3] : memref<1x16x16x4xf32, #tpu.memory_space<vmem>>, vector<1x16x16x4xf32>
    %cst = arith.constant 0.000000e+00 : f32
    %4 = vector.broadcast %cst : f32 to vector<1x16x16x4xf32>
    %5 = arith.maximumf %3, %4 : vector<1x16x16x4xf32>
    %c0_4 = arith.constant 0 : index
    %c1 = arith.constant 1 : index
    %c1_5 = arith.constant 1 : index
    %c0_6 = arith.constant 0 : index
    %6 = vector.load %arg7[%c0_4, %c1, %c1_5, %c0_6] : memref<1x18x18x4xf32, #tpu.memory_space<vmem>>, vector<1x16x16x4xf32>
    tpu.vector_store %arg7[%c0_4, %c1, %c1_5, %c0_6], %5 {strides = array<i32>} : memref<1x18x18x4xf32, #tpu.memory_space<vmem>>, vector<1x16x16x4xf32>,
    %7 = arith.index_cast %arg1 : i32 to index
    %c0_7 = arith.constant 0 : index
    %c0_8 = arith.constant 0 : index
    %c0_9 = arith.constant 0 : index
    %8 = vector.load %arg3[%7, %c0_7, %c0_8, %c0_9] : memref<2x9x4x8xf32, #tpu.memory_space<vmem>>, vector<1x9x4x8xf32>
    %9 = vector.shape_cast %8 : vector<1x9x4x8xf32> to vector<9x4x8xf32>
    %10 = arith.index_cast %arg1 : i32 to index
    %c0_10 = arith.constant 0 : index
    %c0_11 = arith.constant 0 : index
    %11 = vector.load %arg4[%10, %c0_10, %c0_11] : memref<2x8x4xf32, #tpu.memory_space<vmem>>, vector<1x8x4xf32>
    %12 = vector.shape_cast %11 : vector<1x8x4xf32> to vector<8x4xf32>
    %c0_12 = arith.constant 0 : index
    %c0_13 = arith.constant 0 : index
    %c0_14 = arith.constant 0 : index
    %c0_15 = arith.constant 0 : index
    %13 = vector.load %arg7[%c0_12, %c0_13, %c0_14, %c0_15] : memref<1x18x18x4xf32, #tpu.memory_space<vmem>>, vector<1x16x16x4xf32>
    %14 = vector.shape_cast %13 : vector<1x16x16x4xf32> to vector<256x4xf32>
    %15 = vector.extract_strided_slice %9 {offsets = [0, 0, 0], sizes = [1, 4, 8], strides = [1, 1, 1]} : vector<9x4x8xf32> to vector<1x4x8xf32>
    %16 = vector.shape_cast %15 : vector<1x4x8xf32> to vector<4x8xf32>
    %cst_16 = arith.constant dense<0.000000e+00> : vector<256x8xf32>
    %17 = tpu.matmul %14, %16, %cst_16 {dimension_numbers = #tpu.dot_dimension_numbers<[1], [0], [0], [1], [0, 0, 1, 1], [], []>} : vector<256x4xf32>, vector<4x8xf32>, vector<256x8xf32> -> vector<256x8xf32>
    %c0_17 = arith.constant 0 : index
    %c0_18 = arith.constant 0 : index
    %c1_19 = arith.constant 1 : index
    %c0_20 = arith.constant 0 : index
    %18 = vector.load %arg7[%c0_17, %c0_18, %c1_19, %c0_20] : memref<1x18x18x4xf32, #tpu.memory_space<vmem>>, vector<1x16x16x4xf32>
    %19 = vector.shape_cast %18 : vector<1x16x16x4xf32> to vector<256x4xf32>
    %20 = vector.extract_strided_slice %9 {offsets = [1, 0, 0], sizes = [1, 4, 8], strides = [1, 1, 1]} : vector<9x4x8xf32> to vector<1x4x8xf32>
    %21 = vector.shape_cast %20 : vector<1x4x8xf32> to vector<4x8xf32>
    %cst_21 = arith.constant dense<0.000000e+00> : vector<256x8xf32>
    %22 = tpu.matmul %19, %21, %cst_21 {dimension_numbers = #tpu.dot_dimension_numbers<[1], [0], [0], [1], [0, 0, 1, 1], [], []>} : vector<256x4xf32>, vector<4x8xf32>, vector<256x8xf32> -> vector<256x8xf32>
    %c0_22 = arith.constant 0 : index
    %c0_23 = arith.constant 0 : index
    %c2 = arith.constant 2 : index
    %c0_24 = arith.constant 0 : index
    %23 = vector.load %arg7[%c0_22, %c0_23, %c2, %c0_24] : memref<1x18x18x4xf32, #tpu.memory_space<vmem>>, vector<1x16x16x4xf32>
    %24 = vector.shape_cast %23 : vector<1x16x16x4xf32> to vector<256x4xf32>
    %25 = vector.extract_strided_slice %9 {offsets = [2, 0, 0], sizes = [1, 4, 8], strides = [1, 1, 1]} : vector<9x4x8xf32> to vector<1x4x8xf32>
    %26 = vector.shape_cast %25 : vector<1x4x8xf32> to vector<4x8xf32>
    %cst_25 = arith.constant dense<0.000000e+00> : vector<256x8xf32>
    %27 = tpu.matmul %24, %26, %cst_25 {dimension_numbers = #tpu.dot_dimension_numbers<[1], [0], [0], [1], [0, 0, 1, 1], [], []>} : vector<256x4xf32>, vector<4x8xf32>, vector<256x8xf32> -> vector<256x8xf32>
    %c0_26 = arith.constant 0 : index
    %c1_27 = arith.constant 1 : index
    %c0_28 = arith.constant 0 : index
    %c0_29 = arith.constant 0 : index
    %28 = vector.load %arg7[%c0_26, %c1_27, %c0_28, %c0_29] : memref<1x18x18x4xf32, #tpu.memory_space<vmem>>, vector<1x16x16x4xf32>
    %29 = vector.shape_cast %28 : vector<1x16x16x4xf32> to vector<256x4xf32>
    %30 = vector.extract_strided_slice %9 {offsets = [3, 0, 0], sizes = [1, 4, 8], strides = [1, 1, 1]} : vector<9x4x8xf32> to vector<1x4x8xf32>
    %31 = vector.shape_cast %30 : vector<1x4x8xf32> to vector<4x8xf32>
    %cst_30 = arith.constant dense<0.000000e+00> : vector<256x8xf32>
    %32 = tpu.matmul %29, %31, %cst_30 {dimension_numbers = #tpu.dot_dimension_numbers<[1], [0], [0], [1], [0, 0, 1, 1], [], []>} : vector<256x4xf32>, vector<4x8xf32>, vector<256x8xf32> -> vector<256x8xf32>
    %c0_31 = arith.constant 0 : index
    %c1_32 = arith.constant 1 : index
    %c1_33 = arith.constant 1 : index
    %c0_34 = arith.constant 0 : index
    %33 = vector.load %arg7[%c0_31, %c1_32, %c1_33, %c0_34] : memref<1x18x18x4xf32, #tpu.memory_space<vmem>>, vector<1x16x16x4xf32>
    %34 = vector.shape_cast %33 : vector<1x16x16x4xf32> to vector<256x4xf32>
    %35 = vector.extract_strided_slice %9 {offsets = [4, 0, 0], sizes = [1, 4, 8], strides = [1, 1, 1]} : vector<9x4x8xf32> to vector<1x4x8xf32>
    %36 = vector.shape_cast %35 : vector<1x4x8xf32> to vector<4x8xf32>
    %cst_35 = arith.constant dense<0.000000e+00> : vector<256x8xf32>
    %37 = tpu.matmul %34, %36, %cst_35 {dimension_numbers = #tpu.dot_dimension_numbers<[1], [0], [0], [1], [0, 0, 1, 1], [], []>} : vector<256x4xf32>, vector<4x8xf32>, vector<256x8xf32> -> vector<256x8xf32>
    %c0_36 = arith.constant 0 : index
    %c1_37 = arith.constant 1 : index
    %c2_38 = arith.constant 2 : index
    %c0_39 = arith.constant 0 : index
    %38 = vector.load %arg7[%c0_36, %c1_37, %c2_38, %c0_39] : memref<1x18x18x4xf32, #tpu.memory_space<vmem>>, vector<1x16x16x4xf32>
    %39 = vector.shape_cast %38 : vector<1x16x16x4xf32> to vector<256x4xf32>
    %40 = vector.extract_strided_slice %9 {offsets = [5, 0, 0], sizes = [1, 4, 8], strides = [1, 1, 1]} : vector<9x4x8xf32> to vector<1x4x8xf32>
    %41 = vector.shape_cast %40 : vector<1x4x8xf32> to vector<4x8xf32>
    %cst_40 = arith.constant dense<0.000000e+00> : vector<256x8xf32>
    %42 = tpu.matmul %39, %41, %cst_40 {dimension_numbers = #tpu.dot_dimension_numbers<[1], [0], [0], [1], [0, 0, 1, 1], [], []>} : vector<256x4xf32>, vector<4x8xf32>, vector<256x8xf32> -> vector<256x8xf32>
    %c0_41 = arith.constant 0 : index
    %c2_42 = arith.constant 2 : index
    %c0_43 = arith.constant 0 : index
    %c0_44 = arith.constant 0 : index
    %43 = vector.load %arg7[%c0_41, %c2_42, %c0_43, %c0_44] : memref<1x18x18x4xf32, #tpu.memory_space<vmem>>, vector<1x16x16x4xf32>
    %44 = vector.shape_cast %43 : vector<1x16x16x4xf32> to vector<256x4xf32>
    %45 = vector.extract_strided_slice %9 {offsets = [6, 0, 0], sizes = [1, 4, 8], strides = [1, 1, 1]} : vector<9x4x8xf32> to vector<1x4x8xf32>
    %46 = vector.shape_cast %45 : vector<1x4x8xf32> to vector<4x8xf32>
    %cst_45 = arith.constant dense<0.000000e+00> : vector<256x8xf32>
    %47 = tpu.matmul %44, %46, %cst_45 {dimension_numbers = #tpu.dot_dimension_numbers<[1], [0], [0], [1], [0, 0, 1, 1], [], []>} : vector<256x4xf32>, vector<4x8xf32>, vector<256x8xf32> -> vector<256x8xf32>
    %c0_46 = arith.constant 0 : index
    %c2_47 = arith.constant 2 : index
    %c1_48 = arith.constant 1 : index
    %c0_49 = arith.constant 0 : index
    %48 = vector.load %arg7[%c0_46, %c2_47, %c1_48, %c0_49] : memref<1x18x18x4xf32, #tpu.memory_space<vmem>>, vector<1x16x16x4xf32>
    %49 = vector.shape_cast %48 : vector<1x16x16x4xf32> to vector<256x4xf32>
    %50 = vector.extract_strided_slice %9 {offsets = [7, 0, 0], sizes = [1, 4, 8], strides = [1, 1, 1]} : vector<9x4x8xf32> to vector<1x4x8xf32>
    %51 = vector.shape_cast %50 : vector<1x4x8xf32> to vector<4x8xf32>
    %cst_50 = arith.constant dense<0.000000e+00> : vector<256x8xf32>
    %52 = tpu.matmul %49, %51, %cst_50 {dimension_numbers = #tpu.dot_dimension_numbers<[1], [0], [0], [1], [0, 0, 1, 1], [], []>} : vector<256x4xf32>, vector<4x8xf32>, vector<256x8xf32> -> vector<256x8xf32>
    %c0_51 = arith.constant 0 : index
    %c2_52 = arith.constant 2 : index
    %c2_53 = arith.constant 2 : index
    %c0_54 = arith.constant 0 : index
    %53 = vector.load %arg7[%c0_51, %c2_52, %c2_53, %c0_54] : memref<1x18x18x4xf32, #tpu.memory_space<vmem>>, vector<1x16x16x4xf32>
    %54 = vector.shape_cast %53 : vector<1x16x16x4xf32> to vector<256x4xf32>
    %55 = vector.extract_strided_slice %9 {offsets = [8, 0, 0], sizes = [1, 4, 8], strides = [1, 1, 1]} : vector<9x4x8xf32> to vector<1x4x8xf32>
    %56 = vector.shape_cast %55 : vector<1x4x8xf32> to vector<4x8xf32>
    %cst_55 = arith.constant dense<0.000000e+00> : vector<256x8xf32>
    %57 = tpu.matmul %54, %56, %cst_55 {dimension_numbers = #tpu.dot_dimension_numbers<[1], [0], [0], [1], [0, 0, 1, 1], [], []>} : vector<256x4xf32>, vector<4x8xf32>, vector<256x8xf32> -> vector<256x8xf32>
    %58 = arith.addf %17, %22 : vector<256x8xf32>
    %59 = arith.addf %27, %32 : vector<256x8xf32>
    %60 = arith.addf %37, %42 : vector<256x8xf32>
    %61 = arith.addf %47, %52 : vector<256x8xf32>
    %62 = arith.addf %58, %59 : vector<256x8xf32>
    %63 = arith.addf %60, %61 : vector<256x8xf32>
    %64 = arith.addf %62, %63 : vector<256x8xf32>
    %65 = arith.addf %64, %57 : vector<256x8xf32>
    %cst_56 = arith.constant 0.000000e+00 : f32
    %66 = vector.broadcast %cst_56 : f32 to vector<256x8xf32>
    %67 = arith.maximumf %65, %66 : vector<256x8xf32>
    %cst_57 = arith.constant dense<0.000000e+00> : vector<256x4xf32>
    %68 = tpu.matmul %67, %12, %cst_57 {dimension_numbers = #tpu.dot_dimension_numbers<[1], [0], [0], [1], [0, 0, 1, 1], [], []>} : vector<256x8xf32>, vector<8x4xf32>, vector<256x4xf32> -> vector<256x4xf32>
    %69 = vector.shape_cast %68 : vector<256x4xf32> to vector<1x16x16x4xf32>
    %70 = arith.addf %3, %69 : vector<1x16x16x4xf32>
    %c1_i32 = arith.constant 1 : i32
    %71 = arith.cmpi slt, %arg1, %c1_i32 : i32
    %72 = arith.extui %71 : i1 to i32
    %c0_i32_58 = arith.constant 0 : i32
    %73 = arith.cmpi ne, %72, %c0_i32_58 : i32
    scf.if %73 {
      %c0_61 = arith.constant 0 : index
      %c0_62 = arith.constant 0 : index
      %c0_63 = arith.constant 0 : index
      %c0_64 = arith.constant 0 : index
      %77 = vector.load %arg6[%c0_61, %c0_62, %c0_63, %c0_64] : memref<1x16x16x4xf32, #tpu.memory_space<vmem>>, vector<1x16x16x4xf32>
      tpu.vector_store %arg6[%c0_61, %c0_62, %c0_63, %c0_64], %70 {strides = array<i32>} : memref<1x16x16x4xf32, #tpu.memory_space<vmem>>, vector<1x16x16x4xf32>,
    } else {
    }
    %c1_i32_59 = arith.constant 1 : i32
    %74 = arith.cmpi eq, %arg1, %c1_i32_59 : i32
    %75 = arith.extui %74 : i1 to i32
    %c0_i32_60 = arith.constant 0 : i32
    %76 = arith.cmpi ne, %75, %c0_i32_60 : i32
    scf.if %76 {
      %cst_61 = arith.constant 0.000000e+00 : f32
      %77 = vector.broadcast %cst_61 : f32 to vector<1x16x16x4xf32>
      %78 = arith.maximumf %70, %77 : vector<1x16x16x4xf32>
      %c0_62 = arith.constant 0 : index
      %c0_63 = arith.constant 0 : index
      %c0_64 = arith.constant 0 : index
      %c0_65 = arith.constant 0 : index
      %79 = vector.load %arg5[%c0_62, %c0_63, %c0_64, %c0_65] : memref<1x16x16x4xf32, #tpu.memory_space<vmem>>, vector<1x16x16x4xf32>
      tpu.vector_store %arg5[%c0_62, %c0_63, %c0_64, %c0_65], %78 {strides = array<i32>} : memref<1x16x16x4xf32, #tpu.memory_space<vmem>>, vector<1x16x16x4xf32>,
    } else {
    }
    return
  }
  func.func @transform_0(%arg0: i32, %arg1: i32) -> (i32, i32, i32, i32) {
    %c0_i32 = arith.constant 0 : i32
    %c0_i32_0 = arith.constant 0 : i32
    %c0_i32_1 = arith.constant 0 : i32
    %c0_i32_2 = arith.constant 0 : i32
    return %arg0, %c0_i32, %c0_i32_0, %c0_i32_1 : i32, i32, i32, i32
  }
  func.func @transform_1(%arg0: i32, %arg1: i32) -> (i32, i32, i32, i32) {
    %c0_i32 = arith.constant 0 : i32
    %c0_i32_0 = arith.constant 0 : i32
    %c0_i32_1 = arith.constant 0 : i32
    %c0_i32_2 = arith.constant 0 : i32
    %c0_i32_3 = arith.constant 0 : i32
    return %c0_i32, %c0_i32_0, %c0_i32_1, %c0_i32_2 : i32, i32, i32, i32
  }
  func.func @transform_2(%arg0: i32, %arg1: i32) -> (i32, i32, i32) {
    %c0_i32 = arith.constant 0 : i32
    %c0_i32_0 = arith.constant 0 : i32
    %c0_i32_1 = arith.constant 0 : i32
    %c0_i32_2 = arith.constant 0 : i32
    return %c0_i32, %c0_i32_0, %c0_i32_1 : i32, i32, i32
  }
  func.func @transform_3(%arg0: i32, %arg1: i32) -> (i32, i32, i32, i32) {
    %c0_i32 = arith.constant 0 : i32
    %c0_i32_0 = arith.constant 0 : i32
    %c0_i32_1 = arith.constant 0 : i32
    %c0_i32_2 = arith.constant 0 : i32
    return %arg0, %c0_i32, %c0_i32_0, %c0_i32_1 : i32, i32, i32, i32
  }
}

</mosaic_0001>

<bundles_post_ra>
// kernel: tpu_custom_call.1
= control target key start
LH: loop header
LB: loop body
LE: loop exit
PB: predicated region body
PF: predicated region fallthrough
CT: control target
= control target key end

     0   :  { %s3665_s12 = smov 0   ;;  %s3667_s13 = smov 0   ;;  %s5431_s0 = inlined_call_operand.vmem [shape: f32[2,16,16,4], index: 0, kind: input, shape index: {}]   ;;  %s5432_s1 = inlined_call_operand.vmem [shape: f32[2,9,4,8], index: 1, kind: input, shape index: {}]   ;;  %s5433_s2 = inlined_call_operand.vmem [shape: f32[2,8,4], index: 2, kind: input, shape index: {}]   ;;  %s5434_s3 = inlined_call_operand.vmem [shape: f32[2,16,16,4], index: 3, kind: output, shape index: {}]  }
   0x1   :  { %s3669_s14 = smov 0   ;;  %s3671_s15 = smov 0  }
   0x2   :  { %s3673_s16 = smov 0  }
   0x3 LB: > { %s22_s17 = sadd.s32 1, %s3634_s14  ;;  %s25_s18 = sadd.s32 1, %s3638_s15  ;;  %s3642_s16 = sphi %s3673_s16, %s13_s16   ;;  %s3638_s15 = sphi %s3671_s15, %s5750_s15   ;;  %s3634_s14 = sphi %s3669_s14, %s5749_s14   ;;  %s3630_s13 = sphi %s3667_s13, %s5748_s13   ;;  %s3626_s12 = sphi %s3665_s12, %s5747_s12  }
   0x4   : > { %p23_p0 = scmp.ge.s32.totalorder %s22_s17, 2  ;;  %p3187_p1 = scmp.ge.s32.totalorder %s3642_s16, 1 }
   0x5   : > { %p149_p2 = scmp.lt.s32.totalorder %s3642_s16, 5 }
   0x6   : > { %s5752_s17 = smov (%p23_p0, %s22_s17), 0  ;;  %s5754_s18 = smov (!%p23_p0, %s25_s18), %s3638_s15 }
   0x7   : > { %p150_p3 = pnand %p3187_p1, %p149_p2  ;;  %p27_p4 = scmp.ge.s32.totalorder %s5754_s18, 2 }
   0x9   : > { %s5756_s18 = smov (%p27_p4, %s5754_s18), 0  ;;  %153 = sbr.rel (%p150_p3) target bundleno = 1083 (0x43b), region = 32 }
   0xe   : > { %p173_p5 = scmp.lt.s32.totalorder %s3630_s13, 1  ;;  %p3192_p6 = scmp.ne.s32.totalorder %s3626_s12, 0 }
  0x10   : > { %s5758_s13 = smov (!%p173_p5, %s3630_s13), 1  ;;  %186 = sbr.rel (%p3192_p6) target bundleno = 96 (0x60), region = 36 }
  0x11   : > { %s3527_s19 = sshll.u32 %s5758_s13, 8 }
  0x12   : > { %s3700_s22 = scalar_lea.vmem %s5431_s0, %s3527_s19  ;;  %s3705_s25 = scalar_lea.vmem %s5434_s3, %s3527_s19 }
  0x15   : > { %vm219_vm0 = vcmask 31744   ;;  %v3644_v0 = vmov 0.0   ;;  %vm254_vm1 = vcmask 25600   ;;  %v187_v1 = vld [vmem:[%s3700_s22] sm:$0xff]  ;;  %v188_v2 = vld [vmem:[%s3700_s22 + $0x8] sm:$0xff]  ;;  %v189_v3 = vld [vmem:[%s3700_s22 + $0x10] sm:$0xff] }
  0x16   : > { %252 = vst.msk [vmem:[#allocation3] sm:$0xff] %vm219_vm0, %v3644_v0  ;;  %v190_v4 = vld [vmem:[%s3700_s22 + $0x18] sm:$0xff]  ;;  %v191_v5 = vld [vmem:[%s3700_s22 + $0x20] sm:$0xff]  ;;  %v192_v6 = vld [vmem:[%s3700_s22 + $0x28] sm:$0xff]  ;;  %vm260_vm2 = vcmask 24576  }
  0x17   : > { %253 = vst.msk [vmem:[#allocation3 + $0x8] sm:$0xff] %vm219_vm0, %v3644_v0  ;;  %v193_v7 = vld [vmem:[%s3700_s22 + $0x30] sm:$0xff]  ;;  %v194_v8 = vld [vmem:[%s3700_s22 + $0x38] sm:$0xff]  ;;  %v195_v9 = vld [vmem:[%s3700_s22 + $0x40] sm:$0xff] }
  0x18   : > { %257 = vst.msk [vmem:[#allocation3 + $0x198] sm:$0xff] %vm219_vm0, %v3644_v0  ;;  %v196_v10 = vld [vmem:[%s3700_s22 + $0x48] sm:$0xff]  ;;  %v197_v11 = vld [vmem:[%s3700_s22 + $0x50] sm:$0xff]  ;;  %v198_v12 = vld [vmem:[%s3700_s22 + $0x58] sm:$0xff] }
  0x19   : > { %258 = vst.msk [vmem:[#allocation3 + $0x1a0] sm:$0xff] %vm219_vm0, %v3644_v0  ;;  %v199_v13 = vld [vmem:[%s3700_s22 + $0x60] sm:$0xff]  ;;  %v200_v14 = vld [vmem:[%s3700_s22 + $0x68] sm:$0xff]  ;;  %v201_v15 = vld [vmem:[%s3700_s22 + $0x70] sm:$0xff] }
  0x1a   : > { %255 = vst.msk [vmem:[#allocation3 + $0x10] sm:$0x3] %vm254_vm1, %v3644_v0  ;;  %v202_v16 = vld [vmem:[%s3700_s22 + $0x78] sm:$0xff]  ;;  %v203_v17 = vld [vmem:[%s3700_s22 + $0x80] sm:$0xff]  ;;  %v204_v18 = vld [vmem:[%s3700_s22 + $0x88] sm:$0xff] }
  0x1b   : > { %259 = vst.msk [vmem:[#allocation3 + $0x1a8] sm:$0x3] %vm254_vm1, %v3644_v0  ;;  %v205_v19 = vld [vmem:[%s3700_s22 + $0x90] sm:$0xff]  ;;  %v206_v20 = vld [vmem:[%s3700_s22 + $0x98] sm:$0xff]  ;;  %v207_v21 = vld [vmem:[%s3700_s22 + $0xa0] sm:$0xff] }
  0x1c   : > { %220 = vst.msk [vmem:[#allocation2] sm:$0xff] %vm219_vm0, %v187_v1  ;;  %v208_v22 = vld [vmem:[%s3700_s22 + $0xa8] sm:$0xff]  ;;  %v209_v23 = vld [vmem:[%s3700_s22 + $0xb0] sm:$0xff]  ;;  %v210_v24 = vld [vmem:[%s3700_s22 + $0xb8] sm:$0xff] }
  0x1d   : > { %221 = vst.msk [vmem:[#allocation2 + $0x8] sm:$0xff] %vm219_vm0, %v188_v2  ;;  %v211_v25 = vld [vmem:[%s3700_s22 + $0xc0] sm:$0xff]  ;;  %v212_v26 = vld [vmem:[%s3700_s22 + $0xc8] sm:$0xff]  ;;  %v213_v27 = vld [vmem:[%s3700_s22 + $0xd0] sm:$0xff] }
  0x1e   : > { %222 = vst.msk [vmem:[#allocation2 + $0x10] sm:$0xff] %vm219_vm0, %v189_v3  ;;  %v214_v28 = vld [vmem:[%s3700_s22 + $0xd8] sm:$0xff]  ;;  %v215_v29 = vld [vmem:[%s3700_s22 + $0xe0] sm:$0xff]  ;;  %v216_v30 = vld [vmem:[%s3700_s22 + $0xe8] sm:$0xff] }
  0x1f   : > { %223 = vst.msk [vmem:[#allocation2 + $0x18] sm:$0xff] %vm219_vm0, %v190_v4  ;;  %v217_v31 = vld [vmem:[%s3700_s22 + $0xf0] sm:$0xff]  ;;  %v218_v32 = vld [vmem:[%s3700_s22 + $0xf8] sm:$0xff] }
  0x20   : > { %224 = vst.msk [vmem:[#allocation2 + $0x20] sm:$0xff] %vm219_vm0, %v191_v5 }
  0x21   : > { %225 = vst.msk [vmem:[#allocation2 + $0x28] sm:$0xff] %vm219_vm0, %v192_v6 }
  0x22   : > { %226 = vst.msk [vmem:[#allocation2 + $0x30] sm:$0xff] %vm219_vm0, %v193_v7 }
  0x23   : > { %227 = vst.msk [vmem:[#allocation2 + $0x38] sm:$0xff] %vm219_vm0, %v194_v8 }
  0x24   : > { %228 = vst.msk [vmem:[#allocation2 + $0x40] sm:$0xff] %vm219_vm0, %v195_v9 }
  0x25   : > { %229 = vst.msk [vmem:[#allocation2 + $0x48] sm:$0xff] %vm219_vm0, %v196_v10 }
  0x26   : > { %230 = vst.msk [vmem:[#allocation2 + $0x50] sm:$0xff] %vm219_vm0, %v197_v11 }
  0x27   : > { %231 = vst.msk [vmem:[#allocation2 + $0x58] sm:$0xff] %vm219_vm0, %v198_v12 }
  0x28   : > { %232 = vst.msk [vmem:[#allocation2 + $0x60] sm:$0xff] %vm219_vm0, %v199_v13 }
  0x29   : > { %233 = vst.msk [vmem:[#allocation2 + $0x68] sm:$0xff] %vm219_vm0, %v200_v14 }
  0x2a   : > { %234 = vst.msk [vmem:[#allocation2 + $0x70] sm:$0xff] %vm219_vm0, %v201_v15 }
  0x2b   : > { %235 = vst.msk [vmem:[#allocation2 + $0x78] sm:$0xff] %vm219_vm0, %v202_v16 }
  0x2c   : > { %236 = vst.msk [vmem:[#allocation2 + $0x80] sm:$0xff] %vm219_vm0, %v203_v17 }
  0x2d   : > { %237 = vst.msk [vmem:[#allocation2 + $0x88] sm:$0xff] %vm219_vm0, %v204_v18 }
  0x2e   : > { %238 = vst.msk [vmem:[#allocation2 + $0x90] sm:$0xff] %vm219_vm0, %v205_v19 }
  0x2f   : > { %239 = vst.msk [vmem:[#allocation2 + $0x98] sm:$0xff] %vm219_vm0, %v206_v20 }
  0x30   : > { %240 = vst.msk [vmem:[#allocation2 + $0xa0] sm:$0xff] %vm219_vm0, %v207_v21 }
  0x31   : > { %241 = vst.msk [vmem:[#allocation2 + $0xa8] sm:$0xff] %vm219_vm0, %v208_v22 }
  0x32   : > { %242 = vst.msk [vmem:[#allocation2 + $0xb0] sm:$0xff] %vm219_vm0, %v209_v23 }
  0x33   : > { %243 = vst.msk [vmem:[#allocation2 + $0xb8] sm:$0xff] %vm219_vm0, %v210_v24 }
  0x34   : > { %244 = vst.msk [vmem:[#allocation2 + $0xc0] sm:$0xff] %vm219_vm0, %v211_v25 }
  0x35   : > { %245 = vst.msk [vmem:[#allocation2 + $0xc8] sm:$0xff] %vm219_vm0, %v212_v26 }
  0x36   : > { %246 = vst.msk [vmem:[#allocation2 + $0xd0] sm:$0xff] %vm219_vm0, %v213_v27 }
  0x37   : > { %247 = vst.msk [vmem:[#allocation2 + $0xd8] sm:$0xff] %vm219_vm0, %v214_v28 }
  0x38   : > { %248 = vst.msk [vmem:[#allocation2 + $0xe0] sm:$0xff] %vm219_vm0, %v215_v29 }
  0x39   : > { %249 = vst.msk [vmem:[#allocation2 + $0xe8] sm:$0xff] %vm219_vm0, %v216_v30 }
  0x3a   : > { %250 = vst.msk [vmem:[#allocation2 + $0xf0] sm:$0xff] %vm219_vm0, %v217_v31 }
  0x3b   : > { %251 = vst.msk [vmem:[#allocation2 + $0xf8] sm:$0xff] %vm219_vm0, %v218_v32 }
  0x3c   : > { %261 = vst.msk [vmem:[#allocation3] sm:$0x1] %vm260_vm2, %v3644_v0 }
  0x3d   : > { %262 = vst.msk [vmem:[#allocation3 + $0x18] sm:$0x1] %vm260_vm2, %v3644_v0 }
  0x3e   : > { %263 = vst.msk [vmem:[#allocation3 + $0x30] sm:$0x1] %vm260_vm2, %v3644_v0 }
  0x3f   : > { %264 = vst.msk [vmem:[#allocation3 + $0x48] sm:$0x1] %vm260_vm2, %v3644_v0 }
  0x40   : > { %265 = vst.msk [vmem:[#allocation3 + $0x60] sm:$0x1] %vm260_vm2, %v3644_v0 }
  0x41   : > { %266 = vst.msk [vmem:[#allocation3 + $0x78] sm:$0x1] %vm260_vm2, %v3644_v0 }
  0x42   : > { %267 = vst.msk [vmem:[#allocation3 + $0x90] sm:$0x1] %vm260_vm2, %v3644_v0 }
  0x43   : > { %268 = vst.msk [vmem:[#allocation3 + $0xa8] sm:$0x1] %vm260_vm2, %v3644_v0 }
  0x44   : > { %269 = vst.msk [vmem:[#allocation3 + $0xc0] sm:$0x1] %vm260_vm2, %v3644_v0 }
  0x45   : > { %270 = vst.msk [vmem:[#allocation3 + $0xd8] sm:$0x1] %vm260_vm2, %v3644_v0 }
  0x46   : > { %271 = vst.msk [vmem:[#allocation3 + $0xf0] sm:$0x1] %vm260_vm2, %v3644_v0 }
  0x47   : > { %272 = vst.msk [vmem:[#allocation3 + $0x108] sm:$0x1] %vm260_vm2, %v3644_v0 }
  0x48   : > { %273 = vst.msk [vmem:[#allocation3 + $0x120] sm:$0x1] %vm260_vm2, %v3644_v0 }
  0x49   : > { %274 = vst.msk [vmem:[#allocation3 + $0x138] sm:$0x1] %vm260_vm2, %v3644_v0 }
  0x4a   : > { %275 = vst.msk [vmem:[#allocation3 + $0x150] sm:$0x1] %vm260_vm2, %v3644_v0 }
  0x4b   : > { %276 = vst.msk [vmem:[#allocation3 + $0x168] sm:$0x1] %vm260_vm2, %v3644_v0 }
  0x4c   : > { %277 = vst.msk [vmem:[#allocation3 + $0x180] sm:$0x1] %vm260_vm2, %v3644_v0 }
  0x4d   : > { %278 = vst.msk [vmem:[#allocation3 + $0x198] sm:$0x1] %vm260_vm2, %v3644_v0 }
  0x4e   : > { %279 = vst.msk [vmem:[#allocation3 + $0x11] sm:$0x1] %vm260_vm2, %v3644_v0 }
  0x4f   : > { %280 = vst.msk [vmem:[#allocation3 + $0x29] sm:$0x1] %vm260_vm2, %v3644_v0 }
  0x50   : > { %281 = vst.msk [vmem:[#allocation3 + $0x41] sm:$0x1] %vm260_vm2, %v3644_v0 }
  0x51   : > { %282 = vst.msk [vmem:[#allocation3 + $0x59] sm:$0x1] %vm260_vm2, %v3644_v0 }
  0x52   : > { %283 = vst.msk [vmem:[#allocation3 + $0x71] sm:$0x1] %vm260_vm2, %v3644_v0 }
  0x53   : > { %284 = vst.msk [vmem:[#allocation3 + $0x89] sm:$0x1] %vm260_vm2, %v3644_v0 }
  0x54   : > { %285 = vst.msk [vmem:[#allocation3 + $0xa1] sm:$0x1] %vm260_vm2, %v3644_v0 }
  0x55   : > { %286 = vst.msk [vmem:[#allocation3 + $0xb9] sm:$0x1] %vm260_vm2, %v3644_v0 }
  0x56   : > { %287 = vst.msk [vmem:[#allocation3 + $0xd1] sm:$0x1] %vm260_vm2, %v3644_v0 }
  0x57   : > { %288 = vst.msk [vmem:[#allocation3 + $0xe9] sm:$0x1] %vm260_vm2, %v3644_v0 }
  0x58   : > { %289 = vst.msk [vmem:[#allocation3 + $0x101] sm:$0x1] %vm260_vm2, %v3644_v0 }
  0x59   : > { %290 = vst.msk [vmem:[#allocation3 + $0x119] sm:$0x1] %vm260_vm2, %v3644_v0 }
  0x5a   : > { %291 = vst.msk [vmem:[#allocation3 + $0x131] sm:$0x1] %vm260_vm2, %v3644_v0 }
  0x5b   : > { %292 = vst.msk [vmem:[#allocation3 + $0x149] sm:$0x1] %vm260_vm2, %v3644_v0 }
  0x5c   : > { %293 = vst.msk [vmem:[#allocation3 + $0x161] sm:$0x1] %vm260_vm2, %v3644_v0 }
  0x5d   : > { %294 = vst.msk [vmem:[#allocation3 + $0x179] sm:$0x1] %vm260_vm2, %v3644_v0 }
  0x5e   : > { %295 = vst.msk [vmem:[#allocation3 + $0x191] sm:$0x1] %vm260_vm2, %v3644_v0 }
  0x5f   : > { %296 = vst.msk [vmem:[#allocation3 + $0x1a9] sm:$0x1] %vm260_vm2, %v3644_v0 }
  0x60 PF: > { %s395_s26 = smul.u32 36, %s3626_s12  ;;  %vm362_vm3 = vcmask 31744   ;;  %v311_v33 = vld [vmem:[#allocation2 + $0x70] sm:$0xff]  ;;  %v297_v34 = vld [vmem:[#allocation2] sm:$0xff]  ;;  %vm569_vm4 = vcmask 1043456   ;;  %v312_v39 = vld [vmem:[#allocation2 + $0x78] sm:$0xff] }
  0x61   : > { %v441_v35 = vld [vmem:[#allocation3 + $0x1] sm:$0xff]  ;;  %v343_v36 = vmax.f32 %v311_v33, 0.0  ;;  %v329_v37 = vmax.f32 %v297_v34, 0.0  ;;  %v344_v41 = vmax.f32 %v312_v39, 0.0  ;;  %v299_v44 = vld [vmem:[#allocation2 + $0x10] sm:$0xff]  ;;  %v300_v54 = vld [vmem:[#allocation2 + $0x18] sm:$0xff] }
  0x62   : > { %v313_v38 = vld [vmem:[#allocation2 + $0x80] sm:$0xff]  ;;  %s3858_s29 = scalar_lea.vmem %s5432_s1, %s395_s26  ;;  %v298_v42 = vld [vmem:[#allocation2 + $0x8] sm:$0xff]  ;;  %v331_v52 = vmax.f32 %v299_v44, 0.0  ;;  %v315_v53 = vld [vmem:[#allocation2 + $0x90] sm:$0xff]  ;;  %v332_v58 = vmax.f32 %v300_v54, 0.0  ;;  %s3193_s30 = sshll.u32 %s3626_s12, 3 }
  0x63   : > { %v345_v40 = vmax.f32 %v313_v38, 0.0  ;;  %v314_v43 = vld [vmem:[#allocation2 + $0x88] sm:$0xff]  ;;  %v398_v45 = vld [vmem:[%s3858_s29 + $0x4] sm:$0xf]  ;;  %377 = vst.msk [vmem:[#allocation3 + $0xc1] sm:$0xff] %vm362_vm3, %v343_v36  ;;  %v330_v47 = vmax.f32 %v298_v42, 0.0  ;;  %s407_s6 = scalar_lea.vmem %s5433_s2, %s3193_s30 }
  0x64   : > { %v400_v46 = vld [vmem:[%s3858_s29 + $0xc] sm:$0xf]  ;;  %3194 = vmatpush.msk.msra.mxu0 %vm569_vm4, %v398_v45  ;;  %3529 = vmatpush.msk.msra.mxu2 %vm569_vm4, %v398_v45  ;;  %363 = vst.msk [vmem:[#allocation3 + $0x19] sm:$0xff] %vm362_vm3, %v329_v37  ;;  %v402_v48 = vld [vmem:[%s3858_s29 + $0x14] sm:$0xf]  ;;  %v346_v50 = vmax.f32 %v314_v43, 0.0 }
  0x65   : > { %v404_v49 = vld [vmem:[%s3858_s29 + $0x1c] sm:$0xf]  ;;  %3195 = vmatmul.msk.f32.vlgmr.msra.gmra.mxu0 %vm362_vm3, %v441_v35  ;;  %3227 = vmatpush.msk.msra.mxu1 %vm569_vm4, %v400_v46  ;;  %379 = vst.msk [vmem:[#allocation3 + $0xd9] sm:$0xff] %vm362_vm3, %v345_v40  ;;  %v405_v51 = vld [vmem:[%s3858_s29 + $0x20] sm:$0xf]  ;;  %v347_v55 = vmax.f32 %v315_v53, 0.0 }
  0x66   : > { %3530 = vmatpush.msk.msra.mxu3 %vm569_vm4, %v400_v46  ;;  %3260 = vmatpush.msk.msrb.mxu2 %vm569_vm4, %v402_v48  ;;  %378 = vst.msk [vmem:[#allocation3 + $0xc9] sm:$0xff] %vm362_vm3, %v344_v41  ;;  %v316_v56 = vld [vmem:[#allocation2 + $0x98] sm:$0xff]  ;;  %v301_v57 = vld [vmem:[#allocation2 + $0x20] sm:$0xff]  ;;  %v442_v61 = vld [vmem:[#allocation3 + $0x9] sm:$0xff]  ;;  %vm2767_vm5 = vcmask 64512   ;;  %p3523_p7 = scmp.ge.s32.totalorder %s3626_s12, 1 }
  0x67   : > { %3326 = vmatpush.msk.msrb.mxu0 %vm569_vm4, %v405_v51  ;;  %364 = vst.msk [vmem:[#allocation3 + $0x21] sm:$0xff] %vm362_vm3, %v330_v47  ;;  %v317_v59 = vld [vmem:[#allocation2 + $0xa0] sm:$0xff]  ;;  %v348_v60 = vmax.f32 %v316_v56, 0.0  ;;  %v333_v62 = vmax.f32 %v301_v57, 0.0  ;;  %v302_v1 = vld [vmem:[#allocation2 + $0x28] sm:$0xff]  ;;  %v303_v11 = vld [vmem:[#allocation2 + $0x30] sm:$0xff] }
  0x68   : > { %3293 = vmatpush.msk.msrb.mxu3 %vm569_vm4, %v404_v49  ;;  %380 = vst.msk [vmem:[#allocation3 + $0xe1] sm:$0xff] %vm362_vm3, %v346_v50  ;;  %v349_v0 = vmax.f32 %v317_v59, 0.0  ;;  %v318_v2 = vld [vmem:[#allocation2 + $0xa8] sm:$0xff]  ;;  %v334_v4 = vmax.f32 %v302_v1, 0.0  ;;  %v335_v12 = vmax.f32 %v303_v11, 0.0  ;;  %v319_v13 = vld [vmem:[#allocation2 + $0xb0] sm:$0xff] }
  0x69   : > { %365 = vst.msk [vmem:[#allocation3 + $0x31] sm:$0xff] %vm362_vm3, %v331_v52  ;;  %v350_v6 = vmax.f32 %v318_v2, 0.0  ;;  %v351_v14 = vmax.f32 %v319_v13, 0.0  ;;  %v304_v19 = vld [vmem:[#allocation2 + $0x38] sm:$0xff]  ;;  %v305_v27 = vld [vmem:[#allocation2 + $0x40] sm:$0xff]  ;;  %v306_v35 = vld [vmem:[#allocation2 + $0x48] sm:$0xff] }
  0x6a   : > { %v3880_v63 = vld [vmem:[#allocation3 + $0xc1] sm:$0xff]  ;;  %381 = vst.msk [vmem:[#allocation3 + $0xf1] sm:$0xff] %vm362_vm3, %v347_v55  ;;  %v320_v20 = vld [vmem:[#allocation2 + $0xb8] sm:$0xff]  ;;  %v336_v21 = vmax.f32 %v304_v19, 0.0  ;;  %v337_v29 = vmax.f32 %v305_v27, 0.0  ;;  %v338_v37 = vmax.f32 %v306_v35, 0.0 }
  0x6b   : > { %3211 = vmatmul.msk.f32.vlgmr.msra.gmra.mxu2 %vm362_vm3, %v3880_v63  ;;  %v3885_v3 = vld [vmem:[#allocation3 + $0x18] sm:$0xff]  ;;  %366 = vst.msk [vmem:[#allocation3 + $0x39] sm:$0xff] %vm362_vm3, %v332_v58  ;;  %v352_v22 = vmax.f32 %v320_v20, 0.0  ;;  %v321_v28 = vld [vmem:[#allocation2 + $0xc0] sm:$0xff]  ;;  %v322_v36 = vld [vmem:[#allocation2 + $0xc8] sm:$0xff] }
  0x6c   : > { %3228 = vmatmul.msk.f32.vlgmr.msra.gmra.mxu1 %vm362_vm3, %v3885_v3  ;;  %v3890_v5 = vld [vmem:[#allocation3 + $0xd8] sm:$0xff]  ;;  %382 = vst.msk [vmem:[#allocation3 + $0xf9] sm:$0xff] %vm362_vm3, %v348_v60  ;;  %v353_v30 = vmax.f32 %v321_v28, 0.0  ;;  %v354_v38 = vmax.f32 %v322_v36, 0.0  ;;  %v307_v43 = vld [vmem:[#allocation2 + $0x50] sm:$0xff]  ;;  %v309_v59 = vld [vmem:[#allocation2 + $0x60] sm:$0xff] }
  0x6d   : > { %3244 = vmatmul.msk.f32.vlgmr.msra.gmra.mxu3 %vm362_vm3, %v3890_v5  ;;  %3196 = vmatmul.msk.f32.gmra.mxu0 %vm362_vm3, %v442_v61  ;;  %367 = vst.msk [vmem:[#allocation3 + $0x49] sm:$0xff] %vm362_vm3, %v333_v62  ;;  %v3899_v7 = vld [vmem:[#allocation3 + $0xc9] sm:$0xff]  ;;  %v443_v10 = vld [vmem:[#allocation3 + $0x19] sm:$0xff]  ;;  %v339_v45 = vmax.f32 %v307_v43, 0.0  ;;  %v341_v61 = vmax.f32 %v309_v59, 0.0 }
  0x6e   : > { %383 = vst.msk [vmem:[#allocation3 + $0x109] sm:$0xff] %vm362_vm3, %v349_v0  ;;  %v3902_v8 = vld [vmem:[#allocation3 + $0x20] sm:$0xff]  ;;  %v323_v44 = vld [vmem:[#allocation2 + $0xd0] sm:$0xff]  ;;  %v308_v51 = vld [vmem:[#allocation2 + $0x58] sm:$0xff] }
  0x6f   : > { %368 = vst.msk [vmem:[#allocation3 + $0x51] sm:$0xff] %vm362_vm3, %v334_v4  ;;  %v3904_v9 = vld [vmem:[#allocation3 + $0xe0] sm:$0xff]  ;;  %v355_v46 = vmax.f32 %v323_v44, 0.0  ;;  %v324_v52 = vld [vmem:[#allocation2 + $0xd8] sm:$0xff]  ;;  %v340_v53 = vmax.f32 %v308_v51, 0.0  ;;  %v327_v20 = vld [vmem:[#allocation2 + $0xf0] sm:$0xff] }
  0x70   : > { %384 = vst.msk [vmem:[#allocation3 + $0x111] sm:$0xff] %vm362_vm3, %v350_v6  ;;  %v3915_v15 = vld [vmem:[#allocation3 + $0xd9] sm:$0xff]  ;;  %v3917_v16 = vld [vmem:[#allocation3 + $0x30] sm:$0xff]  ;;  %v444_v17 = vld [vmem:[#allocation3 + $0x21] sm:$0xff]  ;;  %v356_v54 = vmax.f32 %v324_v52, 0.0 }
  0x71   : > { %369 = vst.msk [vmem:[#allocation3 + $0x61] sm:$0xff] %vm362_vm3, %v335_v12  ;;  %v3919_v18 = vld [vmem:[#allocation3 + $0xf0] sm:$0xff]  ;;  %v3930_v23 = vld [vmem:[#allocation3 + $0xe1] sm:$0xff] }
  0x72   : > { %385 = vst.msk [vmem:[#allocation3 + $0x121] sm:$0xff] %vm362_vm3, %v351_v14  ;;  %v3932_v24 = vld [vmem:[#allocation3 + $0x38] sm:$0xff]  ;;  %v325_v60 = vld [vmem:[#allocation2 + $0xe0] sm:$0xff]  ;;  %v310_v6 = vld [vmem:[#allocation2 + $0x68] sm:$0xff] }
  0x73   : > { %3212 = vmatmul.msk.f32.gmra.mxu2 %vm362_vm3, %v3899_v7  ;;  %370 = vst.msk [vmem:[#allocation3 + $0x69] sm:$0xff] %vm362_vm3, %v336_v21  ;;  %v3934_v25 = vld [vmem:[#allocation3 + $0x31] sm:$0xff]  ;;  %v3952_v33 = vld [vmem:[#allocation3 + $0x39] sm:$0xff]  ;;  %v357_v62 = vmax.f32 %v325_v60, 0.0  ;;  %v342_v11 = vmax.f32 %v310_v6, 0.0  ;;  %v359_v21 = vmax.f32 %v327_v20, 0.0 }
  0x74   : > { %3229 = vmatmul.msk.f32.gmra.mxu1 %vm362_vm3, %v3902_v8  ;;  %386 = vst.msk [vmem:[#allocation3 + $0x129] sm:$0xff] %vm362_vm3, %v352_v22  ;;  %v3936_v26 = vld [vmem:[#allocation3 + $0xf8] sm:$0xff]  ;;  %v3950_v32 = vld [vmem:[#allocation3 + $0x48] sm:$0xff]  ;;  %v397_v52 = vld [vmem:[%s3858_s29] sm:$0xf] }
  0x75   : > { %3245 = vmatmul.msk.f32.gmra.mxu3 %vm362_vm3, %v3904_v9  ;;  %3197 = vmatmul.msk.f32.gmra.mxu0 %vm362_vm3, %v443_v10  ;;  %371 = vst.msk [vmem:[#allocation3 + $0x79] sm:$0xff] %vm362_vm3, %v337_v29  ;;  %v3948_v31 = vld [vmem:[#allocation3 + $0xf1] sm:$0xff]  ;;  %v3954_v34 = vld [vmem:[#allocation3 + $0x108] sm:$0xff]  ;;  %v3966_v39 = vld [vmem:[#allocation3 + $0xf9] sm:$0xff] }
  0x76   : > { %387 = vst.msk [vmem:[#allocation3 + $0x139] sm:$0xff] %vm362_vm3, %v353_v30  ;;  %v3968_v40 = vld [vmem:[#allocation3 + $0x50] sm:$0xff]  ;;  %v326_v10 = vld [vmem:[#allocation2 + $0xe8] sm:$0xff]  ;;  %v328_v30 = vld [vmem:[#allocation2 + $0xf8] sm:$0xff]  ;;  %3359 = vmatpush.msk.msrb.mxu1 %vm569_vm4, %v397_v52 }
  0x77   : > { %372 = vst.msk [vmem:[#allocation3 + $0x81] sm:$0xff] %vm362_vm3, %v338_v37  ;;  %v3970_v41 = vld [vmem:[#allocation3 + $0x49] sm:$0xff]  ;;  %v3990_v50 = vld [vmem:[#allocation3 + $0x51] sm:$0xff]  ;;  %v358_v12 = vmax.f32 %v326_v10, 0.0  ;;  %v360_v35 = vmax.f32 %v328_v30, 0.0 }
  0x78   : > { %388 = vst.msk [vmem:[#allocation3 + $0x141] sm:$0xff] %vm362_vm3, %v354_v38  ;;  %v3972_v42 = vld [vmem:[#allocation3 + $0x110] sm:$0xff]  ;;  %v3986_v48 = vld [vmem:[#allocation3 + $0x60] sm:$0xff]  ;;  %v4143_v30 = vld [vmem:[#allocation3 + $0xc8] sm:$0xff] }
  0x79   : > { %373 = vst.msk [vmem:[#allocation3 + $0x91] sm:$0xff] %vm362_vm3, %v339_v45  ;;  %v3984_v47 = vld [vmem:[#allocation3 + $0x109] sm:$0xff]  ;;  %v3988_v49 = vld [vmem:[#allocation3 + $0x120] sm:$0xff]  ;;  %v4002_v55 = vld [vmem:[#allocation3 + $0x111] sm:$0xff] }
  0x7a   : > { %389 = vst.msk [vmem:[#allocation3 + $0x151] sm:$0xff] %vm362_vm3, %v355_v46  ;;  %v4004_v56 = vld [vmem:[#allocation3 + $0x68] sm:$0xff] }
  0x7b   : > { %3213 = vmatmul.msk.f32.gmra.mxu2 %vm362_vm3, %v3915_v15  ;;  %374 = vst.msk [vmem:[#allocation3 + $0x99] sm:$0xff] %vm362_vm3, %v340_v53  ;;  %v4006_v57 = vld [vmem:[#allocation3 + $0x128] sm:$0xff] }
  0x7c   : > { %3230 = vmatmul.msk.f32.gmra.mxu1 %vm362_vm3, %v3917_v16  ;;  %390 = vst.msk [vmem:[#allocation3 + $0x159] sm:$0xff] %vm362_vm3, %v356_v54  ;;  %v4008_v58 = vld [vmem:[#allocation3 + $0x61] sm:$0xff]  ;;  %v4022_v1 = vld [vmem:[#allocation3 + $0x78] sm:$0xff]  ;;  %v4026_v4 = vld [vmem:[#allocation3 + $0x69] sm:$0xff] }
  0x7d   : > { %3246 = vmatmul.msk.f32.gmra.mxu3 %vm362_vm3, %v3919_v18  ;;  %3198 = vmatmul.msk.f32.gmra.mxu0 %vm362_vm3, %v444_v17  ;;  %375 = vst.msk [vmem:[#allocation3 + $0xa9] sm:$0xff] %vm362_vm3, %v341_v61  ;;  %v4020_v0 = vld [vmem:[#allocation3 + $0x121] sm:$0xff]  ;;  %v4024_v2 = vld [vmem:[#allocation3 + $0x138] sm:$0xff]  ;;  %v4038_v13 = vld [vmem:[#allocation3 + $0x129] sm:$0xff] }
  0x7e   : > { %391 = vst.msk [vmem:[#allocation3 + $0x169] sm:$0xff] %vm362_vm3, %v357_v62  ;;  %v4040_v14 = vld [vmem:[#allocation3 + $0x80] sm:$0xff]  ;;  %v399_v53 = vld [vmem:[%s3858_s29 + $0x8] sm:$0xf]  ;;  %v401_v54 = vld [vmem:[%s3858_s29 + $0x10] sm:$0xf] }
  0x7f   : > { %376 = vst.msk [vmem:[#allocation3 + $0xb1] sm:$0xff] %vm362_vm3, %v342_v11  ;;  %v4042_v17 = vld [vmem:[#allocation3 + $0x140] sm:$0xff]  ;;  %3392 = vmatpush.msk.msra.mxu2 %vm569_vm4, %v399_v53  ;;  %3425 = vmatpush.msk.msra.mxu3 %vm569_vm4, %v401_v54  ;;  %v403_v61 = vld [vmem:[%s3858_s29 + $0x18] sm:$0xf] }
  0x80   : > { %392 = vst.msk [vmem:[#allocation3 + $0x171] sm:$0xff] %vm362_vm3, %v358_v12  ;;  %v4044_v19 = vld [vmem:[#allocation3 + $0x79] sm:$0xff]  ;;  %v4057_v27 = vld [vmem:[#allocation3 + $0x90] sm:$0xff]  ;;  %v4061_v29 = vld [vmem:[#allocation3 + $0x81] sm:$0xff]  ;;  %3458 = vmatpush.msk.msra.mxu0 %vm569_vm4, %v403_v61 }
  0x81   : > { %393 = vst.msk [vmem:[#allocation3 + $0x181] sm:$0xff] %vm362_vm3, %v359_v21  ;;  %v4055_v22 = vld [vmem:[#allocation3 + $0x139] sm:$0xff]  ;;  %v4059_v28 = vld [vmem:[#allocation3 + $0x150] sm:$0xff]  ;;  %v4072_v36 = vld [vmem:[#allocation3 + $0x141] sm:$0xff] }
  0x82   : > { %5449 = vst [vmem:[#allocation4_spill] sm:$0xff] %v4059_v28  ;;  %v4074_v37 = vld [vmem:[#allocation3 + $0x98] sm:$0xff]  ;;  %v4130_v11 = vld [vmem:[#allocation3 + $0xc0] sm:$0xff] }
  0x83   : > { %3214 = vmatmul.msk.f32.gmra.mxu2 %vm362_vm3, %v3930_v23  ;;  %394 = vst.msk [vmem:[#allocation3 + $0x189] sm:$0xff] %vm362_vm3, %v360_v35  ;;  %v4076_v38 = vld [vmem:[#allocation3 + $0x158] sm:$0xff]  ;;  %v409_v61 = vld [vmem:[#allocation3] sm:$0xff] }
  0x84   : > { %3231 = vmatmul.msk.f32.gmra.mxu1 %vm362_vm3, %v3932_v24  ;;  %5450 = vst [vmem:[#allocation5_spill] sm:$0xff] %v4076_v38  ;;  %v4078_v43 = vld [vmem:[#allocation3 + $0x91] sm:$0xff]  ;;  %v4090_v45 = vld [vmem:[#allocation3 + $0xa8] sm:$0xff]  ;;  %v4094_v51 = vld [vmem:[#allocation3 + $0x99] sm:$0xff] }
  0x85   : > { %3247 = vmatmul.msk.f32.gmra.mxu3 %vm362_vm3, %v3936_v26  ;;  %3199 = vmatmul.msk.f32.gmra.mxu0 %vm362_vm3, %v3934_v25  ;;  %v4088_v44 = vld [vmem:[#allocation3 + $0x151] sm:$0xff]  ;;  %v4092_v46 = vld [vmem:[#allocation3 + $0x168] sm:$0xff]  ;;  %v4110_v59 = vld [vmem:[#allocation3 + $0x159] sm:$0xff] }
  0x86   : > { %5451 = vst [vmem:[#allocation6_spill] sm:$0xff] %v4092_v46  ;;  %v4112_v60 = vld [vmem:[#allocation3 + $0xb0] sm:$0xff]  ;;  %v4156_v54 = vld [vmem:[#allocation3 + $0x1a] sm:$0xff] }
  0x87   : > { %v4115_v62 = vld [vmem:[#allocation3 + $0x170] sm:$0xff] }
  0x88   : > { %5452 = vst [vmem:[#allocation7_spill] sm:$0xff] %v4115_v62  ;;  %v4117_v6 = vld [vmem:[#allocation3 + $0xa9] sm:$0xff]  ;;  %v748_v12 = vld [vmem:[#allocation3 + $0x180] sm:$0xff]  ;;  %v4132_v20 = vld [vmem:[#allocation3 + $0xb1] sm:$0xff] }
  0x89   : > { %v4128_v10 = vld [vmem:[#allocation3 + $0x169] sm:$0xff]  ;;  %v4141_v21 = vld [vmem:[#allocation3 + $0x171] sm:$0xff] }
  0x8a   : > { %v749_v52 = vld [vmem:[#allocation3 + $0x188] sm:$0xff]  ;;  %v4147_v53 = vld [vmem:[#allocation3 + $0x32] sm:$0xff] }
  0x8b   : > { %3215 = vmatmul.msk.f32.gmra.mxu2 %vm362_vm3, %v3948_v31 }
  0x8c   : > { %3232 = vmatmul.msk.f32.gmra.mxu1 %vm362_vm3, %v3950_v32 }
  0x8d   : > { %3248 = vmatmul.msk.f32.gmra.mxu3 %vm362_vm3, %v3954_v34  ;;  %3200 = vmatmul.msk.f32.gmra.mxu0 %vm362_vm3, %v3952_v33 }
  0x93   : > { %3216 = vmatmul.msk.f32.gmra.mxu2 %vm362_vm3, %v3966_v39 }
  0x94   : > { %3233 = vmatmul.msk.f32.gmra.mxu1 %vm362_vm3, %v3968_v40 }
  0x95   : > { %3249 = vmatmul.msk.f32.gmra.mxu3 %vm362_vm3, %v3972_v42  ;;  %3201 = vmatmul.msk.f32.gmra.mxu0 %vm362_vm3, %v3970_v41 }
  0x9b   : > { %3217 = vmatmul.msk.f32.gmra.mxu2 %vm362_vm3, %v3984_v47 }
  0x9c   : > { %3234 = vmatmul.msk.f32.gmra.mxu1 %vm362_vm3, %v3986_v48 }
  0x9d   : > { %3250 = vmatmul.msk.f32.gmra.mxu3 %vm362_vm3, %v3988_v49  ;;  %3202 = vmatmul.msk.f32.gmra.mxu0 %vm362_vm3, %v3990_v50 }
  0xa3   : > { %3218 = vmatmul.msk.f32.gmra.mxu2 %vm362_vm3, %v4002_v55 }
  0xa4   : > { %3235 = vmatmul.msk.f32.gmra.mxu1 %vm362_vm3, %v4004_v56 }
  0xa5   : > { %3251 = vmatmul.msk.f32.gmra.mxu3 %vm362_vm3, %v4006_v57  ;;  %3203 = vmatmul.msk.f32.gmra.mxu0 %vm362_vm3, %v4008_v58 }
  0xab   : > { %3219 = vmatmul.msk.f32.gmra.mxu2 %vm362_vm3, %v4020_v0 }
  0xac   : > { %3236 = vmatmul.msk.f32.gmra.mxu1 %vm362_vm3, %v4022_v1 }
  0xad   : > { %3252 = vmatmul.msk.f32.gmra.mxu3 %vm362_vm3, %v4024_v2  ;;  %3204 = vmatmul.msk.f32.gmra.mxu0 %vm362_vm3, %v4026_v4 }
  0xb3   : > { %3220 = vmatmul.msk.f32.gmra.mxu2 %vm362_vm3, %v4038_v13 }
  0xb4   : > { %3237 = vmatmul.msk.f32.gmra.mxu1 %vm362_vm3, %v4040_v14 }
  0xb5   : > { %3253 = vmatmul.msk.f32.gmra.mxu3 %vm362_vm3, %v4042_v17  ;;  %3205 = vmatmul.msk.f32.gmra.mxu0 %vm362_vm3, %v4044_v19 }
  0xbb   : > { %3221 = vmatmul.msk.f32.gmra.mxu2 %vm362_vm3, %v4055_v22 }
  0xbc   : > { %3238 = vmatmul.msk.f32.gmra.mxu1 %vm362_vm3, %v4057_v27 }
  0xbd   : > { %3254 = vmatmul.msk.f32.gmra.mxu3 %vm362_vm3, %v4059_v28  ;;  %3206 = vmatmul.msk.f32.gmra.mxu0 %vm362_vm3, %v4061_v29  ;;  %v4177_v28 = vld [vmem:[#allocation3 + $0x4a] sm:$0xff] }
  0xc3   : > { %3222 = vmatmul.msk.f32.gmra.mxu2 %vm362_vm3, %v4072_v36 }
  0xc4   : > { %3239 = vmatmul.msk.f32.gmra.mxu1 %vm362_vm3, %v4074_v37 }
  0xc5   : > { %3255 = vmatmul.msk.f32.gmra.mxu3 %vm362_vm3, %v4076_v38  ;;  %3207 = vmatmul.msk.f32.gmra.mxu0 %vm362_vm3, %v4078_v43 }
  0xcb   : > { %3223 = vmatmul.msk.f32.gmra.mxu2 %vm362_vm3, %v4088_v44 }
  0xcc   : > { %3240 = vmatmul.msk.f32.gmra.mxu1 %vm362_vm3, %v4090_v45 }
  0xcd   : > { %3256 = vmatmul.msk.f32.gmra.mxu3 %vm362_vm3, %v4092_v46  ;;  %3208 = vmatmul.msk.f32.gmra.mxu0 %vm362_vm3, %v4094_v51  ;;  %v4173_v46 = vld [vmem:[#allocation3 + $0x22] sm:$0xff] }
  0xd3   : > { %3224 = vmatmul.msk.f32.gmra.mxu2 %vm362_vm3, %v4110_v59 }
  0xd4   : > { %3241 = vmatmul.msk.f32.gmra.mxu1 %vm362_vm3, %v4112_v60 }
  0xd5   : > { %3257 = vmatmul.msk.f32.gmra.mxu3 %vm362_vm3, %v4115_v62  ;;  %3209 = vmatmul.msk.f32.gmra.mxu0 %vm362_vm3, %v4117_v6 }
  0xdb   : > { %3225 = vmatmul.msk.f32.gmra.mxu2 %vm362_vm3, %v4128_v10 }
  0xdc   : > { %3242 = vmatmul.msk.f32.gmra.mxu1 %vm362_vm3, %v4130_v11 }
  0xdd   : > { %3258 = vmatmul.msk.f32.gmra.mxu3 %vm362_vm3, %v748_v12  ;;  %3210 = vmatmul.msk.f32.gmra.mxu0 %vm362_vm3, %v4132_v20 }
  0xe2   : > { %v4145_v35 = vpop.f32.mrf.mxu0 }
  0xe3   : > { %5453 = vst [vmem:[#allocation8_spill] sm:$0xff] %v4145_v35  ;;  %3226 = vmatmul.msk.f32.gmra.mxu2 %vm362_vm3, %v4141_v21  ;;  %v4160_v35 = vld [vmem:[#allocation3 + $0x3a] sm:$0xff] }
  0xe4   : > { %3243 = vmatmul.msk.f32.gmra.mxu1 %vm362_vm3, %v4143_v30 }
  0xe5   : > { %3259 = vmatmul.msk.f32.gmra.mxu3 %vm362_vm3, %v749_v52  ;;  %3327 = vmatmul.msk.f32.vlgmr.msrb.gmra.mxu0 %vm362_vm3, %v4147_v53 }
  0xea   : > { %v4158_v12 = vpop.f32.mrf.mxu0 }
  0xeb   : > { %5454 = vst [vmem:[#allocation9_spill] sm:$0xff] %v4158_v12  ;;  %3261 = vmatmul.msk.f32.vlgmr.msrb.gmra.mxu2 %vm362_vm3, %v4156_v54  ;;  %v410_v12 = vld [vmem:[#allocation3 + $0x8] sm:$0xff] }
  0xec   : > { %3360 = vmatmul.msk.f32.vlgmr.msrb.gmra.mxu1 %vm362_vm3, %v409_v61 }
  0xed   : > { %3294 = vmatmul.msk.f32.vlgmr.msrb.gmra.mxu3 %vm362_vm3, %v3934_v25  ;;  %3328 = vmatmul.msk.f32.gmra.mxu0 %vm362_vm3, %v4160_v35 }
  0xee   : > { %v4169_v52 = vpop.f32.mrf.mxu2 }
  0xef   : > { %5455 = vst [vmem:[#allocation10_spill] sm:$0xff] %v4169_v52  ;;  %v4192_v52 = vld [vmem:[#allocation3 + $0x52] sm:$0xff] }
  0xf0   : > { %v4171_v62 = vpop.f32.mrf.mxu3 }
  0xf1   : > { %5456 = vst [vmem:[#allocation11_spill] sm:$0xff] %v4171_v62 }
  0xf2   : > { %v4175_v38 = vpop.f32.mrf.mxu0 }
  0xf3   : > { %3262 = vmatmul.msk.f32.gmra.mxu2 %vm362_vm3, %v4173_v46 }
  0xf4   : > { %3361 = vmatmul.msk.f32.gmra.mxu1 %vm362_vm3, %v410_v12 }
  0xf5   : > { %3295 = vmatmul.msk.f32.gmra.mxu3 %vm362_vm3, %v3952_v33  ;;  %3329 = vmatmul.msk.f32.gmra.mxu0 %vm362_vm3, %v4177_v28  ;;  %v4202_v33 = vpop.f32.mrf.mxu1 }
  0xf6   : > { %v4186_v25 = vpop.f32.mrf.mxu2 }
  0xf7   : > { %5457 = vst [vmem:[#allocation12_spill] sm:$0xff] %v4186_v25 }
  0xf8   : > { %v4188_v61 = vpop.f32.mrf.mxu3 }
  0xf9   : > { %5458 = vst [vmem:[#allocation13_spill] sm:$0xff] %v4188_v61 }
  0xfa   : > { %v4190_v62 = vpop.f32.mrf.mxu0 }
  0xfb   : > { %5459 = vst [vmem:[#allocation14_spill] sm:$0xff] %v4190_v62  ;;  %3263 = vmatmul.msk.f32.gmra.mxu2 %vm362_vm3, %v4147_v53  ;;  %v4210_v62 = vld [vmem:[#allocation3 + $0x62] sm:$0xff] }
  0xfc   : > { %3362 = vmatmul.msk.f32.gmra.mxu1 %vm362_vm3, %v3885_v3 }
  0xfd   : > { %3296 = vmatmul.msk.f32.gmra.mxu3 %vm362_vm3, %v3970_v41  ;;  %3330 = vmatmul.msk.f32.gmra.mxu0 %vm362_vm3, %v4192_v52  ;;  %v4222_v41 = vpop.f32.mrf.mxu1 }
  0xfe   : > { %v4204_v12 = vpop.f32.mrf.mxu2 }
  0xff   : > { %5460 = vst [vmem:[#allocation15_spill] sm:$0xff] %v4204_v12 }
 0x100   : > { %v4206_v61 = vpop.f32.mrf.mxu3 }
 0x101   : > { %5461 = vst [vmem:[#allocation16_spill] sm:$0xff] %v4206_v61 }
 0x102   : > { %v4208_v25 = vpop.f32.mrf.mxu0 }
 0x103   : > { %5462 = vst [vmem:[#allocation17_spill] sm:$0xff] %v4208_v25  ;;  %3264 = vmatmul.msk.f32.gmra.mxu2 %vm362_vm3, %v4160_v35  ;;  %v4228_v25 = vld [vmem:[#allocation3 + $0x6a] sm:$0xff] }
 0x104   : > { %3363 = vmatmul.msk.f32.gmra.mxu1 %vm362_vm3, %v3902_v8 }
 0x105   : > { %3297 = vmatmul.msk.f32.gmra.mxu3 %vm362_vm3, %v3990_v50  ;;  %3331 = vmatmul.msk.f32.gmra.mxu0 %vm362_vm3, %v4210_v62 }
 0x106   : > { %v4220_v3 = vpop.f32.mrf.mxu2 }
 0x107   : > { %5463 = vst [vmem:[#allocation18_spill] sm:$0xff] %v4220_v3 }
 0x108   : > { %v4224_v61 = vpop.f32.mrf.mxu3 }
 0x109   : > { %5464 = vst [vmem:[#allocation19_spill] sm:$0xff] %v4224_v61  ;;  %v4242_v61 = vpop.f32.mrf.mxu1 }
 0x10a   : > { %v4226_v12 = vpop.f32.mrf.mxu0 }
 0x10b   : > { %5465 = vst [vmem:[#allocation20_spill] sm:$0xff] %v4226_v12  ;;  %3265 = vmatmul.msk.f32.gmra.mxu2 %vm362_vm3, %v4177_v28  ;;  %v4246_v12 = vld [vmem:[#allocation3 + $0x7a] sm:$0xff] }
 0x10c   : > { %3364 = vmatmul.msk.f32.gmra.mxu1 %vm362_vm3, %v3917_v16 }
 0x10d   : > { %3298 = vmatmul.msk.f32.gmra.mxu3 %vm362_vm3, %v4008_v58  ;;  %3332 = vmatmul.msk.f32.gmra.mxu0 %vm362_vm3, %v4228_v25 }
 0x10e   : > { %v4238_v8 = vpop.f32.mrf.mxu2 }
 0x10f   : > { %5466 = vst [vmem:[#allocation21_spill] sm:$0xff] %v4238_v8  ;;  %v4262_v8 = vld [vmem:[#allocation3 + $0x82] sm:$0xff] }
 0x110   : > { %v4240_v50 = vpop.f32.mrf.mxu3 }
 0x111   : > { %5467 = vst [vmem:[#allocation22_spill] sm:$0xff] %v4240_v50 }
 0x112   : > { %v4244_v3 = vpop.f32.mrf.mxu0 }
 0x113   : > { %5468 = vst [vmem:[#allocation23_spill] sm:$0xff] %v4244_v3  ;;  %3266 = vmatmul.msk.f32.gmra.mxu2 %vm362_vm3, %v4192_v52  ;;  %v4266_v3 = vpop.f32.mrf.mxu1 }
 0x114   : > { %3365 = vmatmul.msk.f32.gmra.mxu1 %vm362_vm3, %v3932_v24 }
 0x115   : > { %3299 = vmatmul.msk.f32.gmra.mxu3 %vm362_vm3, %v4026_v4  ;;  %3333 = vmatmul.msk.f32.gmra.mxu0 %vm362_vm3, %v4246_v12 }
 0x116   : > { %v4256_v16 = vpop.f32.mrf.mxu2 }
 0x117   : > { %5469 = vst [vmem:[#allocation24_spill] sm:$0xff] %v4256_v16  ;;  %v4280_v16 = vld [vmem:[#allocation3 + $0x92] sm:$0xff] }
 0x118   : > { %v4258_v58 = vpop.f32.mrf.mxu3 }
 0x119   : > { %5470 = vst [vmem:[#allocation25_spill] sm:$0xff] %v4258_v58 }
 0x11a   : > { %v4260_v50 = vpop.f32.mrf.mxu0 }
 0x11b   : > { %5471 = vst [vmem:[#allocation26_spill] sm:$0xff] %v4260_v50  ;;  %3267 = vmatmul.msk.f32.gmra.mxu2 %vm362_vm3, %v4210_v62 }
 0x11c   : > { %3366 = vmatmul.msk.f32.gmra.mxu1 %vm362_vm3, %v3950_v32  ;;  %v4290_v32 = vpop.f32.mrf.mxu1 }
 0x11d   : > { %3300 = vmatmul.msk.f32.gmra.mxu3 %vm362_vm3, %v4044_v19  ;;  %3334 = vmatmul.msk.f32.gmra.mxu0 %vm362_vm3, %v4262_v8 }
 0x11e   : > { %v4274_v24 = vpop.f32.mrf.mxu2 }
 0x11f   : > { %5472 = vst [vmem:[#allocation27_spill] sm:$0xff] %v4274_v24 }
 0x120   : > { %v4276_v4 = vpop.f32.mrf.mxu3 }
 0x121   : > { %5473 = vst [vmem:[#allocation28_spill] sm:$0xff] %v4276_v4 }
 0x122   : > { %v4278_v58 = vpop.f32.mrf.mxu0 }
 0x123   : > { %5474 = vst [vmem:[#allocation29_spill] sm:$0xff] %v4278_v58  ;;  %3268 = vmatmul.msk.f32.gmra.mxu2 %vm362_vm3, %v4228_v25  ;;  %v4298_v58 = vld [vmem:[#allocation3 + $0x9a] sm:$0xff] }
 0x124   : > { %3367 = vmatmul.msk.f32.gmra.mxu1 %vm362_vm3, %v3968_v40 }
 0x125   : > { %3301 = vmatmul.msk.f32.gmra.mxu3 %vm362_vm3, %v4061_v29  ;;  %3335 = vmatmul.msk.f32.gmra.mxu0 %vm362_vm3, %v4280_v16  ;;  %v4310_v29 = vpop.f32.mrf.mxu1 }
 0x126   : > { %v4292_v19 = vpop.f32.mrf.mxu2  ;;  %5479 = vst [vmem:[#allocation34_spill] sm:$0xff] %v4310_v29  ;;  %v4548_v29 = vld [vmem:[#allocation3 + $0x142] sm:$0xff] }
 0x127   : > { %5475 = vst [vmem:[#allocation30_spill] sm:$0xff] %v4292_v19 }
 0x128   : > { %v4294_v4 = vpop.f32.mrf.mxu3  ;;  %5519 = vst [vmem:[#allocation74_spill] sm:$0xff] %v4548_v29 }
 0x129   : > { %5476 = vst [vmem:[#allocation31_spill] sm:$0xff] %v4294_v4 }
 0x12a   : > { %v4296_v24 = vpop.f32.mrf.mxu0 }
 0x12b   : > { %5477 = vst [vmem:[#allocation32_spill] sm:$0xff] %v4296_v24  ;;  %3269 = vmatmul.msk.f32.gmra.mxu2 %vm362_vm3, %v4246_v12  ;;  %v4316_v24 = vld [vmem:[#allocation3 + $0xaa] sm:$0xff] }
 0x12c   : > { %3368 = vmatmul.msk.f32.gmra.mxu1 %vm362_vm3, %v3986_v48 }
 0x12d   : > { %3302 = vmatmul.msk.f32.gmra.mxu3 %vm362_vm3, %v4078_v43  ;;  %3336 = vmatmul.msk.f32.gmra.mxu0 %vm362_vm3, %v4298_v58 }
 0x12e   : > { %v4308_v40 = vpop.f32.mrf.mxu2 }
 0x12f   : > { %5478 = vst [vmem:[#allocation33_spill] sm:$0xff] %v4308_v40 }
 0x130   : > { %v4312_v4 = vpop.f32.mrf.mxu3 }
 0x131   : > { %5480 = vst [vmem:[#allocation35_spill] sm:$0xff] %v4312_v4  ;;  %v4330_v4 = vpop.f32.mrf.mxu1 }
 0x132   : > { %v4314_v19 = vpop.f32.mrf.mxu0  ;;  %5484 = vst [vmem:[#allocation39_spill] sm:$0xff] %v4330_v4  ;;  %v4514_v4 = vld [vmem:[#allocation3 + $0x12a] sm:$0xff] }
 0x133   : > { %5481 = vst [vmem:[#allocation36_spill] sm:$0xff] %v4314_v19  ;;  %3270 = vmatmul.msk.f32.gmra.mxu2 %vm362_vm3, %v4262_v8  ;;  %v4334_v19 = vld [vmem:[#allocation3 + $0xb2] sm:$0xff] }
 0x134   : > { %3369 = vmatmul.msk.f32.gmra.mxu1 %vm362_vm3, %v4004_v56  ;;  %5514 = vst [vmem:[#allocation69_spill] sm:$0xff] %v4514_v4 }
 0x135   : > { %3303 = vmatmul.msk.f32.gmra.mxu3 %vm362_vm3, %v4094_v51  ;;  %3337 = vmatmul.msk.f32.gmra.mxu0 %vm362_vm3, %v4316_v24 }
 0x136   : > { %v4326_v48 = vpop.f32.mrf.mxu2 }
 0x137   : > { %5482 = vst [vmem:[#allocation37_spill] sm:$0xff] %v4326_v48  ;;  %v4350_v48 = vld [vmem:[#allocation3 + $0xc2] sm:$0xff] }
 0x138   : > { %v4328_v43 = vpop.f32.mrf.mxu3 }
 0x139   : > { %5483 = vst [vmem:[#allocation38_spill] sm:$0xff] %v4328_v43 }
 0x13a   : > { %v4332_v40 = vpop.f32.mrf.mxu0 }
 0x13b   : > { %5485 = vst [vmem:[#allocation40_spill] sm:$0xff] %v4332_v40  ;;  %3271 = vmatmul.msk.f32.gmra.mxu2 %vm362_vm3, %v4280_v16  ;;  %v4354_v40 = vpop.f32.mrf.mxu1 }
 0x13c   : > { %3370 = vmatmul.msk.f32.gmra.mxu1 %vm362_vm3, %v4022_v1  ;;  %5489 = vst [vmem:[#allocation44_spill] sm:$0xff] %v4354_v40  ;;  %v4496_v40 = vld [vmem:[#allocation3 + $0x122] sm:$0xff] }
 0x13d   : > { %3304 = vmatmul.msk.f32.gmra.mxu3 %vm362_vm3, %v4117_v6  ;;  %3338 = vmatmul.msk.f32.gmra.mxu0 %vm362_vm3, %v4334_v19  ;;  %5511 = vst [vmem:[#allocation66_spill] sm:$0xff] %v4496_v40 }
 0x13e   : > { %v4344_v56 = vpop.f32.mrf.mxu2 }
 0x13f   : > { %5486 = vst [vmem:[#allocation41_spill] sm:$0xff] %v4344_v56  ;;  %v4368_v56 = vld [vmem:[#allocation3 + $0xca] sm:$0xff] }
 0x140   : > { %v4346_v51 = vpop.f32.mrf.mxu3 }
 0x141   : > { %5487 = vst [vmem:[#allocation42_spill] sm:$0xff] %v4346_v51 }
 0x142   : > { %v4348_v43 = vpop.f32.mrf.mxu0 }
 0x143   : > { %5488 = vst [vmem:[#allocation43_spill] sm:$0xff] %v4348_v43  ;;  %3272 = vmatmul.msk.f32.gmra.mxu2 %vm362_vm3, %v4298_v58  ;;  %v4426_v43 = vld [vmem:[#allocation3 + $0xf2] sm:$0xff] }
 0x144   : > { %3371 = vmatmul.msk.f32.gmra.mxu1 %vm362_vm3, %v4040_v14  ;;  %v4378_v14 = vpop.f32.mrf.mxu1 }
 0x145   : > { %3305 = vmatmul.msk.f32.gmra.mxu3 %vm362_vm3, %v4132_v20  ;;  %3339 = vmatmul.msk.f32.gmra.mxu0 %vm362_vm3, %v4350_v48  ;;  %5493 = vst [vmem:[#allocation48_spill] sm:$0xff] %v4378_v14 }
 0x146   : > { %v4362_v1 = vpop.f32.mrf.mxu2 }
 0x147   : > { %5490 = vst [vmem:[#allocation45_spill] sm:$0xff] %v4362_v1 }
 0x148   : > { %v4364_v6 = vpop.f32.mrf.mxu3 }
 0x149   : > { %5491 = vst [vmem:[#allocation46_spill] sm:$0xff] %v4364_v6 }
 0x14a   : > { %v4366_v51 = vpop.f32.mrf.mxu0 }
 0x14b   : > { %5492 = vst [vmem:[#allocation47_spill] sm:$0xff] %v4366_v51  ;;  %3273 = vmatmul.msk.f32.gmra.mxu2 %vm362_vm3, %v4316_v24  ;;  %v4386_v51 = vld [vmem:[#allocation3 + $0xda] sm:$0xff] }
 0x14c   : > { %3372 = vmatmul.msk.f32.gmra.mxu1 %vm362_vm3, %v4057_v27  ;;  %v4402_v27 = vpop.f32.mrf.mxu1 }
 0x14d   : > { %3306 = vmatmul.msk.f32.gmra.mxu3 %vm362_vm3, %v3880_v63  ;;  %3340 = vmatmul.msk.f32.gmra.mxu0 %vm362_vm3, %v4368_v56  ;;  %5498 = vst [vmem:[#allocation53_spill] sm:$0xff] %v4402_v27  ;;  %v4478_v27 = vld [vmem:[#allocation3 + $0x112] sm:$0xff] }
 0x14e   : > { %v4380_v20 = vpop.f32.mrf.mxu2  ;;  %5509 = vst [vmem:[#allocation64_spill] sm:$0xff] %v4478_v27 }
 0x14f   : > { %5494 = vst [vmem:[#allocation49_spill] sm:$0xff] %v4380_v20 }
 0x150   : > { %v4382_v6 = vpop.f32.mrf.mxu3 }
 0x151   : > { %5495 = vst [vmem:[#allocation50_spill] sm:$0xff] %v4382_v6 }
 0x152   : > { %v4384_v1 = vpop.f32.mrf.mxu0 }
 0x153   : > { %5496 = vst [vmem:[#allocation51_spill] sm:$0xff] %v4384_v1  ;;  %3274 = vmatmul.msk.f32.gmra.mxu2 %vm362_vm3, %v4334_v19  ;;  %v408_v1 = vld [vmem:[%s407_s6] sm:$0xff] }
 0x154   : > { %3373 = vmatmul.msk.f32.gmra.mxu1 %vm362_vm3, %v4074_v37  ;;  %v4408_v37 = vld [vmem:[#allocation3 + $0xe2] sm:$0xff] }
 0x155   : > { %3307 = vmatmul.msk.f32.gmra.mxu3 %vm362_vm3, %v3899_v7  ;;  %3341 = vmatmul.msk.f32.gmra.mxu0 %vm362_vm3, %v4386_v51 }
 0x156   : > { %v4397_v63 = vpop.f32.mrf.mxu2  ;;  %2879 = vmatpush.msra.mxu1 %v408_v1 }
 0x157   : > { %5497 = vst [vmem:[#allocation52_spill] sm:$0xff] %v4397_v63  ;;  %v4422_v63 = vpop.f32.mrf.mxu1 }
 0x158   : > { %v4404_v6 = vpop.f32.mrf.mxu3  ;;  %5503 = vst [vmem:[#allocation58_spill] sm:$0xff] %v4422_v63 }
 0x159   : > { %5499 = vst [vmem:[#allocation54_spill] sm:$0xff] %v4404_v6 }
 0x15a   : > { %v4406_v20 = vpop.f32.mrf.mxu0 }
 0x15b   : > { %5500 = vst [vmem:[#allocation55_spill] sm:$0xff] %v4406_v20  ;;  %3275 = vmatmul.msk.f32.gmra.mxu2 %vm362_vm3, %v4350_v48 }
 0x15c   : > { %3374 = vmatmul.msk.f32.gmra.mxu1 %vm362_vm3, %v4090_v45 }
 0x15d   : > { %3308 = vmatmul.msk.f32.gmra.mxu3 %vm362_vm3, %v3915_v15  ;;  %3342 = vmatmul.msk.f32.gmra.mxu0 %vm362_vm3, %v4408_v37 }
 0x15e   : > { %v4418_v7 = vpop.f32.mrf.mxu2 }
 0x15f   : > { %5501 = vst [vmem:[#allocation56_spill] sm:$0xff] %v4418_v7  ;;  %v4446_v7 = vpop.f32.mrf.mxu1 }
 0x160   : > { %v4420_v6 = vpop.f32.mrf.mxu3  ;;  %5506 = vst [vmem:[#allocation61_spill] sm:$0xff] %v4446_v7 }
 0x161   : > { %5502 = vst [vmem:[#allocation57_spill] sm:$0xff] %v4420_v6  ;;  %v4442_v6 = vld [vmem:[#allocation3 + $0xfa] sm:$0xff] }
 0x162   : > { %v4424_v20 = vpop.f32.mrf.mxu0 }
 0x163   : > { %3276 = vmatmul.msk.f32.gmra.mxu2 %vm362_vm3, %v4368_v56 }
 0x164   : > { %3375 = vmatmul.msk.f32.gmra.mxu1 %vm362_vm3, %v4112_v60 }
 0x165   : > { %3309 = vmatmul.msk.f32.gmra.mxu3 %vm362_vm3, %v3930_v23  ;;  %3343 = vmatmul.msk.f32.gmra.mxu0 %vm362_vm3, %v4426_v43 }
 0x166   : > { %v4436_v15 = vpop.f32.mrf.mxu2 }
 0x167   : > { %5504 = vst [vmem:[#allocation59_spill] sm:$0xff] %v4436_v15  ;;  %v4460_v15 = vld [vmem:[#allocation3 + $0x10a] sm:$0xff] }
 0x168   : > { %v4438_v45 = vpop.f32.mrf.mxu3  ;;  %5507 = vst [vmem:[#allocation62_spill] sm:$0xff] %v4460_v15 }
 0x169   : > { %5505 = vst [vmem:[#allocation60_spill] sm:$0xff] %v4438_v45 }
 0x16a   : > { %v4440_v1 = vpop.f32.mrf.mxu0 }
 0x16b   : > { %3277 = vmatmul.msk.f32.gmra.mxu2 %vm362_vm3, %v4386_v51 }
 0x16c   : > { %3376 = vmatmul.msk.f32.gmra.mxu1 %vm362_vm3, %v4130_v11 }
 0x16d   : > { %3310 = vmatmul.msk.f32.gmra.mxu3 %vm362_vm3, %v3948_v31  ;;  %3344 = vmatmul.msk.f32.gmra.mxu0 %vm362_vm3, %v4442_v6  ;;  %v4470_v31 = vpop.f32.mrf.mxu1 }
 0x16e   : > { %v4454_v23 = vpop.f32.mrf.mxu2  ;;  %5508 = vst [vmem:[#allocation63_spill] sm:$0xff] %v4470_v31 }
 0x170   : > { %v4456_v60 = vpop.f32.mrf.mxu3 }
 0x172   : > { %v4458_v45 = vpop.f32.mrf.mxu0 }
 0x173   : > { %3278 = vmatmul.msk.f32.gmra.mxu2 %vm362_vm3, %v4408_v37 }
 0x174   : > { %3377 = vmatmul.msk.f32.gmra.mxu1 %vm362_vm3, %v4143_v30 }
 0x175   : > { %3311 = vmatmul.msk.f32.gmra.mxu3 %vm362_vm3, %v3966_v39  ;;  %3345 = vmatmul.msk.f32.gmra.mxu0 %vm362_vm3, %v4460_v15  ;;  %v4490_v30 = vpop.f32.mrf.mxu1 }
 0x176   : > { %v4472_v11 = vpop.f32.mrf.mxu2  ;;  %5510 = vst [vmem:[#allocation65_spill] sm:$0xff] %v4490_v30 }
 0x178   : > { %v4474_v7 = vpop.f32.mrf.mxu3 }
 0x17a   : > { %v4476_v63 = vpop.f32.mrf.mxu0 }
 0x17b   : > { %3279 = vmatmul.msk.f32.gmra.mxu2 %vm362_vm3, %v4426_v43 }
 0x17c   : > { %3378 = vmatmul.msk.f32.gmra.mxu1 %vm362_vm3, %v3890_v5 }
 0x17d   : > { %3312 = vmatmul.msk.f32.gmra.mxu3 %vm362_vm3, %v3984_v47  ;;  %3346 = vmatmul.msk.f32.gmra.mxu0 %vm362_vm3, %v4478_v27  ;;  %v4510_v30 = vpop.f32.mrf.mxu1 }
 0x17e   : > { %v4488_v39 = vpop.f32.mrf.mxu2  ;;  %5512 = vst [vmem:[#allocation67_spill] sm:$0xff] %v4510_v30 }
 0x180   : > { %v4492_v31 = vpop.f32.mrf.mxu3 }
 0x182   : > { %v4494_v14 = vpop.f32.mrf.mxu0 }
 0x183   : > { %3280 = vmatmul.msk.f32.gmra.mxu2 %vm362_vm3, %v4442_v6 }
 0x184   : > { %3379 = vmatmul.msk.f32.gmra.mxu1 %vm362_vm3, %v3904_v9 }
 0x185   : > { %3313 = vmatmul.msk.f32.gmra.mxu3 %vm362_vm3, %v4002_v55  ;;  %3347 = vmatmul.msk.f32.gmra.mxu0 %vm362_vm3, %v4496_v40 }
 0x186   : > { %v4506_v5 = vpop.f32.mrf.mxu2 }
 0x188   : > { %v4508_v47 = vpop.f32.mrf.mxu3 }
 0x18a   : > { %v4512_v50 = vpop.f32.mrf.mxu0 }
 0x18b   : > { %5513 = vst [vmem:[#allocation68_spill] sm:$0xff] %v4512_v50  ;;  %3281 = vmatmul.msk.f32.gmra.mxu2 %vm362_vm3, %v4460_v15  ;;  %v4530_v50 = vld [vmem:[#allocation3 + $0x13a] sm:$0xff]  ;;  %v4534_v15 = vpop.f32.mrf.mxu1 }
 0x18c   : > { %3380 = vmatmul.msk.f32.gmra.mxu1 %vm362_vm3, %v3919_v18  ;;  %5516 = vst [vmem:[#allocation71_spill] sm:$0xff] %v4530_v50 }
 0x18d   : > { %3314 = vmatmul.msk.f32.gmra.mxu3 %vm362_vm3, %v4020_v0  ;;  %3348 = vmatmul.msk.f32.gmra.mxu0 %vm362_vm3, %v4514_v4  ;;  %5517 = vst [vmem:[#allocation72_spill] sm:$0xff] %v4534_v15 }
 0x18e   : > { %v4524_v9 = vpop.f32.mrf.mxu2 }
 0x190   : > { %v4526_v55 = vpop.f32.mrf.mxu3 }
 0x192   : > { %v4528_v30 = vpop.f32.mrf.mxu0 }
 0x193   : > { %5515 = vst [vmem:[#allocation70_spill] sm:$0xff] %v4528_v30  ;;  %3282 = vmatmul.msk.f32.gmra.mxu2 %vm362_vm3, %v4478_v27  ;;  %v4566_v27 = vld [vmem:[#allocation3 + $0x152] sm:$0xff] }
 0x194   : > { %3381 = vmatmul.msk.f32.gmra.mxu1 %vm362_vm3, %v3936_v26  ;;  %v4558_v26 = vpop.f32.mrf.mxu1  ;;  %5522 = vst [vmem:[#allocation77_spill] sm:$0xff] %v4566_v27 }
 0x195   : > { %3315 = vmatmul.msk.f32.gmra.mxu3 %vm362_vm3, %v4038_v13  ;;  %3349 = vmatmul.msk.f32.gmra.mxu0 %vm362_vm3, %v4530_v50 }
 0x196   : > { %v4542_v18 = vpop.f32.mrf.mxu2 }
 0x198   : > { %v4544_v0 = vpop.f32.mrf.mxu3 }
 0x19a   : > { %v4546_v30 = vpop.f32.mrf.mxu0 }
 0x19b   : > { %5518 = vst [vmem:[#allocation73_spill] sm:$0xff] %v4546_v30  ;;  %3283 = vmatmul.msk.f32.gmra.mxu2 %vm362_vm3, %v4496_v40 }
 0x19c   : > { %3382 = vmatmul.msk.f32.gmra.mxu1 %vm362_vm3, %v3954_v34 }
 0x19d   : > { %3316 = vmatmul.msk.f32.gmra.mxu3 %vm362_vm3, %v4055_v22  ;;  %3350 = vmatmul.msk.f32.gmra.mxu0 %vm362_vm3, %v4548_v29  ;;  %v4578_v22 = vpop.f32.mrf.mxu1 }
 0x19e   : > { %v4560_v13 = vpop.f32.mrf.mxu2 }
 0x19f   : > { %5520 = vst [vmem:[#allocation75_spill] sm:$0xff] %v4560_v13  ;;  %v4584_v13 = vld [vmem:[#allocation3 + $0x15a] sm:$0xff] }
 0x1a0   : > { %v4562_v15 = vpop.f32.mrf.mxu3  ;;  %5525 = vst [vmem:[#allocation80_spill] sm:$0xff] %v4584_v13 }
 0x1a2   : > { %v4564_v30 = vpop.f32.mrf.mxu0 }
 0x1a3   : > { %5521 = vst [vmem:[#allocation76_spill] sm:$0xff] %v4564_v30  ;;  %3284 = vmatmul.msk.f32.gmra.mxu2 %vm362_vm3, %v4514_v4 }
 0x1a4   : > { %3383 = vmatmul.msk.f32.gmra.mxu1 %vm362_vm3, %v3972_v42 }
 0x1a5   : > { %3317 = vmatmul.msk.f32.gmra.mxu3 %vm362_vm3, %v4072_v36  ;;  %3351 = vmatmul.msk.f32.gmra.mxu0 %vm362_vm3, %v4566_v27  ;;  %v4598_v4 = vpop.f32.mrf.mxu1 }
 0x1a6   : > { %v4576_v34 = vpop.f32.mrf.mxu2 }
 0x1a7   : > { %5523 = vst [vmem:[#allocation78_spill] sm:$0xff] %v4576_v34  ;;  %v1541_v34 = vld [vmem:[#allocation3 + $0x16a] sm:$0xff] }
 0x1a8   : > { %v4580_v40 = vpop.f32.mrf.mxu3 }
 0x1aa   : > { %v4582_v30 = vpop.f32.mrf.mxu0 }
 0x1ab   : > { %5524 = vst [vmem:[#allocation79_spill] sm:$0xff] %v4582_v30  ;;  %3285 = vmatmul.msk.f32.gmra.mxu2 %vm362_vm3, %v4530_v50 }
 0x1ac   : > { %3384 = vmatmul.msk.f32.gmra.mxu1 %vm362_vm3, %v3988_v49 }
 0x1ad   : > { %3318 = vmatmul.msk.f32.gmra.mxu3 %vm362_vm3, %v4088_v44  ;;  %3352 = vmatmul.msk.f32.gmra.mxu0 %vm362_vm3, %v4584_v13 }
 0x1ae   : > { %v4594_v42 = vpop.f32.mrf.mxu2 }
 0x1af   : > { %5526 = vst [vmem:[#allocation81_spill] sm:$0xff] %v4594_v42  ;;  %v1542_v42 = vld [vmem:[#allocation3 + $0x172] sm:$0xff] }
 0x1b0   : > { %v4596_v36 = vpop.f32.mrf.mxu3 }
 0x1b2   : > { %v4600_v30 = vpop.f32.mrf.mxu0 }
 0x1b3   : > { %5527 = vst [vmem:[#allocation82_spill] sm:$0xff] %v4600_v30  ;;  %3286 = vmatmul.msk.f32.gmra.mxu2 %vm362_vm3, %v4548_v29  ;;  %v4617_v30 = vpop.f32.mrf.mxu1 }
 0x1b4   : > { %3385 = vmatmul.msk.f32.gmra.mxu1 %vm362_vm3, %v4006_v57 }
 0x1b5   : > { %3319 = vmatmul.msk.f32.gmra.mxu3 %vm362_vm3, %v4110_v59  ;;  %3353 = vmatmul.msk.f32.gmra.mxu0 %vm362_vm3, %v1541_v34 }
 0x1b6   : > { %v4609_v49 = vpop.f32.mrf.mxu2 }
 0x1b7   : > { %5528 = vst [vmem:[#allocation83_spill] sm:$0xff] %v4609_v49  ;;  %v1545_v49 = vld [vmem:[#allocation3 + $0x19a] sm:$0xff] }
 0x1b8   : > { %v4611_v44 = vpop.f32.mrf.mxu3 }
 0x1b9   : > { %5529 = vst [vmem:[#allocation84_spill] sm:$0xff] %v4611_v44  ;;  %v1546_v44 = vld [vmem:[#allocation3 + $0x1a2] sm:$0xff] }
 0x1ba   : > { %v4613_v50 = vpop.f32.mrf.mxu0 }
 0x1bb   : > { %5530 = vst [vmem:[#allocation85_spill] sm:$0xff] %v4613_v50  ;;  %3287 = vmatmul.msk.f32.gmra.mxu2 %vm362_vm3, %v4566_v27  ;;  %v1543_v50 = vld [vmem:[#allocation3 + $0x182] sm:$0xff] }
 0x1bc   : > { %3386 = vmatmul.msk.f32.gmra.mxu1 %vm362_vm3, %v4024_v2  ;;  %v4637_v2 = vpop.f32.mrf.mxu1 }
 0x1bd   : > { %3320 = vmatmul.msk.f32.gmra.mxu3 %vm362_vm3, %v4128_v10  ;;  %3354 = vmatmul.msk.f32.gmra.mxu0 %vm362_vm3, %v1542_v42 }
 0x1be   : > { %v4624_v57 = vpop.f32.mrf.mxu2 }
 0x1bf   : > { %5531 = vst [vmem:[#allocation86_spill] sm:$0xff] %v4624_v57 }
 0x1c0   : > { %v4626_v59 = vpop.f32.mrf.mxu3 }
 0x1c1   : > { %5532 = vst [vmem:[#allocation87_spill] sm:$0xff] %v4626_v59  ;;  %v1544_v59 = vld [vmem:[#allocation3 + $0x18a] sm:$0xff] }
 0x1c2   : > { %v4628_v29 = vpop.f32.mrf.mxu0 }
 0x1c3   : > { %5533 = vst [vmem:[#allocation88_spill] sm:$0xff] %v4628_v29  ;;  %3288 = vmatmul.msk.f32.gmra.mxu2 %vm362_vm3, %v4584_v13  ;;  %v4645_v29 = vld [vmem:[#allocation3 + $0x181] sm:$0xff]  ;;  %v5538_v13 = vld [vmem:[#allocation4_spill] sm:$0xff] }
 0x1c4   : > { %3387 = vmatmul.msk.f32.gmra.mxu1 %vm362_vm3, %v4042_v17  ;;  %5537 = vst [vmem:[#allocation92_spill] sm:$0xff] %v4645_v29 }
 0x1c5   : > { %3321 = vmatmul.msk.f32.gmra.mxu3 %vm362_vm3, %v4141_v21  ;;  %3355 = vmatmul.msk.f32.gmra.mxu0 %vm362_vm3, %v1543_v50  ;;  %v4655_v21 = vpop.f32.mrf.mxu1 }
 0x1c6   : > { %v4639_v10 = vpop.f32.mrf.mxu2 }
 0x1c7   : > { %5534 = vst [vmem:[#allocation89_spill] sm:$0xff] %v4639_v10 }
 0x1c8   : > { %v4641_v27 = vpop.f32.mrf.mxu3 }
 0x1c9   : > { %5535 = vst [vmem:[#allocation90_spill] sm:$0xff] %v4641_v27  ;;  %v4661_v27 = vld [vmem:[#allocation3 + $0x189] sm:$0xff] }
 0x1ca   : > { %v4643_v57 = vpop.f32.mrf.mxu0  ;;  %5542 = vst [vmem:[#allocation95_spill] sm:$0xff] %v4661_v27 }
 0x1cb   : > { %5536 = vst [vmem:[#allocation91_spill] sm:$0xff] %v4643_v57  ;;  %3289 = vmatmul.msk.f32.gmra.mxu2 %vm362_vm3, %v1541_v34  ;;  %v5543_v34 = vld [vmem:[#allocation5_spill] sm:$0xff] }
 0x1cc   : > { %3388 = vmatmul.msk.f32.gmra.mxu1 %vm362_vm3, %v5538_v13 }
 0x1cd   : > { %3322 = vmatmul.msk.f32.gmra.mxu3 %vm362_vm3, %v4645_v29  ;;  %3356 = vmatmul.msk.f32.gmra.mxu0 %vm362_vm3, %v1544_v59 }
 0x1ce   : > { %v4653_v17 = vpop.f32.mrf.mxu2 }
 0x1cf   : > { %5539 = vst [vmem:[#allocation4_spill] sm:$0xff] %v4653_v17  ;;  %v4673_v17 = vpop.f32.mrf.mxu1 }
 0x1d0   : > { %v4657_v10 = vpop.f32.mrf.mxu3 }
 0x1d1   : > { %5540 = vst [vmem:[#allocation93_spill] sm:$0xff] %v4657_v10  ;;  %v1301_v10 = vld [vmem:[#allocation3 + $0x199] sm:$0xff] }
 0x1d2   : > { %v4659_v57 = vpop.f32.mrf.mxu0 }
 0x1d3   : > { %5541 = vst [vmem:[#allocation94_spill] sm:$0xff] %v4659_v57  ;;  %3290 = vmatmul.msk.f32.gmra.mxu2 %vm362_vm3, %v1542_v42  ;;  %v5547_v42 = vld [vmem:[#allocation6_spill] sm:$0xff] }
 0x1d4   : > { %3389 = vmatmul.msk.f32.gmra.mxu1 %vm362_vm3, %v5543_v34 }
 0x1d5   : > { %3323 = vmatmul.msk.f32.gmra.mxu3 %vm362_vm3, %v4661_v27  ;;  %3357 = vmatmul.msk.f32.gmra.mxu0 %vm362_vm3, %v1545_v49 }
 0x1d6   : > { %v4669_v13 = vpop.f32.mrf.mxu2 }
 0x1d7   : > { %5544 = vst [vmem:[#allocation5_spill] sm:$0xff] %v4669_v13  ;;  %v1302_v13 = vld [vmem:[#allocation3 + $0x1a1] sm:$0xff] }
 0x1d8   : > { %v4671_v29 = vpop.f32.mrf.mxu3 }
 0x1d9   : > { %5545 = vst [vmem:[#allocation96_spill] sm:$0xff] %v4671_v29  ;;  %v1239_v29 = vld [vmem:[#allocation3 + $0x30] sm:$0xff] }
 0x1da   : > { %v4675_v57 = vpop.f32.mrf.mxu0 }
 0x1db   : > { %5546 = vst [vmem:[#allocation97_spill] sm:$0xff] %v4675_v57  ;;  %3291 = vmatmul.msk.f32.gmra.mxu2 %vm362_vm3, %v1543_v50  ;;  %v4689_v57 = vpop.f32.mrf.mxu1  ;;  %v5551_v50 = vld [vmem:[#allocation7_spill] sm:$0xff] }
 0x1dc   : > { %3390 = vmatmul.msk.f32.gmra.mxu1 %vm362_vm3, %v5547_v42  ;;  %v686_v42 = vld [vmem:[#allocation3 + $0x2] sm:$0xff] }
 0x1dd   : > { %3324 = vmatmul.msk.f32.gmra.mxu3 %vm362_vm3, %v1301_v10  ;;  %3358 = vmatmul.msk.f32.gmra.mxu0 %vm362_vm3, %v1546_v44 }
 0x1de   : > { %v4682_v49 = vpop.f32.mrf.mxu2 }
 0x1df   : > { %5548 = vst [vmem:[#allocation6_spill] sm:$0xff] %v4682_v49 }
 0x1e0   : > { %v4684_v34 = vpop.f32.mrf.mxu3 }
 0x1e1   : > { %5549 = vst [vmem:[#allocation98_spill] sm:$0xff] %v4684_v34  ;;  %v1240_v34 = vld [vmem:[#allocation3 + $0x38] sm:$0xff] }
 0x1e2   : > { %v4686_v27 = vpop.f32.mrf.mxu0 }
 0x1e3   : > { %5550 = vst [vmem:[#allocation99_spill] sm:$0xff] %v4686_v27  ;;  %3292 = vmatmul.msk.f32.gmra.mxu2 %vm362_vm3, %v1544_v59  ;;  %v962_v27 = vld [vmem:[#allocation3 + $0x19] sm:$0xff] }
 0x1e4   : > { %3391 = vmatmul.msk.f32.gmra.mxu1 %vm362_vm3, %v5551_v50 }
 0x1e5   : > { %3325 = vmatmul.msk.f32.gmra.mxu3 %vm362_vm3, %v1302_v13  ;;  %3459 = vmatmul.msk.f32.vlgmr.msra.gmra.mxu0 %vm362_vm3, %v1239_v29  ;;  %v687_v29 = vld [vmem:[#allocation3 + $0xa] sm:$0xff] }
 0x1e6   : > { %v4695_v44 = vpop.f32.mrf.mxu2 }
 0x1e7   : > { %5552 = vst [vmem:[#allocation7_spill] sm:$0xff] %v4695_v44  ;;  %v963_v44 = vld [vmem:[#allocation3 + $0x21] sm:$0xff] }
 0x1e8   : > { %v4697_v10 = vpop.f32.mrf.mxu3 }
 0x1e9   : > { %5553 = vst [vmem:[#allocation100_spill] sm:$0xff] %v4697_v10  ;;  %v1241_v10 = vld [vmem:[#allocation3 + $0x48] sm:$0xff] }
 0x1ea   : > { %v4699_v49 = vpop.f32.mrf.mxu0 }
 0x1eb   : > { %5554 = vst [vmem:[#allocation101_spill] sm:$0xff] %v4699_v49  ;;  %3393 = vmatmul.msk.f32.vlgmr.msra.gmra.mxu2 %vm362_vm3, %v686_v42  ;;  %v964_v49 = vld [vmem:[#allocation3 + $0x31] sm:$0xff] }
 0x1ed   : > { %3426 = vmatmul.msk.f32.vlgmr.msra.gmra.mxu3 %vm362_vm3, %v962_v27  ;;  %3460 = vmatmul.msk.f32.gmra.mxu0 %vm362_vm3, %v1240_v34 }
 0x1ee   : > { %v4704_v59 = vpop.f32.mrf.mxu2 }
 0x1ef   : > { %5555 = vst [vmem:[#allocation102_spill] sm:$0xff] %v4704_v59  ;;  %v1242_v59 = vld [vmem:[#allocation3 + $0x50] sm:$0xff] }
 0x1f0   : > { %v4706_v13 = vpop.f32.mrf.mxu3 }
 0x1f1   : > { %5556 = vst [vmem:[#allocation103_spill] sm:$0xff] %v4706_v13  ;;  %v1257_v13 = vld [vmem:[#allocation3 + $0x108] sm:$0xff] }
 0x1f2   : > { %v4708_v50 = vpop.f32.mrf.mxu0 }
 0x1f3   : > { %5557 = vst [vmem:[#allocation104_spill] sm:$0xff] %v4708_v50  ;;  %3394 = vmatmul.msk.f32.gmra.mxu2 %vm362_vm3, %v687_v29  ;;  %v965_v50 = vld [vmem:[#allocation3 + $0x39] sm:$0xff] }
 0x1f5   : > { %3427 = vmatmul.msk.f32.gmra.mxu3 %vm362_vm3, %v963_v44  ;;  %3461 = vmatmul.msk.f32.gmra.mxu0 %vm362_vm3, %v1241_v10 }
 0x1f6   : > { %v4713_v42 = vpop.f32.mrf.mxu2 }
 0x1f7   : > { %5558 = vst [vmem:[#allocation105_spill] sm:$0xff] %v4713_v42  ;;  %v1243_v42 = vld [vmem:[#allocation3 + $0x60] sm:$0xff] }
 0x1f8   : > { %v4715_v27 = vpop.f32.mrf.mxu3 }
 0x1f9   : > { %5559 = vst [vmem:[#allocation106_spill] sm:$0xff] %v4715_v27 }
 0x1fa   : > { %v4717_v34 = vpop.f32.mrf.mxu0 }
 0x1fb   : > { %5560 = vst [vmem:[#allocation107_spill] sm:$0xff] %v4717_v34  ;;  %3395 = vmatmul.msk.f32.gmra.mxu2 %vm362_vm3, %v4156_v54 }
 0x1fd   : > { %3428 = vmatmul.msk.f32.gmra.mxu3 %vm362_vm3, %v964_v49  ;;  %3462 = vmatmul.msk.f32.gmra.mxu0 %vm362_vm3, %v1242_v59  ;;  %v4737_v59 = vpop.f32.mrf.mxu1 }
 0x1fe   : > { %v4723_v29 = vpop.f32.mrf.mxu2 }
 0x1ff   : > { %5561 = vst [vmem:[#allocation108_spill] sm:$0xff] %v4723_v29  ;;  %v966_v29 = vld [vmem:[#allocation3 + $0x49] sm:$0xff] }
 0x200   : > { %v4725_v44 = vpop.f32.mrf.mxu3 }
 0x201   : > { %5562 = vst [vmem:[#allocation109_spill] sm:$0xff] %v4725_v44  ;;  %v1244_v44 = vld [vmem:[#allocation3 + $0x68] sm:$0xff] }
 0x202   : > { %v4727_v10 = vpop.f32.mrf.mxu0 }
 0x203   : > { %5563 = vst [vmem:[#allocation110_spill] sm:$0xff] %v4727_v10  ;;  %3396 = vmatmul.msk.f32.gmra.mxu2 %vm362_vm3, %v4173_v46  ;;  %v967_v10 = vld [vmem:[#allocation3 + $0x51] sm:$0xff] }
 0x205   : > { %3429 = vmatmul.msk.f32.gmra.mxu3 %vm362_vm3, %v965_v50  ;;  %3463 = vmatmul.msk.f32.gmra.mxu0 %vm362_vm3, %v1243_v42 }
 0x206   : > { %v4733_v54 = vpop.f32.mrf.mxu2 }
 0x207   : > { %5564 = vst [vmem:[#allocation111_spill] sm:$0xff] %v4733_v54  ;;  %v1245_v54 = vld [vmem:[#allocation3 + $0x78] sm:$0xff] }
 0x208   : > { %v4735_v49 = vpop.f32.mrf.mxu3 }
 0x209   : > { %5565 = vst [vmem:[#allocation112_spill] sm:$0xff] %v4735_v49 }
 0x20a   : > { %v4739_v34 = vpop.f32.mrf.mxu0 }
 0x20b   : > { %5566 = vst [vmem:[#allocation113_spill] sm:$0xff] %v4739_v34  ;;  %3397 = vmatmul.msk.f32.gmra.mxu2 %vm362_vm3, %v4147_v53  ;;  %v4753_v34 = vpop.f32.mrf.mxu1 }
 0x20d   : > { %3430 = vmatmul.msk.f32.gmra.mxu3 %vm362_vm3, %v966_v29  ;;  %3464 = vmatmul.msk.f32.gmra.mxu0 %vm362_vm3, %v1244_v44 }
 0x20e   : > { %v4745_v46 = vpop.f32.mrf.mxu2 }
 0x20f   : > { %5567 = vst [vmem:[#allocation114_spill] sm:$0xff] %v4745_v46  ;;  %v968_v46 = vld [vmem:[#allocation3 + $0x61] sm:$0xff] }
 0x210   : > { %v4747_v50 = vpop.f32.mrf.mxu3 }
 0x211   : > { %5568 = vst [vmem:[#allocation115_spill] sm:$0xff] %v4747_v50  ;;  %v1246_v50 = vld [vmem:[#allocation3 + $0x80] sm:$0xff] }
 0x212   : > { %v4749_v42 = vpop.f32.mrf.mxu0 }
 0x213   : > { %5569 = vst [vmem:[#allocation116_spill] sm:$0xff] %v4749_v42  ;;  %3398 = vmatmul.msk.f32.gmra.mxu2 %vm362_vm3, %v4160_v35  ;;  %v4767_v35 = vpop.f32.mrf.mxu1 }
 0x215   : > { %3431 = vmatmul.msk.f32.gmra.mxu3 %vm362_vm3, %v967_v10  ;;  %3465 = vmatmul.msk.f32.gmra.mxu0 %vm362_vm3, %v1245_v54 }
 0x216   : > { %v4757_v53 = vpop.f32.mrf.mxu2 }
 0x217   : > { %5570 = vst [vmem:[#allocation117_spill] sm:$0xff] %v4757_v53  ;;  %v969_v53 = vld [vmem:[#allocation3 + $0x69] sm:$0xff] }
 0x218   : > { %v4759_v29 = vpop.f32.mrf.mxu3 }
 0x219   : > { %5571 = vst [vmem:[#allocation118_spill] sm:$0xff] %v4759_v29  ;;  %v1247_v29 = vld [vmem:[#allocation3 + $0x90] sm:$0xff] }
 0x21a   : > { %v4761_v44 = vpop.f32.mrf.mxu0 }
 0x21b   : > { %5572 = vst [vmem:[#allocation119_spill] sm:$0xff] %v4761_v44  ;;  %3399 = vmatmul.msk.f32.gmra.mxu2 %vm362_vm3, %v4177_v28 }
 0x21d   : > { %3432 = vmatmul.msk.f32.gmra.mxu3 %vm362_vm3, %v968_v46  ;;  %3466 = vmatmul.msk.f32.gmra.mxu0 %vm362_vm3, %v1246_v50  ;;  %v4781_v46 = vpop.f32.mrf.mxu1 }
 0x21e   : > { %v4769_v10 = vpop.f32.mrf.mxu2 }
 0x21f   : > { %5573 = vst [vmem:[#allocation120_spill] sm:$0xff] %v4769_v10  ;;  %v970_v10 = vld [vmem:[#allocation3 + $0x79] sm:$0xff] }
 0x220   : > { %v4771_v54 = vpop.f32.mrf.mxu3 }
 0x221   : > { %5574 = vst [vmem:[#allocation121_spill] sm:$0xff] %v4771_v54  ;;  %v1248_v54 = vld [vmem:[#allocation3 + $0x98] sm:$0xff] }
 0x222   : > { %v4773_v42 = vpop.f32.mrf.mxu0 }
 0x223   : > { %5575 = vst [vmem:[#allocation122_spill] sm:$0xff] %v4773_v42  ;;  %3400 = vmatmul.msk.f32.gmra.mxu2 %vm362_vm3, %v4192_v52 }
 0x225   : > { %3433 = vmatmul.msk.f32.gmra.mxu3 %vm362_vm3, %v969_v53  ;;  %3467 = vmatmul.msk.f32.gmra.mxu0 %vm362_vm3, %v1247_v29  ;;  %v4795_v29 = vpop.f32.mrf.mxu1 }
 0x226   : > { %v4779_v28 = vpop.f32.mrf.mxu2 }
 0x227   : > { %5576 = vst [vmem:[#allocation123_spill] sm:$0xff] %v4779_v28  ;;  %v971_v28 = vld [vmem:[#allocation3 + $0x81] sm:$0xff] }
 0x228   : > { %v4783_v50 = vpop.f32.mrf.mxu3 }
 0x229   : > { %5577 = vst [vmem:[#allocation124_spill] sm:$0xff] %v4783_v50  ;;  %v1249_v50 = vld [vmem:[#allocation3 + $0xa8] sm:$0xff] }
 0x22a   : > { %v4785_v44 = vpop.f32.mrf.mxu0 }
 0x22b   : > { %5578 = vst [vmem:[#allocation125_spill] sm:$0xff] %v4785_v44  ;;  %3401 = vmatmul.msk.f32.gmra.mxu2 %vm362_vm3, %v4210_v62  ;;  %v972_v44 = vld [vmem:[#allocation3 + $0x91] sm:$0xff] }
 0x22d   : > { %3434 = vmatmul.msk.f32.gmra.mxu3 %vm362_vm3, %v970_v10  ;;  %3468 = vmatmul.msk.f32.gmra.mxu0 %vm362_vm3, %v1248_v54 }
 0x22e   : > { %v4791_v52 = vpop.f32.mrf.mxu2 }
 0x22f   : > { %5579 = vst [vmem:[#allocation126_spill] sm:$0xff] %v4791_v52  ;;  %v1250_v52 = vld [vmem:[#allocation3 + $0xb0] sm:$0xff] }
 0x230   : > { %v4793_v53 = vpop.f32.mrf.mxu3 }
 0x231   : > { %5580 = vst [vmem:[#allocation127_spill] sm:$0xff] %v4793_v53 }
 0x232   : > { %v4797_v42 = vpop.f32.mrf.mxu0 }
 0x233   : > { %5581 = vst [vmem:[#allocation128_spill] sm:$0xff] %v4797_v42  ;;  %3402 = vmatmul.msk.f32.gmra.mxu2 %vm362_vm3, %v4228_v25  ;;  %v4811_v42 = vpop.f32.mrf.mxu1 }
 0x235   : > { %3435 = vmatmul.msk.f32.gmra.mxu3 %vm362_vm3, %v971_v28  ;;  %3469 = vmatmul.msk.f32.gmra.mxu0 %vm362_vm3, %v1249_v50 }
 0x236   : > { %v4803_v62 = vpop.f32.mrf.mxu2 }
 0x237   : > { %5582 = vst [vmem:[#allocation129_spill] sm:$0xff] %v4803_v62  ;;  %v973_v62 = vld [vmem:[#allocation3 + $0x99] sm:$0xff] }
 0x238   : > { %v4805_v10 = vpop.f32.mrf.mxu3 }
 0x239   : > { %5583 = vst [vmem:[#allocation130_spill] sm:$0xff] %v4805_v10  ;;  %v1251_v10 = vld [vmem:[#allocation3 + $0xc0] sm:$0xff] }
 0x23a   : > { %v4807_v54 = vpop.f32.mrf.mxu0 }
 0x23b   : > { %5584 = vst [vmem:[#allocation131_spill] sm:$0xff] %v4807_v54  ;;  %3403 = vmatmul.msk.f32.gmra.mxu2 %vm362_vm3, %v4246_v12  ;;  %v4825_v12 = vpop.f32.mrf.mxu1 }
 0x23d   : > { %3436 = vmatmul.msk.f32.gmra.mxu3 %vm362_vm3, %v972_v44  ;;  %3470 = vmatmul.msk.f32.gmra.mxu0 %vm362_vm3, %v1250_v52 }
 0x23e   : > { %v4815_v25 = vpop.f32.mrf.mxu2 }
 0x23f   : > { %5585 = vst [vmem:[#allocation132_spill] sm:$0xff] %v4815_v25  ;;  %v974_v25 = vld [vmem:[#allocation3 + $0xa9] sm:$0xff] }
 0x240   : > { %v4817_v28 = vpop.f32.mrf.mxu3 }
 0x241   : > { %5586 = vst [vmem:[#allocation133_spill] sm:$0xff] %v4817_v28  ;;  %v1252_v28 = vld [vmem:[#allocation3 + $0xc8] sm:$0xff] }
 0x242   : > { %v4819_v50 = vpop.f32.mrf.mxu0 }
 0x243   : > { %5587 = vst [vmem:[#allocation134_spill] sm:$0xff] %v4819_v50  ;;  %3404 = vmatmul.msk.f32.gmra.mxu2 %vm362_vm3, %v4262_v8 }
 0x245   : > { %3437 = vmatmul.msk.f32.gmra.mxu3 %vm362_vm3, %v973_v62  ;;  %3471 = vmatmul.msk.f32.gmra.mxu0 %vm362_vm3, %v1251_v10  ;;  %v4839_v62 = vpop.f32.mrf.mxu1 }
 0x246   : > { %v4827_v44 = vpop.f32.mrf.mxu2 }
 0x247   : > { %5588 = vst [vmem:[#allocation135_spill] sm:$0xff] %v4827_v44  ;;  %v975_v44 = vld [vmem:[#allocation3 + $0xb1] sm:$0xff] }
 0x248   : > { %v4829_v52 = vpop.f32.mrf.mxu3 }
 0x249   : > { %5589 = vst [vmem:[#allocation136_spill] sm:$0xff] %v4829_v52  ;;  %v1253_v52 = vld [vmem:[#allocation3 + $0xd8] sm:$0xff] }
 0x24a   : > { %v4831_v54 = vpop.f32.mrf.mxu0 }
 0x24b   : > { %5590 = vst [vmem:[#allocation137_spill] sm:$0xff] %v4831_v54  ;;  %3405 = vmatmul.msk.f32.gmra.mxu2 %vm362_vm3, %v4280_v16 }
 0x24d   : > { %3438 = vmatmul.msk.f32.gmra.mxu3 %vm362_vm3, %v974_v25  ;;  %3472 = vmatmul.msk.f32.gmra.mxu0 %vm362_vm3, %v1252_v28  ;;  %v4853_v28 = vpop.f32.mrf.mxu1 }
 0x24e   : > { %v4837_v8 = vpop.f32.mrf.mxu2 }
 0x24f   : > { %5591 = vst [vmem:[#allocation138_spill] sm:$0xff] %v4837_v8  ;;  %v976_v8 = vld [vmem:[#allocation3 + $0xc1] sm:$0xff] }
 0x250   : > { %v4841_v10 = vpop.f32.mrf.mxu3 }
 0x251   : > { %5592 = vst [vmem:[#allocation139_spill] sm:$0xff] %v4841_v10  ;;  %v1254_v10 = vld [vmem:[#allocation3 + $0xe0] sm:$0xff] }
 0x252   : > { %v4843_v50 = vpop.f32.mrf.mxu0 }
 0x253   : > { %5593 = vst [vmem:[#allocation140_spill] sm:$0xff] %v4843_v50  ;;  %3406 = vmatmul.msk.f32.gmra.mxu2 %vm362_vm3, %v4298_v58  ;;  %v977_v50 = vld [vmem:[#allocation3 + $0xc9] sm:$0xff] }
 0x255   : > { %3439 = vmatmul.msk.f32.gmra.mxu3 %vm362_vm3, %v975_v44  ;;  %3473 = vmatmul.msk.f32.gmra.mxu0 %vm362_vm3, %v1253_v52 }
 0x256   : > { %v4849_v16 = vpop.f32.mrf.mxu2 }
 0x257   : > { %5594 = vst [vmem:[#allocation141_spill] sm:$0xff] %v4849_v16  ;;  %v1255_v16 = vld [vmem:[#allocation3 + $0xf0] sm:$0xff] }
 0x258   : > { %v4851_v25 = vpop.f32.mrf.mxu3 }
 0x259   : > { %5595 = vst [vmem:[#allocation142_spill] sm:$0xff] %v4851_v25  ;;  %v1256_v25 = vld [vmem:[#allocation3 + $0xf8] sm:$0xff] }
 0x25a   : > { %v4855_v54 = vpop.f32.mrf.mxu0 }
 0x25b   : > { %5596 = vst [vmem:[#allocation143_spill] sm:$0xff] %v4855_v54  ;;  %3407 = vmatmul.msk.f32.gmra.mxu2 %vm362_vm3, %v4316_v24  ;;  %v4867_v54 = vpop.f32.mrf.mxu1 }
 0x25c   : > { %5599 = vst [vmem:[#allocation146_spill] sm:$0xff] %v4867_v54 }
 0x25d   : > { %3440 = vmatmul.msk.f32.gmra.mxu3 %vm362_vm3, %v976_v8  ;;  %3474 = vmatmul.msk.f32.gmra.mxu0 %vm362_vm3, %v1254_v10 }
 0x25e   : > { %v4861_v58 = vpop.f32.mrf.mxu2 }
 0x25f   : > { %5597 = vst [vmem:[#allocation144_spill] sm:$0xff] %v4861_v58  ;;  %v978_v58 = vld [vmem:[#allocation3 + $0xd9] sm:$0xff] }
 0x260   : > { %v4863_v44 = vpop.f32.mrf.mxu3 }
 0x261   : > { %5598 = vst [vmem:[#allocation145_spill] sm:$0xff] %v4863_v44 }
 0x262   : > { %v2511_v52 = vpop.f32.mrf.mxu0 }
 0x263   : > { %3408 = vmatmul.msk.f32.gmra.mxu2 %vm362_vm3, %v4334_v19  ;;  %v4879_v19 = vpop.f32.mrf.mxu1 }
 0x265   : > { %3441 = vmatmul.msk.f32.gmra.mxu3 %vm362_vm3, %v977_v50  ;;  %3475 = vmatmul.msk.f32.gmra.mxu0 %vm362_vm3, %v1255_v16  ;;  %v5602_v50 = vld [vmem:[#allocation8_spill] sm:$0xff] }
 0x266   : > { %v4871_v24 = vpop.f32.mrf.mxu2  ;;  %v1876_v16 = vadd.f32 %v4558_v26, %v5602_v50  ;;  %v1258_v50 = vld [vmem:[#allocation3 + $0x110] sm:$0xff] }
 0x267   : > { %5600 = vst [vmem:[#allocation147_spill] sm:$0xff] %v4871_v24 }
 0x268   : > { %v4873_v8 = vpop.f32.mrf.mxu3 }
 0x269   : > { %5601 = vst [vmem:[#allocation148_spill] sm:$0xff] %v4873_v8  ;;  %v2512_v8 = vadd.f32 %v2511_v52, %v4456_v60 }
 0x26a   : > { %v2514_v10 = vpop.f32.mrf.mxu0 }
 0x26b   : > { %3409 = vmatmul.msk.f32.gmra.mxu2 %vm362_vm3, %v4350_v48  ;;  %v979_v48 = vld [vmem:[#allocation3 + $0xe1] sm:$0xff] }
 0x26d   : > { %3442 = vmatmul.msk.f32.gmra.mxu3 %vm362_vm3, %v978_v58  ;;  %3476 = vmatmul.msk.f32.gmra.mxu0 %vm362_vm3, %v1256_v25 }
 0x26e   : > { %v2087_v44 = vpop.f32.mrf.mxu2 }
 0x26f   : > { %v2088_v24 = vadd.f32 %v2087_v44, %v4202_v33  ;;  %v5603_v33 = vld [vmem:[#allocation9_spill] sm:$0xff] }
 0x270   : > { %v2299_v53 = vpop.f32.mrf.mxu3  ;;  %v1879_v44 = vadd.f32 %v4578_v22, %v5603_v33 }
 0x271   : > { %v2607_v49 = vadd.f32 %v2088_v24, %v1876_v16  ;;  %v2300_v27 = vadd.f32 %v2299_v53, %v4454_v23  ;;  %v4894_v53 = vpop.f32.mrf.mxu1 }
 0x272   : > { %v2517_v54 = vpop.f32.mrf.mxu0 }
 0x273   : > { %v2639_v58 = vadd.f32 %v2512_v8, %v2300_v27  ;;  %3410 = vmatmul.msk.f32.gmra.mxu2 %vm362_vm3, %v4368_v56  ;;  %v2515_v27 = vadd.f32 %v2514_v10, %v4474_v7  ;;  %v1882_v7 = vadd.f32 %v4598_v4, %v4175_v38  ;;  %v5604_v4 = vld [vmem:[#allocation14_spill] sm:$0xff] }
 0x275   : > { %v2671_v25 = vadd.f32 %v2639_v58, %v2607_v49  ;;  %3443 = vmatmul.msk.f32.gmra.mxu3 %vm362_vm3, %v979_v48  ;;  %3477 = vmatmul.msk.f32.gmra.mxu0 %vm362_vm3, %v1257_v13  ;;  %v980_v13 = vld [vmem:[#allocation3 + $0xf1] sm:$0xff]  ;;  %v2518_v48 = vadd.f32 %v2517_v54, %v4492_v31 }
 0x276   : > { %v2090_v26 = vpop.f32.mrf.mxu2 }
 0x277   : > { %v2703_v60 = vadd.f32 %v2671_v25, %v4424_v20  ;;  %v2091_v23 = vadd.f32 %v2090_v26, %v4222_v41 }
 0x278   : > { %v2302_v52 = vpop.f32.mrf.mxu3 }
 0x279   : > { %v2735_v56 = vmax.f32 %v2703_v60, 0.0  ;;  %v2608_v49 = vadd.f32 %v2091_v23, %v1879_v44  ;;  %v2303_v24 = vadd.f32 %v2302_v52, %v4472_v11  ;;  %v4909_v26 = vpop.f32.mrf.mxu1  ;;  %v981_v44 = vld [vmem:[#allocation3 + $0xf9] sm:$0xff] }
 0x27a   : > { %v2520_v8 = vpop.f32.mrf.mxu0  ;;  %v1259_v60 = vld [vmem:[#allocation3 + $0x120] sm:$0xff] }
 0x27b   : > { %v2640_v16 = vadd.f32 %v2515_v27, %v2303_v24  ;;  %3491 = vmatmul.msk.f32.vlgmr.msra.gmra.mxu1 %vm2767_vm5, %v2735_v56  ;;  %3411 = vmatmul.msk.f32.gmra.mxu2 %vm362_vm3, %v4386_v51  ;;  %v2521_v52 = vadd.f32 %v2520_v8, %v4508_v47  ;;  %v982_v24 = vld [vmem:[#allocation3 + $0x109] sm:$0xff]  ;;  %v5605_v47 = vld [vmem:[#allocation17_spill] sm:$0xff] }
 0x27d   : > { %v2672_v41 = vadd.f32 %v2640_v16, %v2608_v49  ;;  %3444 = vmatmul.msk.f32.gmra.mxu3 %vm362_vm3, %v980_v13  ;;  %3478 = vmatmul.msk.f32.gmra.mxu0 %vm362_vm3, %v1258_v50  ;;  %v1260_v13 = vld [vmem:[#allocation3 + $0x128] sm:$0xff] }
 0x27e   : > { %v2093_v20 = vpop.f32.mrf.mxu2 }
 0x27f   : > { %v2704_v11 = vadd.f32 %v2672_v41, %v4440_v1  ;;  %v2094_v22 = vadd.f32 %v2093_v20, %v4242_v61  ;;  %v1885_v1 = vadd.f32 %v4617_v30, %v5604_v4  ;;  %v984_v4 = vld [vmem:[#allocation3 + $0x121] sm:$0xff] }
 0x280   : > { %v2305_v10 = vpop.f32.mrf.mxu3 }
 0x281   : > { %v2609_v58 = vadd.f32 %v2094_v22, %v1882_v7  ;;  %v2306_v25 = vadd.f32 %v2305_v10, %v4488_v39  ;;  %v2736_v51 = vmax.f32 %v2704_v11, 0.0  ;;  %v4925_v30 = vpop.f32.mrf.mxu1  ;;  %v983_v10 = vld [vmem:[#allocation3 + $0x111] sm:$0xff] }
 0x282   : > { %v2523_v33 = vpop.f32.mrf.mxu0 }
 0x283   : > { %v2641_v23 = vadd.f32 %v2518_v48, %v2306_v25  ;;  %3492 = vmatmul.msk.f32.gmra.mxu1 %vm2767_vm5, %v2736_v51  ;;  %3412 = vmatmul.msk.f32.gmra.mxu2 %vm362_vm3, %v4408_v37  ;;  %v2524_v20 = vadd.f32 %v2523_v33, %v4526_v55  ;;  %v1261_v48 = vld [vmem:[#allocation3 + $0x138] sm:$0xff]  ;;  %v5606_v55 = vld [vmem:[#allocation20_spill] sm:$0xff]  ;;  %v5607_v51 = vld [vmem:[#allocation34_spill] sm:$0xff] }
 0x285   : > { %v2673_v38 = vadd.f32 %v2641_v23, %v2609_v58  ;;  %3445 = vmatmul.msk.f32.gmra.mxu3 %vm362_vm3, %v981_v44  ;;  %3479 = vmatmul.msk.f32.gmra.mxu0 %vm362_vm3, %v1259_v60 }
 0x286   : > { %v2096_v61 = vpop.f32.mrf.mxu2 }
 0x287   : > { %v2705_v31 = vadd.f32 %v2673_v38, %v4458_v45  ;;  %v2097_v39 = vadd.f32 %v2096_v61, %v4266_v3 }
 0x288   : > { %v2308_v54 = vpop.f32.mrf.mxu3 }
 0x289   : > { %v2610_v27 = vadd.f32 %v2097_v39, %v1885_v1  ;;  %v2309_v56 = vadd.f32 %v2308_v54, %v4506_v5  ;;  %v2737_v37 = vmax.f32 %v2705_v31, 0.0  ;;  %v1888_v5 = vadd.f32 %v4637_v2, %v5605_v47  ;;  %v1262_v1 = vld [vmem:[#allocation3 + $0x140] sm:$0xff] }
 0x28a   : > { %v2526_v49 = vpop.f32.mrf.mxu0  ;;  %v5608_v39 = vld [vmem:[#allocation62_spill] sm:$0xff] }
 0x28b   : > { %v2642_v50 = vadd.f32 %v2521_v52, %v2309_v56  ;;  %3493 = vmatmul.msk.f32.gmra.mxu1 %vm2767_vm5, %v2737_v37  ;;  %3413 = vmatmul.msk.f32.gmra.mxu2 %vm362_vm3, %v4426_v43  ;;  %v2527_v60 = vadd.f32 %v2526_v49, %v4544_v0  ;;  %v5609_v0 = vld [vmem:[#allocation23_spill] sm:$0xff] }
 0x28c   : > { %v1894_v54 = vadd.f32 %v4673_v17, %v5609_v0  ;;  %v5613_v17 = vld [vmem:[#allocation64_spill] sm:$0xff]  ;;  %v5622_v0 = vld [vmem:[#allocation81_spill] sm:$0xff] }
 0x28d   : > { %v2674_v45 = vadd.f32 %v2642_v50, %v2610_v27  ;;  %3446 = vmatmul.msk.f32.gmra.mxu3 %vm362_vm3, %v982_v24  ;;  %3480 = vmatmul.msk.f32.gmra.mxu0 %vm362_vm3, %v1260_v13  ;;  %v5611_v27 = vld [vmem:[#allocation39_spill] sm:$0xff] }
 0x28e   : > { %v2099_v3 = vpop.f32.mrf.mxu2  ;;  %v5612_v50 = vld [vmem:[#allocation75_spill] sm:$0xff] }
 0x28f   : > { %v2706_v8 = vadd.f32 %v2674_v45, %v4476_v63  ;;  %v2100_v16 = vadd.f32 %v2099_v3, %v4290_v32  ;;  %v4940_v32 = vpop.f32.mrf.mxu1 }
 0x290   : > { %v2311_v41 = vpop.f32.mrf.mxu3 }
 0x291   : > { %v2611_v7 = vadd.f32 %v2100_v16, %v1888_v5  ;;  %v2312_v43 = vadd.f32 %v2311_v41, %v4524_v9  ;;  %v2738_v11 = vmax.f32 %v2706_v8, 0.0  ;;  %v1891_v9 = vadd.f32 %v4655_v21, %v5606_v55  ;;  %v985_v5 = vld [vmem:[#allocation3 + $0x129] sm:$0xff] }
 0x292   : > { %v2529_v22 = vpop.f32.mrf.mxu0  ;;  %v1263_v8 = vld [vmem:[#allocation3 + $0x150] sm:$0xff] }
 0x293   : > { %v2643_v58 = vadd.f32 %v2524_v20, %v2312_v43  ;;  %3494 = vmatmul.msk.f32.gmra.mxu1 %vm2767_vm5, %v2738_v11  ;;  %3414 = vmatmul.msk.f32.gmra.mxu2 %vm362_vm3, %v4442_v6  ;;  %v2530_v24 = vadd.f32 %v2529_v22, %v4562_v15  ;;  %v5614_v15 = vld [vmem:[#allocation26_spill] sm:$0xff]  ;;  %v5616_v22 = vld [vmem:[#allocation44_spill] sm:$0xff] }
 0x294   : > { %v5615_v43 = vld [vmem:[#allocation70_spill] sm:$0xff] }
 0x295   : > { %v2675_v2 = vadd.f32 %v2643_v58, %v2611_v7  ;;  %3447 = vmatmul.msk.f32.gmra.mxu3 %vm362_vm3, %v983_v10  ;;  %3481 = vmatmul.msk.f32.gmra.mxu0 %vm362_vm3, %v1261_v48  ;;  %v1897_v7 = vadd.f32 %v4689_v57, %v5614_v15  ;;  %v5618_v57 = vld [vmem:[#allocation66_spill] sm:$0xff] }
 0x296   : > { %v2102_v63 = vpop.f32.mrf.mxu2 }
 0x297   : > { %v2707_v25 = vadd.f32 %v2675_v2, %v4494_v14  ;;  %v2103_v33 = vadd.f32 %v2102_v63, %v5607_v51  ;;  %v4957_v37 = vpop.f32.mrf.mxu1  ;;  %v5617_v63 = vld [vmem:[#allocation78_spill] sm:$0xff] }
 0x298   : > { %v2314_v44 = vpop.f32.mrf.mxu3 }
 0x299   : > { %v2612_v23 = vadd.f32 %v2103_v33, %v1891_v9  ;;  %v2315_v6 = vadd.f32 %v2314_v44, %v4542_v18  ;;  %v2739_v38 = vmax.f32 %v2707_v25, 0.0  ;;  %v5610_v18 = vld [vmem:[#allocation68_spill] sm:$0xff]  ;;  %v986_v33 = vld [vmem:[#allocation3 + $0x139] sm:$0xff] }
 0x29a   : > { %v2532_v61 = vpop.f32.mrf.mxu0  ;;  %v1264_v44 = vld [vmem:[#allocation3 + $0x158] sm:$0xff] }
 0x29b   : > { %v2644_v31 = vadd.f32 %v2527_v60, %v2315_v6  ;;  %3495 = vmatmul.msk.f32.gmra.mxu1 %vm2767_vm5, %v2739_v38  ;;  %3415 = vmatmul.msk.f32.gmra.mxu2 %vm362_vm3, %v5608_v39  ;;  %v2533_v58 = vadd.f32 %v2532_v61, %v4580_v40  ;;  %v5619_v6 = vld [vmem:[#allocation29_spill] sm:$0xff] }
 0x29c   : > { %v1900_v38 = vadd.f32 %v4737_v59, %v5619_v6  ;;  %v5620_v61 = vld [vmem:[#allocation73_spill] sm:$0xff] }
 0x29d   : > { %v2676_v21 = vadd.f32 %v2644_v31, %v2612_v23  ;;  %3448 = vmatmul.msk.f32.gmra.mxu3 %vm362_vm3, %v984_v4  ;;  %3482 = vmatmul.msk.f32.gmra.mxu0 %vm362_vm3, %v1262_v1  ;;  %v5621_v1 = vld [vmem:[#allocation48_spill] sm:$0xff] }
 0x29e   : > { %v2105_v14 = vpop.f32.mrf.mxu2 }
 0x29f   : > { %v2708_v52 = vadd.f32 %v2676_v21, %v5610_v18  ;;  %v2106_v56 = vadd.f32 %v2105_v14, %v5611_v27  ;;  %v4972_v25 = vpop.f32.mrf.mxu1  ;;  %v987_v27 = vld [vmem:[#allocation3 + $0x141] sm:$0xff] }
 0x2a0   : > { %v2317_v49 = vpop.f32.mrf.mxu3 }
 0x2a1   : > { %v2613_v13 = vadd.f32 %v2106_v56, %v1894_v54  ;;  %v2318_v45 = vadd.f32 %v2317_v49, %v5612_v50  ;;  %v2740_v3 = vmax.f32 %v2708_v52, 0.0  ;;  %v1265_v56 = vld [vmem:[#allocation3 + $0x168] sm:$0xff]  ;;  %v5624_v50 = vld [vmem:[#allocation32_spill] sm:$0xff] }
 0x2a2   : > { %v2535_v47 = vpop.f32.mrf.mxu0 }
 0x2a3   : > { %v2645_v16 = vadd.f32 %v2530_v24, %v2318_v45  ;;  %3496 = vmatmul.msk.f32.gmra.mxu1 %vm2767_vm5, %v2740_v3  ;;  %3416 = vmatmul.msk.f32.gmra.mxu2 %vm362_vm3, %v5613_v17  ;;  %v2536_v21 = vadd.f32 %v2535_v47, %v4596_v36  ;;  %v5623_v24 = vld [vmem:[#allocation69_spill] sm:$0xff]  ;;  %v1903_v45 = vadd.f32 %v4753_v34, %v5624_v50  ;;  %v5625_v3 = vld [vmem:[#allocation76_spill] sm:$0xff] }
 0x2a4   : > { %v5627_v17 = vld [vmem:[#allocation84_spill] sm:$0xff] }
 0x2a5   : > { %v2677_v41 = vadd.f32 %v2645_v16, %v2613_v13  ;;  %3449 = vmatmul.msk.f32.gmra.mxu3 %vm362_vm3, %v985_v5  ;;  %3483 = vmatmul.msk.f32.gmra.mxu0 %vm362_vm3, %v1263_v8  ;;  %v5626_v5 = vld [vmem:[#allocation53_spill] sm:$0xff] }
 0x2a6   : > { %v2108_v20 = vpop.f32.mrf.mxu2 }
 0x2a7   : > { %v2709_v11 = vadd.f32 %v2677_v41, %v5615_v43  ;;  %v2109_v10 = vadd.f32 %v2108_v20, %v5616_v22  ;;  %v4988_v59 = vpop.f32.mrf.mxu1  ;;  %v988_v22 = vld [vmem:[#allocation3 + $0x151] sm:$0xff] }
 0x2a8   : > { %v2320_v48 = vpop.f32.mrf.mxu3 }
 0x2a9   : > { %v2614_v2 = vadd.f32 %v2109_v10, %v1897_v7  ;;  %v2321_v55 = vadd.f32 %v2320_v48, %v5617_v63  ;;  %v2741_v9 = vmax.f32 %v2709_v11, 0.0  ;;  %v5628_v7 = vld [vmem:[#allocation83_spill] sm:$0xff]  ;;  %v1266_v10 = vld [vmem:[#allocation3 + $0x170] sm:$0xff] }
 0x2aa   : > { %v2538_v51 = vpop.f32.mrf.mxu0 }
 0x2ab   : > { %v2646_v60 = vadd.f32 %v2533_v58, %v2321_v55  ;;  %3497 = vmatmul.msk.f32.gmra.mxu1 %vm2767_vm5, %v2741_v9  ;;  %3417 = vmatmul.msk.f32.gmra.mxu2 %vm362_vm3, %v5618_v57  ;;  %v2539_v41 = vadd.f32 %v2538_v51, %v5627_v17  ;;  %v5629_v58 = vld [vmem:[#allocation71_spill] sm:$0xff]  ;;  %v5630_v55 = vld [vmem:[#allocation36_spill] sm:$0xff] }
 0x2ac   : > { %v1906_v9 = vadd.f32 %v4767_v35, %v5630_v55  ;;  %v5631_v51 = vld [vmem:[#allocation79_spill] sm:$0xff] }
 0x2ad   : > { %v2678_v23 = vadd.f32 %v2646_v60, %v2614_v2  ;;  %3450 = vmatmul.msk.f32.gmra.mxu3 %vm362_vm3, %v986_v33  ;;  %3484 = vmatmul.msk.f32.gmra.mxu0 %vm362_vm3, %v1264_v44  ;;  %v5632_v44 = vld [vmem:[#allocation58_spill] sm:$0xff]  ;;  %v1268_v17 = vld [vmem:[#allocation3 + $0x188] sm:$0xff] }
 0x2ae   : > { %v2111_v40 = vpop.f32.mrf.mxu2 }
 0x2af   : > { %v2710_v4 = vadd.f32 %v2678_v23, %v5620_v61  ;;  %v2112_v31 = vadd.f32 %v2111_v40, %v5621_v1  ;;  %v5003_v2 = vpop.f32.mrf.mxu1  ;;  %v5633_v23 = vld [vmem:[#allocation87_spill] sm:$0xff]  ;;  %v5634_v61 = vld [vmem:[#allocation86_spill] sm:$0xff] }
 0x2b0   : > { %v2323_v39 = vpop.f32.mrf.mxu3 }
 0x2b1   : > { %v2615_v14 = vadd.f32 %v2112_v31, %v1900_v38  ;;  %v2324_v54 = vadd.f32 %v2323_v39, %v5622_v0  ;;  %v2742_v18 = vmax.f32 %v2710_v4, 0.0  ;;  %v989_v31 = vld [vmem:[#allocation3 + $0x159] sm:$0xff] }
 0x2b2   : > { %v2541_v52 = vpop.f32.mrf.mxu0  ;;  %v1267_v39 = vld [vmem:[#allocation3 + $0x180] sm:$0xff] }
 0x2b3   : > { %v2647_v49 = vadd.f32 %v2536_v21, %v2324_v54  ;;  %3498 = vmatmul.msk.f32.gmra.mxu1 %vm2767_vm5, %v2742_v18  ;;  %3418 = vmatmul.msk.f32.gmra.mxu2 %vm362_vm3, %v5623_v24  ;;  %v2542_v40 = vadd.f32 %v2541_v52, %v5633_v23  ;;  %v5636_v54 = vld [vmem:[#allocation40_spill] sm:$0xff]  ;;  %v5637_v52 = vld [vmem:[#allocation82_spill] sm:$0xff]  ;;  %v1269_v23 = vld [vmem:[#allocation3 + $0x198] sm:$0xff] }
 0x2b4   : > { %v1909_v18 = vadd.f32 %v4781_v46, %v5636_v54  ;;  %v5641_v46 = vld [vmem:[#allocation77_spill] sm:$0xff] }
 0x2b5   : > { %v2679_v13 = vadd.f32 %v2647_v49, %v2615_v14  ;;  %3451 = vmatmul.msk.f32.gmra.mxu3 %vm362_vm3, %v987_v27  ;;  %3485 = vmatmul.msk.f32.gmra.mxu0 %vm362_vm3, %v1265_v56  ;;  %v5635_v14 = vld [vmem:[#allocation74_spill] sm:$0xff]  ;;  %v5638_v56 = vld [vmem:[#allocation61_spill] sm:$0xff] }
 0x2b6   : > { %v2114_v36 = vpop.f32.mrf.mxu2 }
 0x2b7   : > { %v2711_v47 = vadd.f32 %v2679_v13, %v5625_v3  ;;  %v2115_v8 = vadd.f32 %v2114_v36, %v5626_v5  ;;  %v5020_v24 = vpop.f32.mrf.mxu1  ;;  %v5639_v36 = vld [vmem:[#allocation90_spill] sm:$0xff] }
 0x2b8   : > { %v2326_v16 = vpop.f32.mrf.mxu3 }
 0x2b9   : > { %v2743_v20 = vmax.f32 %v2711_v47, 0.0  ;;  %v2616_v15 = vadd.f32 %v2115_v8, %v1903_v45  ;;  %v2327_v43 = vadd.f32 %v2326_v16, %v5628_v7  ;;  %v5640_v47 = vld [vmem:[#allocation89_spill] sm:$0xff]  ;;  %v990_v16 = vld [vmem:[#allocation3 + $0x169] sm:$0xff] }
 0x2ba   : > { %v2544_v11 = vpop.f32.mrf.mxu0  ;;  %v5642_v7 = vld [vmem:[#allocation43_spill] sm:$0xff] }
 0x2bb   : > { %v2648_v48 = vadd.f32 %v2539_v41, %v2327_v43  ;;  %3499 = vmatmul.msk.f32.gmra.mxu1 %vm2767_vm5, %v2743_v20  ;;  %3419 = vmatmul.msk.f32.gmra.mxu2 %vm362_vm3, %v5629_v58  ;;  %v2545_v50 = vadd.f32 %v2544_v11, %v5639_v36  ;;  %v1912_v43 = vadd.f32 %v4795_v29, %v5642_v7  ;;  %v5643_v11 = vld [vmem:[#allocation85_spill] sm:$0xff]  ;;  %v5647_v29 = vld [vmem:[#allocation80_spill] sm:$0xff] }
 0x2bd   : > { %v2680_v34 = vadd.f32 %v2648_v48, %v2616_v15  ;;  %3452 = vmatmul.msk.f32.gmra.mxu3 %vm362_vm3, %v988_v22  ;;  %3486 = vmatmul.msk.f32.gmra.mxu0 %vm362_vm3, %v1266_v10  ;;  %v5644_v10 = vld [vmem:[#allocation63_spill] sm:$0xff] }
 0x2be   : > { %v2117_v63 = vpop.f32.mrf.mxu2 }
 0x2bf   : > { %v2712_v33 = vadd.f32 %v2680_v34, %v5631_v51  ;;  %v2118_v60 = vadd.f32 %v2117_v63, %v5632_v44  ;;  %v5645_v34 = vld [vmem:[#allocation93_spill] sm:$0xff]  ;;  %v5646_v51 = vld [vmem:[#allocation4_spill] sm:$0xff]  ;;  %v5035_v44 = vpop.f32.mrf.mxu1 }
 0x2c0   : > { %v2329_v57 = vpop.f32.mrf.mxu3 }
 0x2c1   : > { %v2744_v6 = vmax.f32 %v2712_v33, 0.0  ;;  %v2617_v38 = vadd.f32 %v2118_v60, %v1906_v9  ;;  %v2330_v4 = vadd.f32 %v2329_v57, %v5634_v61  ;;  %v991_v57 = vld [vmem:[#allocation3 + $0x171] sm:$0xff]  ;;  %v5648_v61 = vld [vmem:[#allocation47_spill] sm:$0xff] }
 0x2c2   : > { %v2547_v1 = vpop.f32.mrf.mxu0 }
 0x2c3   : > { %v2649_v21 = vadd.f32 %v2542_v40, %v2330_v4  ;;  %3500 = vmatmul.msk.f32.gmra.mxu1 %vm2767_vm5, %v2744_v6  ;;  %3420 = vmatmul.msk.f32.gmra.mxu2 %vm362_vm3, %v5635_v14  ;;  %v2548_v63 = vadd.f32 %v2547_v1, %v5645_v34  ;;  %v1915_v4 = vadd.f32 %v4811_v42, %v5648_v61  ;;  %v5649_v1 = vld [vmem:[#allocation88_spill] sm:$0xff] }
 0x2c5   : > { %v2681_v35 = vadd.f32 %v2649_v21, %v2617_v38  ;;  %3453 = vmatmul.msk.f32.gmra.mxu3 %vm362_vm3, %v989_v31  ;;  %3487 = vmatmul.msk.f32.gmra.mxu0 %vm362_vm3, %v1267_v39  ;;  %v5650_v39 = vld [vmem:[#allocation65_spill] sm:$0xff] }
 0x2c6   : > { %v2120_v0 = vpop.f32.mrf.mxu2 }
 0x2c7   : > { %v2713_v27 = vadd.f32 %v2681_v35, %v5637_v52  ;;  %v2121_v49 = vadd.f32 %v2120_v0, %v5638_v56  ;;  %v716_v35 = vld [vmem:[#allocation3 + $0x16a] sm:$0xff]  ;;  %v5050_v42 = vpop.f32.mrf.mxu1 }
 0x2c8   : > { %v2332_v13 = vpop.f32.mrf.mxu3  ;;  %v5651_v0 = vld [vmem:[#allocation96_spill] sm:$0xff] }
 0x2c9   : > { %v2745_v45 = vmax.f32 %v2713_v27, 0.0  ;;  %v2618_v3 = vadd.f32 %v2121_v49, %v1909_v18  ;;  %v2333_v5 = vadd.f32 %v2332_v13, %v5640_v47  ;;  %v5652_v27 = vld [vmem:[#allocation5_spill] sm:$0xff]  ;;  %v1270_v13 = vld [vmem:[#allocation3 + $0x1a0] sm:$0xff]  ;;  %v5654_v47 = vld [vmem:[#allocation51_spill] sm:$0xff] }
 0x2ca   : > { %v2550_v8 = vpop.f32.mrf.mxu0 }
 0x2cb   : > { %v2650_v41 = vadd.f32 %v2545_v50, %v2333_v5  ;;  %3501 = vmatmul.msk.f32.gmra.mxu1 %vm2767_vm5, %v2745_v45  ;;  %3421 = vmatmul.msk.f32.gmra.mxu2 %vm362_vm3, %v5641_v46  ;;  %v2551_v54 = vadd.f32 %v2550_v8, %v5651_v0  ;;  %v5653_v45 = vld [vmem:[#allocation92_spill] sm:$0xff]  ;;  %v1918_v5 = vadd.f32 %v4825_v12, %v5654_v47  ;;  %v5655_v8 = vld [vmem:[#allocation91_spill] sm:$0xff]  ;;  %v5666_v0 = vld [vmem:[#allocation97_spill] sm:$0xff] }
 0x2cc   : > { %v5659_v12 = vld [vmem:[#allocation95_spill] sm:$0xff] }
 0x2cd   : > { %v2682_v20 = vadd.f32 %v2650_v41, %v2618_v3  ;;  %3454 = vmatmul.msk.f32.gmra.mxu3 %vm362_vm3, %v990_v16  ;;  %3488 = vmatmul.msk.f32.gmra.mxu0 %vm362_vm3, %v1268_v17  ;;  %v5656_v17 = vld [vmem:[#allocation67_spill] sm:$0xff] }
 0x2ce   : > { %v2123_v15 = vpop.f32.mrf.mxu2 }
 0x2cf   : > { %v2714_v22 = vadd.f32 %v2682_v20, %v5643_v11  ;;  %v2124_v48 = vadd.f32 %v2123_v15, %v5644_v10  ;;  %v717_v20 = vld [vmem:[#allocation3 + $0x172] sm:$0xff]  ;;  %v5657_v15 = vld [vmem:[#allocation98_spill] sm:$0xff] }
 0x2d0   : > { %v2335_v58 = vpop.f32.mrf.mxu3 }
 0x2d1   : > { %v2746_v55 = vmax.f32 %v2714_v22, 0.0  ;;  %v2619_v9 = vadd.f32 %v2124_v48, %v1912_v43  ;;  %v2336_v33 = vadd.f32 %v2335_v58, %v5646_v51  ;;  %v5658_v22 = vld [vmem:[#allocation6_spill] sm:$0xff] }
 0x2d2   : > { %v2553_v60 = vpop.f32.mrf.mxu0 }
 0x2d3   : > { %v2651_v40 = vadd.f32 %v2548_v63, %v2336_v33  ;;  %3502 = vmatmul.msk.f32.gmra.mxu1 %vm2767_vm5, %v2746_v55  ;;  %3422 = vmatmul.msk.f32.gmra.mxu2 %vm362_vm3, %v5647_v29  ;;  %v2554_v7 = vadd.f32 %v2553_v60, %v5657_v15  ;;  %v5065_v63 = vpop.f32.mrf.mxu1  ;;  %v5661_v33 = vld [vmem:[#allocation94_spill] sm:$0xff]  ;;  %v5663_v29 = vld [vmem:[#allocation100_spill] sm:$0xff]  ;;  %v5673_v15 = vld [vmem:[#allocation13_spill] sm:$0xff] }
 0x2d5   : > { %v2683_v6 = vadd.f32 %v2651_v40, %v2619_v9  ;;  %3455 = vmatmul.msk.f32.gmra.mxu3 %vm362_vm3, %v991_v57  ;;  %3489 = vmatmul.msk.f32.gmra.mxu0 %vm362_vm3, %v1269_v23  ;;  %v5660_v9 = vld [vmem:[#allocation55_spill] sm:$0xff]  ;;  %v5662_v57 = vld [vmem:[#allocation72_spill] sm:$0xff] }
 0x2d6   : > { %v2126_v38 = vpop.f32.mrf.mxu2  ;;  %v1921_v51 = vadd.f32 %v4839_v62, %v5660_v9 }
 0x2d7   : > { %v2715_v31 = vadd.f32 %v2683_v6, %v5649_v1  ;;  %v2127_v21 = vadd.f32 %v2126_v38, %v5650_v39 }
 0x2d8   : > { %v2338_v14 = vpop.f32.mrf.mxu3 }
 0x2d9   : > { %v2747_v18 = vmax.f32 %v2715_v31, 0.0  ;;  %v2620_v52 = vadd.f32 %v2127_v21, %v1915_v4  ;;  %v2339_v56 = vadd.f32 %v2338_v14, %v5652_v27  ;;  %v5664_v4 = vld [vmem:[#allocation7_spill] sm:$0xff] }
 0x2da   : > { %v2556_v49 = vpop.f32.mrf.mxu0 }
 0x2db   : > { %v2652_v36 = vadd.f32 %v2551_v54, %v2339_v56  ;;  %3503 = vmatmul.msk.f32.gmra.mxu1 %vm2767_vm5, %v2747_v18  ;;  %3423 = vmatmul.msk.f32.gmra.mxu2 %vm362_vm3, %v716_v35  ;;  %v2557_v6 = vadd.f32 %v2556_v49, %v5663_v29  ;;  %v5665_v35 = vld [vmem:[#allocation10_spill] sm:$0xff]  ;;  %v5667_v18 = vld [vmem:[#allocation11_spill] sm:$0xff]  ;;  %v5078_v27 = vpop.f32.mrf.mxu1  ;;  %v5677_v29 = vld [vmem:[#allocation101_spill] sm:$0xff] }
 0x2dc   : > { %v1924_v62 = vadd.f32 %v4853_v28, %v5665_v35  ;;  %v5668_v49 = vld [vmem:[#allocation103_spill] sm:$0xff]  ;;  %v5670_v28 = vld [vmem:[#allocation12_spill] sm:$0xff] }
 0x2dd   : > { %v2684_v50 = vadd.f32 %v2652_v36, %v2620_v52  ;;  %3456 = vmatmul.msk.f32.gmra.mxu3 %vm362_vm3, %v5653_v45  ;;  %3490 = vmatmul.msk.f32.gmra.mxu0 %vm362_vm3, %v1270_v13  ;;  %v5669_v45 = vld [vmem:[#allocation102_spill] sm:$0xff]  ;;  %v5680_v35 = vld [vmem:[#allocation108_spill] sm:$0xff] }
 0x2de   : > { %v2129_v3 = vpop.f32.mrf.mxu2 }
 0x2df   : > { %v2716_v16 = vadd.f32 %v2684_v50, %v5655_v8  ;;  %v2130_v41 = vadd.f32 %v2129_v3, %v5656_v17  ;;  %v5671_v17 = vld [vmem:[#allocation146_spill] sm:$0xff] }
 0x2e0   : > { %v2341_v46 = vpop.f32.mrf.mxu3 }
 0x2e1   : > { %v2748_v43 = vmax.f32 %v2716_v16, 0.0  ;;  %v2621_v11 = vadd.f32 %v2130_v41, %v1918_v5  ;;  %v2342_v10 = vadd.f32 %v2341_v46, %v5658_v22  ;;  %v1927_v41 = vadd.f32 %v5671_v17, %v5670_v28  ;;  %v5672_v46 = vld [vmem:[#allocation99_spill] sm:$0xff] }
 0x2e2   : > { %v2559_v48 = vpop.f32.mrf.mxu0 }
 0x2e3   : > { %v2653_v58 = vadd.f32 %v2554_v7, %v2342_v10  ;;  %3504 = vmatmul.msk.f32.gmra.mxu1 %vm2767_vm5, %v2748_v43  ;;  %3424 = vmatmul.msk.f32.gmra.mxu2 %vm362_vm3, %v717_v20  ;;  %v2560_v13 = vadd.f32 %v2559_v48, %v5668_v49  ;;  %v5674_v43 = vld [vmem:[#allocation106_spill] sm:$0xff] }
 0x2e4   : > { %v5681_v49 = vld [vmem:[#allocation18_spill] sm:$0xff] }
 0x2e5   : > { %v2685_v34 = vadd.f32 %v2653_v58, %v2621_v11  ;;  %3457 = vmatmul.msk.f32.gmra.mxu3 %vm362_vm3, %v5659_v12 }
 0x2e6   : > { %v2132_v55 = vpop.f32.mrf.mxu2 }
 0x2e7   : > { %v2717_v60 = vadd.f32 %v2685_v34, %v5661_v33  ;;  %v2133_v23 = vadd.f32 %v2132_v55, %v5662_v57  ;;  %v5675_v34 = vld [vmem:[#allocation105_spill] sm:$0xff]  ;;  %v3572_v55 = vld [vmem:[#allocation2] sm:$0xff] }
 0x2e8   : > { %v2344_v40 = vpop.f32.mrf.mxu3 }
 0x2e9   : > { %v2749_v38 = vmax.f32 %v2717_v60, 0.0  ;;  %v2622_v61 = vadd.f32 %v2133_v23, %v1921_v51  ;;  %v2345_v1 = vadd.f32 %v2344_v40, %v5664_v4  ;;  %v5676_v23 = vld [vmem:[#allocation15_spill] sm:$0xff]  ;;  %v5679_v4 = vld [vmem:[#allocation109_spill] sm:$0xff] }
 0x2ea   : > { %v2562_v31 = vpop.f32.mrf.mxu0  ;;  %v1930_v40 = vadd.f32 %v4879_v19, %v5676_v23 }
 0x2eb   : > { %v2654_v39 = vadd.f32 %v2557_v6, %v2345_v1  ;;  %3505 = vmatmul.msk.f32.gmra.mxu1 %vm2767_vm5, %v2749_v38  ;;  %v2563_v11 = vadd.f32 %v2562_v31, %v5674_v43  ;;  %v5678_v38 = vld [vmem:[#allocation16_spill] sm:$0xff] }
 0x2ed   : > { %v2686_v21 = vadd.f32 %v2654_v39, %v2622_v61 }
 0x2ee   : > { %v2135_v14 = vpop.f32.mrf.mxu2 }
 0x2ef   : > { %v2718_v54 = vadd.f32 %v2686_v21, %v5666_v0  ;;  %v2136_v52 = vadd.f32 %v2135_v14, %v5667_v18  ;;  %v3573_v0 = vld [vmem:[#allocation2 + $0x8] sm:$0xff] }
 0x2f0   : > { %v2347_v56 = vpop.f32.mrf.mxu3 }
 0x2f1   : > { %v2750_v36 = vmax.f32 %v2718_v54, 0.0  ;;  %v2623_v50 = vadd.f32 %v2136_v52, %v1924_v62  ;;  %v2348_v3 = vadd.f32 %v2347_v56, %v5669_v45  ;;  %v5683_v45 = vld [vmem:[#allocation19_spill] sm:$0xff] }
 0x2f2   : > { %v2565_v47 = vpop.f32.mrf.mxu0 }
 0x2f3   : > { %v2655_v5 = vadd.f32 %v2560_v13, %v2348_v3  ;;  %3506 = vmatmul.msk.f32.gmra.mxu1 %vm2767_vm5, %v2750_v36  ;;  %v2566_v1 = vadd.f32 %v2565_v47, %v5679_v4  ;;  %v1933_v13 = vadd.f32 %v4894_v53, %v5681_v49  ;;  %v5682_v36 = vld [vmem:[#allocation104_spill] sm:$0xff] }
 0x2f4   : > { %v5684_v47 = vld [vmem:[#allocation112_spill] sm:$0xff] }
 0x2f5   : > { %v2687_v8 = vadd.f32 %v2655_v5, %v2623_v50 }
 0x2f6   : > { %v2138_v16 = vpop.f32.mrf.mxu2 }
 0x2f7   : > { %v2719_v20 = vadd.f32 %v2687_v8, %v5672_v46  ;;  %v2139_v7 = vadd.f32 %v2138_v16, %v5673_v15 }
 0x2f8   : > { %v2350_v22 = vpop.f32.mrf.mxu3  ;;  %v2881_v10 = vpop.f32.mrf.mxu1 }
 0x2f9   : > { %v2751_v48 = vmax.f32 %v2719_v20, 0.0  ;;  %v2624_v58 = vadd.f32 %v2139_v7, %v1927_v41  ;;  %v2351_v12 = vadd.f32 %v2350_v22, %v5675_v34  ;;  %v5089_v9 = vadd.f32 %v3572_v55, %v2881_v10  ;;  %v5685_v41 = vld [vmem:[#allocation111_spill] sm:$0xff]  ;;  %v3574_v20 = vld [vmem:[#allocation2 + $0x10] sm:$0xff]  ;;  %v5686_v22 = vld [vmem:[#allocation21_spill] sm:$0xff] }
 0x2fa   : > { %v2568_v51 = vpop.f32.mrf.mxu0  ;;  %v1936_v10 = vadd.f32 %v4909_v26, %v5686_v22  ;;  %v5688_v34 = vld [vmem:[#allocation22_spill] sm:$0xff]  ;;  %v5689_v55 = vld [vmem:[#allocation115_spill] sm:$0xff] }
 0x2fb   : > { %v2656_v33 = vadd.f32 %v2563_v11, %v2351_v12  ;;  %3507 = vmatmul.msk.f32.gmra.mxu1 %vm2767_vm5, %v2751_v48  ;;  %v2569_v5 = vadd.f32 %v2568_v51, %v5684_v47  ;;  %v5687_v48 = vld [vmem:[#allocation107_spill] sm:$0xff] }
 0x2fd   : > { %v2688_v60 = vadd.f32 %v2656_v33, %v2624_v58 }
 0x2fe   : > { %v2141_v57 = vpop.f32.mrf.mxu2 }
 0x2ff   : > { %v2720_v6 = vadd.f32 %v2688_v60, %v5677_v29  ;;  %v2142_v61 = vadd.f32 %v2141_v57, %v5678_v38 }
 0x300   : > { %v2353_v31 = vpop.f32.mrf.mxu3  ;;  %v2884_v39 = vpop.f32.mrf.mxu1 }
 0x301   : > { %v2752_v21 = vmax.f32 %v2720_v6, 0.0  ;;  %v2625_v14 = vadd.f32 %v2142_v61, %v1930_v40  ;;  %v2354_v62 = vadd.f32 %v2353_v31, %v5680_v35  ;;  %v5098_v54 = vadd.f32 %v3573_v0, %v2884_v39  ;;  %v5690_v40 = vld [vmem:[#allocation114_spill] sm:$0xff]  ;;  %v3575_v6 = vld [vmem:[#allocation2 + $0x18] sm:$0xff]  ;;  %v5691_v31 = vld [vmem:[#allocation24_spill] sm:$0xff] }
 0x302   : > { %v2571_v18 = vpop.f32.mrf.mxu0  ;;  %v1939_v39 = vadd.f32 %v4925_v30, %v5691_v31  ;;  %v5693_v35 = vld [vmem:[#allocation25_spill] sm:$0xff]  ;;  %v5694_v0 = vld [vmem:[#allocation118_spill] sm:$0xff] }
 0x303   : > { %v2657_v52 = vadd.f32 %v2566_v1, %v2354_v62  ;;  %3508 = vmatmul.msk.f32.gmra.mxu1 %vm2767_vm5, %v2752_v21  ;;  %v2572_v51 = vadd.f32 %v2571_v18, %v5689_v55  ;;  %v5692_v21 = vld [vmem:[#allocation110_spill] sm:$0xff] }
 0x305   : > { %v2689_v19 = vadd.f32 %v2657_v52, %v2625_v14 }
 0x306   : > { %v2144_v56 = vpop.f32.mrf.mxu2 }
 0x307   : > { %v2721_v50 = vadd.f32 %v2689_v19, %v5682_v36  ;;  %v2145_v3 = vadd.f32 %v2144_v56, %v5683_v45 }
 0x308   : > { %v2356_v8 = vpop.f32.mrf.mxu3  ;;  %v2887_v16 = vpop.f32.mrf.mxu1 }
 0x309   : > { %v2753_v28 = vmax.f32 %v2721_v50, 0.0  ;;  %v2626_v17 = vadd.f32 %v2145_v3, %v1933_v13  ;;  %v2357_v46 = vadd.f32 %v2356_v8, %v5685_v41  ;;  %v5107_v15 = vadd.f32 %v3574_v20, %v2887_v16  ;;  %v5695_v13 = vld [vmem:[#allocation117_spill] sm:$0xff]  ;;  %v3576_v50 = vld [vmem:[#allocation2 + $0x20] sm:$0xff]  ;;  %v5696_v8 = vld [vmem:[#allocation27_spill] sm:$0xff] }
 0x30a   : > { %v2574_v7 = vpop.f32.mrf.mxu0  ;;  %v1942_v16 = vadd.f32 %v4940_v32, %v5696_v8  ;;  %v5698_v41 = vld [vmem:[#allocation28_spill] sm:$0xff]  ;;  %v5699_v20 = vld [vmem:[#allocation121_spill] sm:$0xff] }
 0x30b   : > { %v2658_v43 = vadd.f32 %v2569_v5, %v2357_v46  ;;  %3509 = vmatmul.msk.f32.gmra.mxu1 %vm2767_vm5, %v2753_v28  ;;  %v2575_v18 = vadd.f32 %v2574_v7, %v5694_v0  ;;  %v5697_v28 = vld [vmem:[#allocation113_spill] sm:$0xff] }
 0x30d   : > { %v2690_v53 = vadd.f32 %v2658_v43, %v2626_v17 }
 0x30e   : > { %v2147_v11 = vpop.f32.mrf.mxu2 }
 0x30f   : > { %v2722_v58 = vadd.f32 %v2690_v53, %v5687_v48  ;;  %v2148_v12 = vadd.f32 %v2147_v11, %v5688_v34 }
 0x310   : > { %v2359_v33 = vpop.f32.mrf.mxu3  ;;  %v2890_v60 = vpop.f32.mrf.mxu1 }
 0x311   : > { %v2754_v57 = vmax.f32 %v2722_v58, 0.0  ;;  %v2627_v23 = vadd.f32 %v2148_v12, %v1936_v10  ;;  %v2360_v29 = vadd.f32 %v2359_v33, %v5690_v40  ;;  %v5116_v38 = vadd.f32 %v3575_v6, %v2890_v60  ;;  %v5700_v10 = vld [vmem:[#allocation120_spill] sm:$0xff]  ;;  %v3577_v58 = vld [vmem:[#allocation2 + $0x28] sm:$0xff]  ;;  %v5701_v33 = vld [vmem:[#allocation30_spill] sm:$0xff] }
 0x312   : > { %v2577_v61 = vpop.f32.mrf.mxu0  ;;  %v1945_v60 = vadd.f32 %v4957_v37, %v5701_v33  ;;  %v5703_v40 = vld [vmem:[#allocation31_spill] sm:$0xff]  ;;  %v5704_v6 = vld [vmem:[#allocation124_spill] sm:$0xff] }
 0x313   : > { %v2659_v4 = vadd.f32 %v2572_v51, %v2360_v29  ;;  %3510 = vmatmul.msk.f32.gmra.mxu1 %vm2767_vm5, %v2754_v57  ;;  %v2578_v7 = vadd.f32 %v2577_v61, %v5699_v20  ;;  %v5702_v57 = vld [vmem:[#allocation116_spill] sm:$0xff] }
 0x315   : > { %v2691_v26 = vadd.f32 %v2659_v4, %v2627_v23 }
 0x316   : > { %v2150_v1 = vpop.f32.mrf.mxu2 }
 0x317   : > { %v2723_v14 = vadd.f32 %v2691_v26, %v5692_v21  ;;  %v2151_v62 = vadd.f32 %v2150_v1, %v5693_v35 }
 0x318   : > { %v2362_v52 = vpop.f32.mrf.mxu3  ;;  %v2893_v19 = vpop.f32.mrf.mxu1 }
 0x319   : > { %v2755_v56 = vmax.f32 %v2723_v14, 0.0  ;;  %v2628_v49 = vadd.f32 %v2151_v62, %v1939_v39  ;;  %v2363_v36 = vadd.f32 %v2362_v52, %v5695_v13  ;;  %v5125_v45 = vadd.f32 %v3576_v50, %v2893_v19  ;;  %v5705_v39 = vld [vmem:[#allocation123_spill] sm:$0xff]  ;;  %v3578_v14 = vld [vmem:[#allocation2 + $0x30] sm:$0xff]  ;;  %v5706_v52 = vld [vmem:[#allocation33_spill] sm:$0xff] }
 0x31a   : > { %v2580_v3 = vpop.f32.mrf.mxu0  ;;  %v1948_v19 = vadd.f32 %v4972_v25, %v5706_v52  ;;  %v5708_v13 = vld [vmem:[#allocation35_spill] sm:$0xff] }
 0x31b   : > { %v2660_v47 = vadd.f32 %v2575_v18, %v2363_v36  ;;  %3511 = vmatmul.msk.f32.gmra.mxu1 %vm2767_vm5, %v2755_v56  ;;  %v2581_v61 = vadd.f32 %v2580_v3, %v5704_v6  ;;  %v5707_v56 = vld [vmem:[#allocation119_spill] sm:$0xff] }
 0x31c   : > { %v5709_v50 = vld [vmem:[#allocation127_spill] sm:$0xff] }
 0x31d   : > { %v2692_v30 = vadd.f32 %v2660_v47, %v2628_v49 }
 0x31e   : > { %v2153_v5 = vpop.f32.mrf.mxu2 }
 0x31f   : > { %v2724_v17 = vadd.f32 %v2692_v30, %v5697_v28  ;;  %v2154_v46 = vadd.f32 %v2153_v5, %v5698_v41 }
 0x320   : > { %v2365_v43 = vpop.f32.mrf.mxu3  ;;  %v2896_v53 = vpop.f32.mrf.mxu1 }
 0x321   : > { %v2756_v11 = vmax.f32 %v2724_v17, 0.0  ;;  %v2629_v22 = vadd.f32 %v2154_v46, %v1942_v16  ;;  %v2366_v48 = vadd.f32 %v2365_v43, %v5700_v10  ;;  %v5134_v34 = vadd.f32 %v3577_v58, %v2896_v53  ;;  %v5710_v16 = vld [vmem:[#allocation126_spill] sm:$0xff]  ;;  %v3579_v17 = vld [vmem:[#allocation2 + $0x38] sm:$0xff] }
 0x322   : > { %v2583_v12 = vpop.f32.mrf.mxu0  ;;  %v5711_v43 = vld [vmem:[#allocation37_spill] sm:$0xff]  ;;  %v5713_v10 = vld [vmem:[#allocation38_spill] sm:$0xff] }
 0x323   : > { %v2661_v55 = vadd.f32 %v2578_v7, %v2366_v48  ;;  %3512 = vmatmul.msk.f32.gmra.mxu1 %vm2767_vm5, %v2756_v11  ;;  %v2584_v3 = vadd.f32 %v2583_v12, %v5709_v50  ;;  %v1951_v53 = vadd.f32 %v4988_v59, %v5711_v43  ;;  %v5712_v11 = vld [vmem:[#allocation122_spill] sm:$0xff] }
 0x324   : > { %v5714_v58 = vld [vmem:[#allocation130_spill] sm:$0xff] }
 0x325   : > { %v2693_v32 = vadd.f32 %v2661_v55, %v2629_v22 }
 0x326   : > { %v2156_v51 = vpop.f32.mrf.mxu2 }
 0x327   : > { %v2725_v23 = vadd.f32 %v2693_v32, %v5702_v57  ;;  %v2157_v29 = vadd.f32 %v2156_v51, %v5703_v40 }
 0x328   : > { %v2368_v4 = vpop.f32.mrf.mxu3  ;;  %v2899_v26 = vpop.f32.mrf.mxu1 }
 0x329   : > { %v2757_v1 = vmax.f32 %v2725_v23, 0.0  ;;  %v2630_v31 = vadd.f32 %v2157_v29, %v1945_v60  ;;  %v2369_v21 = vadd.f32 %v2368_v4, %v5705_v39  ;;  %v5143_v35 = vadd.f32 %v3578_v14, %v2899_v26  ;;  %v5715_v60 = vld [vmem:[#allocation129_spill] sm:$0xff]  ;;  %v3580_v23 = vld [vmem:[#allocation2 + $0x40] sm:$0xff] }
 0x32a   : > { %v2586_v62 = vpop.f32.mrf.mxu0  ;;  %v5716_v4 = vld [vmem:[#allocation41_spill] sm:$0xff]  ;;  %v5718_v39 = vld [vmem:[#allocation42_spill] sm:$0xff] }
 0x32b   : > { %v2662_v0 = vadd.f32 %v2581_v61, %v2369_v21  ;;  %3513 = vmatmul.msk.f32.gmra.mxu1 %vm2767_vm5, %v2757_v1  ;;  %v2587_v12 = vadd.f32 %v2586_v62, %v5714_v58  ;;  %v1954_v26 = vadd.f32 %v5003_v2, %v5716_v4  ;;  %v5717_v1 = vld [vmem:[#allocation125_spill] sm:$0xff] }
 0x32c   : > { %v5719_v14 = vld [vmem:[#allocation133_spill] sm:$0xff] }
 0x32d   : > { %v2694_v37 = vadd.f32 %v2662_v0, %v2630_v31 }
 0x32e   : > { %v2159_v18 = vpop.f32.mrf.mxu2 }
 0x32f   : > { %v2726_v49 = vadd.f32 %v2694_v37, %v5707_v56  ;;  %v2160_v36 = vadd.f32 %v2159_v18, %v5708_v13 }
 0x330   : > { %v2371_v47 = vpop.f32.mrf.mxu3  ;;  %v2902_v30 = vpop.f32.mrf.mxu1 }
 0x331   : > { %v2758_v5 = vmax.f32 %v2726_v49, 0.0  ;;  %v2631_v8 = vadd.f32 %v2160_v36, %v1948_v19  ;;  %v2372_v28 = vadd.f32 %v2371_v47, %v5710_v16  ;;  %v5152_v41 = vadd.f32 %v3579_v17, %v2902_v30  ;;  %v5720_v19 = vld [vmem:[#allocation132_spill] sm:$0xff]  ;;  %v3581_v49 = vld [vmem:[#allocation2 + $0x48] sm:$0xff]  ;;  %v5723_v16 = vld [vmem:[#allocation46_spill] sm:$0xff] }
 0x332   : > { %v2589_v20 = vpop.f32.mrf.mxu0  ;;  %v5722_v30 = vld [vmem:[#allocation128_spill] sm:$0xff] }
 0x333   : > { %v2663_v46 = vadd.f32 %v2584_v3, %v2372_v28  ;;  %3514 = vmatmul.msk.f32.gmra.mxu1 %vm2767_vm5, %v2758_v5  ;;  %v2590_v62 = vadd.f32 %v2589_v20, %v5719_v14  ;;  %v5721_v3 = vld [vmem:[#allocation45_spill] sm:$0xff]  ;;  %v5724_v17 = vld [vmem:[#allocation136_spill] sm:$0xff] }
 0x334   : > { %v1957_v47 = vadd.f32 %v5020_v24, %v5721_v3 }
 0x335   : > { %v2695_v25 = vadd.f32 %v2663_v46, %v2631_v8 }
 0x336   : > { %v2162_v7 = vpop.f32.mrf.mxu2 }
 0x337   : > { %v2727_v22 = vadd.f32 %v2695_v25, %v5712_v11  ;;  %v2163_v48 = vadd.f32 %v2162_v7, %v5713_v10 }
 0x338   : > { %v2374_v55 = vpop.f32.mrf.mxu3  ;;  %v2905_v32 = vpop.f32.mrf.mxu1 }
 0x339   : > { %v2759_v51 = vmax.f32 %v2727_v22, 0.0  ;;  %v2632_v33 = vadd.f32 %v2163_v48, %v1951_v53  ;;  %v2375_v57 = vadd.f32 %v2374_v55, %v5715_v60  ;;  %v5161_v40 = vadd.f32 %v3580_v23, %v2905_v32  ;;  %v5725_v53 = vld [vmem:[#allocation135_spill] sm:$0xff]  ;;  %v3582_v22 = vld [vmem:[#allocation2 + $0x50] sm:$0xff] }
 0x33a   : > { %v2592_v59 = vpop.f32.mrf.mxu0  ;;  %v5727_v32 = vld [vmem:[#allocation131_spill] sm:$0xff] }
 0x33b   : > { %v2664_v29 = vadd.f32 %v2587_v12, %v2375_v57  ;;  %3515 = vmatmul.msk.f32.gmra.mxu1 %vm2767_vm5, %v2759_v51  ;;  %v2593_v46 = vadd.f32 %v2592_v59, %v5724_v17  ;;  %v5726_v12 = vld [vmem:[#allocation49_spill] sm:$0xff]  ;;  %v5729_v57 = vld [vmem:[#allocation139_spill] sm:$0xff] }
 0x33c   : > { %v1960_v55 = vadd.f32 %v5035_v44, %v5726_v12 }
 0x33d   : > { %v2696_v6 = vadd.f32 %v2664_v29, %v2632_v33  ;;  %v5728_v33 = vld [vmem:[#allocation50_spill] sm:$0xff] }
 0x33e   : > { %v2165_v61 = vpop.f32.mrf.mxu2 }
 0x33f   : > { %v2728_v31 = vadd.f32 %v2696_v6, %v5717_v1  ;;  %v2166_v21 = vadd.f32 %v2165_v61, %v5718_v39 }
 0x340   : > { %v2377_v0 = vpop.f32.mrf.mxu3  ;;  %v2908_v37 = vpop.f32.mrf.mxu1 }
 0x341   : > { %v2760_v18 = vmax.f32 %v2728_v31, 0.0  ;;  %v2633_v52 = vadd.f32 %v2166_v21, %v1954_v26  ;;  %v2378_v56 = vadd.f32 %v2377_v0, %v5720_v19  ;;  %v5170_v13 = vadd.f32 %v3581_v49, %v2908_v37  ;;  %v5730_v26 = vld [vmem:[#allocation138_spill] sm:$0xff]  ;;  %v3583_v31 = vld [vmem:[#allocation2 + $0x58] sm:$0xff] }
 0x342   : > { %v2595_v8 = vpop.f32.mrf.mxu0  ;;  %v5732_v37 = vld [vmem:[#allocation134_spill] sm:$0xff] }
 0x343   : > { %v2665_v36 = vadd.f32 %v2590_v62, %v2378_v56  ;;  %3516 = vmatmul.msk.f32.gmra.mxu1 %vm2767_vm5, %v2760_v18  ;;  %v2596_v23 = vadd.f32 %v2595_v8, %v5729_v57  ;;  %v5731_v62 = vld [vmem:[#allocation52_spill] sm:$0xff]  ;;  %v5734_v56 = vld [vmem:[#allocation142_spill] sm:$0xff] }
 0x344   : > { %v1963_v0 = vadd.f32 %v5050_v42, %v5731_v62 }
 0x345   : > { %v2697_v50 = vadd.f32 %v2665_v36, %v2633_v52  ;;  %v5733_v52 = vld [vmem:[#allocation54_spill] sm:$0xff] }
 0x346   : > { %v2168_v2 = vpop.f32.mrf.mxu2 }
 0x347   : > { %v2729_v5 = vadd.f32 %v2697_v50, %v5722_v30  ;;  %v2169_v28 = vadd.f32 %v2168_v2, %v5723_v16 }
 0x348   : > { %v2380_v20 = vpop.f32.mrf.mxu3  ;;  %v2911_v25 = vpop.f32.mrf.mxu1 }
 0x349   : > { %v2761_v7 = vmax.f32 %v2729_v5, 0.0  ;;  %v2634_v43 = vadd.f32 %v2169_v28, %v1957_v47  ;;  %v2381_v11 = vadd.f32 %v2380_v20, %v5725_v53  ;;  %v5179_v10 = vadd.f32 %v3582_v22, %v2911_v25  ;;  %v5735_v47 = vld [vmem:[#allocation141_spill] sm:$0xff]  ;;  %v3584_v5 = vld [vmem:[#allocation2 + $0x60] sm:$0xff] }
 0x34a   : > { %v2598_v61 = vpop.f32.mrf.mxu0  ;;  %v5737_v25 = vld [vmem:[#allocation137_spill] sm:$0xff] }
 0x34b   : > { %v2666_v48 = vadd.f32 %v2593_v46, %v2381_v11  ;;  %3517 = vmatmul.msk.f32.gmra.mxu1 %vm2767_vm5, %v2761_v7  ;;  %v2599_v49 = vadd.f32 %v2598_v61, %v5734_v56  ;;  %v5736_v46 = vld [vmem:[#allocation56_spill] sm:$0xff]  ;;  %v5739_v11 = vld [vmem:[#allocation145_spill] sm:$0xff] }
 0x34c   : > { %v1966_v20 = vadd.f32 %v5065_v63, %v5736_v46  ;;  %v3590_v46 = vld [vmem:[#allocation2 + $0x90] sm:$0xff] }
 0x34d   : > { %v2698_v24 = vadd.f32 %v2666_v48, %v2634_v43  ;;  %v5738_v43 = vld [vmem:[#allocation57_spill] sm:$0xff] }
 0x34e   : > { %v2171_v58 = vpop.f32.mrf.mxu2 }
 0x34f   : > { %v2730_v51 = vadd.f32 %v2698_v24, %v5727_v32  ;;  %v2172_v60 = vadd.f32 %v2171_v58, %v5728_v33 }
 0x350   : > { %v2383_v29 = vpop.f32.mrf.mxu3  ;;  %v2914_v6 = vpop.f32.mrf.mxu1 }
 0x351   : > { %v2762_v59 = vmax.f32 %v2730_v51, 0.0  ;;  %v2635_v4 = vadd.f32 %v2172_v60, %v1960_v55  ;;  %v2384_v1 = vadd.f32 %v2383_v29, %v5730_v26  ;;  %v5188_v39 = vadd.f32 %v3583_v31, %v2914_v6  ;;  %v5740_v55 = vld [vmem:[#allocation144_spill] sm:$0xff]  ;;  %v3585_v51 = vld [vmem:[#allocation2 + $0x68] sm:$0xff] }
 0x352   : > { %v2601_v16 = vpop.f32.mrf.mxu0  ;;  %v5741_v29 = vld [vmem:[#allocation59_spill] sm:$0xff] }
 0x353   : > { %v2667_v21 = vadd.f32 %v2596_v23, %v2384_v1  ;;  %3518 = vmatmul.msk.f32.gmra.mxu1 %vm2767_vm5, %v2762_v59  ;;  %v2602_v22 = vadd.f32 %v2601_v16, %v5739_v11  ;;  %v1969_v6 = vadd.f32 %v5078_v27, %v5741_v29  ;;  %v5742_v59 = vld [vmem:[#allocation140_spill] sm:$0xff]  ;;  %v5746_v27 = vld [vmem:[#allocation143_spill] sm:$0xff]  ;;  %v3592_v11 = vld [vmem:[#allocation2 + $0xa0] sm:$0xff] }
 0x354   : > { %v5744_v1 = vld [vmem:[#allocation148_spill] sm:$0xff] }
 0x355   : > { %v2699_v44 = vadd.f32 %v2667_v21, %v2635_v4  ;;  %v5743_v4 = vld [vmem:[#allocation60_spill] sm:$0xff] }
 0x356   : > { %v2174_v14 = vpop.f32.mrf.mxu2 }
 0x357   : > { %v2731_v18 = vadd.f32 %v2699_v44, %v5732_v37  ;;  %v2175_v19 = vadd.f32 %v2174_v14, %v5733_v52 }
 0x358   : > { %v2386_v36 = vpop.f32.mrf.mxu3  ;;  %v2917_v50 = vpop.f32.mrf.mxu1 }
 0x359   : > { %v2763_v2 = vmax.f32 %v2731_v18, 0.0  ;;  %v2636_v3 = vadd.f32 %v2175_v19, %v1963_v0  ;;  %v2387_v30 = vadd.f32 %v2386_v36, %v5735_v47  ;;  %v5197_v8 = vadd.f32 %v3584_v5, %v2917_v50  ;;  %v5745_v0 = vld [vmem:[#allocation147_spill] sm:$0xff]  ;;  %v3586_v18 = vld [vmem:[#allocation2 + $0x70] sm:$0xff] }
 0x35a   : > { %v2604_v57 = vpop.f32.mrf.mxu0 }
 0x35b   : > { %v2668_v28 = vadd.f32 %v2599_v49, %v2387_v30  ;;  %3519 = vmatmul.msk.f32.gmra.mxu1 %vm2767_vm5, %v2763_v2  ;;  %v2605_v31 = vadd.f32 %v2604_v57, %v5744_v1  ;;  %v3587_v2 = vld [vmem:[#allocation2 + $0x78] sm:$0xff]  ;;  %v3588_v30 = vld [vmem:[#allocation2 + $0x80] sm:$0xff] }
 0x35d   : > { %v2700_v42 = vadd.f32 %v2668_v28, %v2636_v3  ;;  %v3589_v28 = vld [vmem:[#allocation2 + $0x88] sm:$0xff] }
 0x35e   : > { %v2177_v17 = vpop.f32.mrf.mxu2 }
 0x35f   : > { %v2732_v7 = vadd.f32 %v2700_v42, %v5737_v25  ;;  %v2178_v53 = vadd.f32 %v2177_v17, %v5738_v43 }
 0x360   : > { %v2389_v48 = vpop.f32.mrf.mxu3  ;;  %v2920_v24 = vpop.f32.mrf.mxu1 }
 0x361   : > { %v2764_v58 = vmax.f32 %v2732_v7, 0.0  ;;  %v2637_v12 = vadd.f32 %v2178_v53, %v1966_v20  ;;  %v2390_v32 = vadd.f32 %v2389_v48, %v5740_v55  ;;  %v5206_v33 = vadd.f32 %v3585_v51, %v2920_v24  ;;  %v3591_v7 = vld [vmem:[#allocation2 + $0x98] sm:$0xff]  ;;  %v3593_v24 = vld [vmem:[#allocation2 + $0xa8] sm:$0xff]  ;;  %v3594_v55 = vld [vmem:[#allocation2 + $0xb0] sm:$0xff] }
 0x363   : > { %v2669_v60 = vadd.f32 %v2602_v22, %v2390_v32  ;;  %3520 = vmatmul.msk.f32.gmra.mxu1 %vm2767_vm5, %v2764_v58 }
 0x365   : > { %v2701_v63 = vadd.f32 %v2669_v60, %v2637_v12  ;;  %v3595_v60 = vld [vmem:[#allocation2 + $0xb8] sm:$0xff] }
 0x366   : > { %v2180_v23 = vpop.f32.mrf.mxu2 }
 0x367   : > { %v2733_v61 = vadd.f32 %v2701_v63, %v5742_v59  ;;  %v2181_v26 = vadd.f32 %v2180_v23, %v5743_v4  ;;  %v3596_v23 = vld [vmem:[#allocation2 + $0xc0] sm:$0xff]  ;;  %v3597_v59 = vld [vmem:[#allocation2 + $0xc8] sm:$0xff] }
 0x368   : > { %v2392_v21 = vpop.f32.mrf.mxu3  ;;  %v2923_v44 = vpop.f32.mrf.mxu1 }
 0x369   : > { %v2765_v14 = vmax.f32 %v2733_v61, 0.0  ;;  %v2638_v62 = vadd.f32 %v2181_v26, %v1969_v6  ;;  %v2393_v37 = vadd.f32 %v2392_v21, %v5745_v0  ;;  %v5215_v52 = vadd.f32 %v3586_v18, %v2923_v44  ;;  %v3598_v26 = vld [vmem:[#allocation2 + $0xd0] sm:$0xff]  ;;  %v3599_v21 = vld [vmem:[#allocation2 + $0xd8] sm:$0xff]  ;;  %v3601_v18 = vld [vmem:[#allocation2 + $0xe8] sm:$0xff] }
 0x36b   : > { %v2670_v19 = vadd.f32 %v2605_v31, %v2393_v37  ;;  %3521 = vmatmul.msk.f32.gmra.mxu1 %vm2767_vm5, %v2765_v14 }
 0x36d   : > { %v2702_v56 = vadd.f32 %v2670_v19, %v2638_v62  ;;  %v3600_v62 = vld [vmem:[#allocation2 + $0xe0] sm:$0xff] }
 0x36f   : > { %v2734_v49 = vadd.f32 %v2702_v56, %v5746_v27  ;;  %v3602_v27 = vld [vmem:[#allocation2 + $0xf0] sm:$0xff] }
 0x370   : > { %v2926_v36 = vpop.f32.mrf.mxu1 }
 0x371   : > { %v2766_v50 = vmax.f32 %v2734_v49, 0.0  ;;  %v5219_v3 = vadd.f32 %v3587_v2, %v2926_v36 }
 0x373   : > { %3522 = vmatmul.msk.f32.gmra.mxu1 %vm2767_vm5, %v2766_v50  ;;  %v3603_v50 = vld [vmem:[#allocation2 + $0xf8] sm:$0xff] }
 0x378   : > { %v2929_v47 = vpop.f32.mrf.mxu1 }
 0x379   : > { %v5222_v5 = vadd.f32 %v3588_v30, %v2929_v47 }
 0x380   : > { %v2932_v16 = vpop.f32.mrf.mxu1 }
 0x381   : > { %v5224_v42 = vadd.f32 %v3589_v28, %v2932_v16 }
 0x388   : > { %v2935_v17 = vpop.f32.mrf.mxu1 }
 0x389   : > { %v5226_v20 = vadd.f32 %v3590_v46, %v2935_v17 }
 0x390   : > { %v2938_v25 = vpop.f32.mrf.mxu1 }
 0x391   : > { %v5228_v43 = vadd.f32 %v3591_v7, %v2938_v25 }
 0x398   : > { %v2941_v53 = vpop.f32.mrf.mxu1 }
 0x399   : > { %v5230_v22 = vadd.f32 %v3592_v11, %v2941_v53 }
 0x3a0   : > { %v2944_v48 = vpop.f32.mrf.mxu1 }
 0x3a1   : > { %v5232_v58 = vadd.f32 %v3593_v24, %v2944_v48 }
 0x3a8   : > { %v2947_v12 = vpop.f32.mrf.mxu1 }
 0x3a9   : > { %v5234_v32 = vadd.f32 %v3594_v55, %v2947_v12 }
 0x3b0   : > { %v2950_v51 = vpop.f32.mrf.mxu1 }
 0x3b1   : > { %v5236_v57 = vadd.f32 %v3595_v60, %v2950_v51 }
 0x3b8   : > { %v2953_v63 = vpop.f32.mrf.mxu1 }
 0x3b9   : > { %v5238_v29 = vadd.f32 %v3596_v23, %v2953_v63 }
 0x3c0   : > { %v2956_v6 = vpop.f32.mrf.mxu1 }
 0x3c1   : > { %v5240_v61 = vadd.f32 %v3597_v59, %v2956_v6 }
 0x3c8   : > { %v2959_v4 = vpop.f32.mrf.mxu1 }
 0x3c9   : > { %v5242_v1 = vadd.f32 %v3598_v26, %v2959_v4 }
 0x3d0   : > { %v2962_v31 = vpop.f32.mrf.mxu1 }
 0x3d1   : > { %v5244_v44 = vadd.f32 %v3599_v21, %v2962_v31 }
 0x3d8   : > { %v2965_v14 = vpop.f32.mrf.mxu1 }
 0x3d9   : > { %v5246_v0 = vadd.f32 %v3600_v62, %v2965_v14 }
 0x3e0   : > { %v2968_v37 = vpop.f32.mrf.mxu1 }
 0x3e1   : > { %v5248_v19 = vadd.f32 %v3601_v18, %v2968_v37 }
 0x3e8   : > { %v2971_v56 = vpop.f32.mrf.mxu1 }
 0x3e9   : > { %v5250_v49 = vadd.f32 %v3602_v27, %v2971_v56 }
 0x3ed   : > { %3012 = sbr.rel (%p3523_p7) target bundleno = 1042 (0x412), region = 40 }
 0x3f0   : > { %v2974_v36 = vpop.f32.mrf.mxu1 }
 0x3f1   : > { %v5252_v2 = vadd.f32 %v3603_v50, %v2974_v36 }
 0x3f2   : > { %3013 = vst.msk [vmem:[#allocation2] sm:$0xff] %vm362_vm3, %v5089_v9 }
 0x3f3   : > { %3014 = vst.msk [vmem:[#allocation2 + $0x8] sm:$0xff] %vm362_vm3, %v5098_v54 }
 0x3f4   : > { %3015 = vst.msk [vmem:[#allocation2 + $0x10] sm:$0xff] %vm362_vm3, %v5107_v15 }
 0x3f5   : > { %3016 = vst.msk [vmem:[#allocation2 + $0x18] sm:$0xff] %vm362_vm3, %v5116_v38 }
 0x3f6   : > { %3017 = vst.msk [vmem:[#allocation2 + $0x20] sm:$0xff] %vm362_vm3, %v5125_v45 }
 0x3f7   : > { %3018 = vst.msk [vmem:[#allocation2 + $0x28] sm:$0xff] %vm362_vm3, %v5134_v34 }
 0x3f8   : > { %3019 = vst.msk [vmem:[#allocation2 + $0x30] sm:$0xff] %vm362_vm3, %v5143_v35 }
 0x3f9   : > { %3020 = vst.msk [vmem:[#allocation2 + $0x38] sm:$0xff] %vm362_vm3, %v5152_v41 }
 0x3fa   : > { %3021 = vst.msk [vmem:[#allocation2 + $0x40] sm:$0xff] %vm362_vm3, %v5161_v40 }
 0x3fb   : > { %3022 = vst.msk [vmem:[#allocation2 + $0x48] sm:$0xff] %vm362_vm3, %v5170_v13 }
 0x3fc   : > { %3023 = vst.msk [vmem:[#allocation2 + $0x50] sm:$0xff] %vm362_vm3, %v5179_v10 }
 0x3fd   : > { %3024 = vst.msk [vmem:[#allocation2 + $0x58] sm:$0xff] %vm362_vm3, %v5188_v39 }
 0x3fe   : > { %3025 = vst.msk [vmem:[#allocation2 + $0x60] sm:$0xff] %vm362_vm3, %v5197_v8 }
 0x3ff   : > { %3026 = vst.msk [vmem:[#allocation2 + $0x68] sm:$0xff] %vm362_vm3, %v5206_v33 }
 0x400   : > { %3027 = vst.msk [vmem:[#allocation2 + $0x70] sm:$0xff] %vm362_vm3, %v5215_v52 }
 0x401   : > { %3028 = vst.msk [vmem:[#allocation2 + $0x78] sm:$0xff] %vm362_vm3, %v5219_v3 }
 0x402   : > { %3029 = vst.msk [vmem:[#allocation2 + $0x80] sm:$0xff] %vm362_vm3, %v5222_v5 }
 0x403   : > { %3030 = vst.msk [vmem:[#allocation2 + $0x88] sm:$0xff] %vm362_vm3, %v5224_v42 }
 0x404   : > { %3031 = vst.msk [vmem:[#allocation2 + $0x90] sm:$0xff] %vm362_vm3, %v5226_v20 }
 0x405   : > { %3032 = vst.msk [vmem:[#allocation2 + $0x98] sm:$0xff] %vm362_vm3, %v5228_v43 }
 0x406   : > { %3033 = vst.msk [vmem:[#allocation2 + $0xa0] sm:$0xff] %vm362_vm3, %v5230_v22 }
 0x407   : > { %3034 = vst.msk [vmem:[#allocation2 + $0xa8] sm:$0xff] %vm362_vm3, %v5232_v58 }
 0x408   : > { %3035 = vst.msk [vmem:[#allocation2 + $0xb0] sm:$0xff] %vm362_vm3, %v5234_v32 }
 0x409   : > { %3036 = vst.msk [vmem:[#allocation2 + $0xb8] sm:$0xff] %vm362_vm3, %v5236_v57 }
 0x40a   : > { %3037 = vst.msk [vmem:[#allocation2 + $0xc0] sm:$0xff] %vm362_vm3, %v5238_v29 }
 0x40b   : > { %3038 = vst.msk [vmem:[#allocation2 + $0xc8] sm:$0xff] %vm362_vm3, %v5240_v61 }
 0x40c   : > { %3039 = vst.msk [vmem:[#allocation2 + $0xd0] sm:$0xff] %vm362_vm3, %v5242_v1 }
 0x40d   : > { %3040 = vst.msk [vmem:[#allocation2 + $0xd8] sm:$0xff] %vm362_vm3, %v5244_v44 }
 0x40e   : > { %3041 = vst.msk [vmem:[#allocation2 + $0xe0] sm:$0xff] %vm362_vm3, %v5246_v0 }
 0x40f   : > { %3042 = vst.msk [vmem:[#allocation2 + $0xe8] sm:$0xff] %vm362_vm3, %v5248_v19 }
 0x410   : > { %3043 = vst.msk [vmem:[#allocation2 + $0xf0] sm:$0xff] %vm362_vm3, %v5250_v49 }
 0x411   : > { %3044 = vst.msk [vmem:[#allocation2 + $0xf8] sm:$0xff] %vm362_vm3, %v5252_v2 }
 0x412 PF: > { %p3524_p8 = scmp.ne.s32.totalorder %s3626_s12, 1 }
 0x414   : > { %3048 = sbr.rel (%p3524_p8) target bundleno = 1083 (0x43b), region = 44 }
 0x419   : > { %v3049_v47 = vmax.f32 %v5089_v9, 0.0  ;;  %v3050_v30 = vmax.f32 %v5098_v54, 0.0  ;;  %v3051_v16 = vmax.f32 %v5107_v15, 0.0  ;;  %v3052_v28 = vmax.f32 %v5116_v38, 0.0 }
 0x41a   : > { %v3053_v17 = vmax.f32 %v5125_v45, 0.0  ;;  %v3054_v46 = vmax.f32 %v5134_v34, 0.0  ;;  %v3055_v9 = vmax.f32 %v5143_v35, 0.0  ;;  %v3056_v54 = vmax.f32 %v5152_v41, 0.0 }
 0x41b   : > { %3081 = vst.msk [vmem:[%s3705_s25] sm:$0xff] %vm362_vm3, %v3049_v47  ;;  %v3057_v15 = vmax.f32 %v5161_v40, 0.0  ;;  %v3058_v38 = vmax.f32 %v5170_v13, 0.0  ;;  %v3059_v45 = vmax.f32 %v5179_v10, 0.0  ;;  %v3060_v34 = vmax.f32 %v5188_v39, 0.0 }
 0x41c   : > { %3082 = vst.msk [vmem:[%s3705_s25 + $0x8] sm:$0xff] %vm362_vm3, %v3050_v30  ;;  %v3061_v35 = vmax.f32 %v5197_v8, 0.0  ;;  %v3062_v41 = vmax.f32 %v5206_v33, 0.0  ;;  %v3063_v40 = vmax.f32 %v5215_v52, 0.0  ;;  %v3064_v13 = vmax.f32 %v5219_v3, 0.0 }
 0x41d   : > { %3083 = vst.msk [vmem:[%s3705_s25 + $0x10] sm:$0xff] %vm362_vm3, %v3051_v16  ;;  %v3065_v10 = vmax.f32 %v5222_v5, 0.0  ;;  %v3066_v39 = vmax.f32 %v5224_v42, 0.0  ;;  %v3067_v8 = vmax.f32 %v5226_v20, 0.0  ;;  %v3068_v33 = vmax.f32 %v5228_v43, 0.0 }
 0x41e   : > { %3084 = vst.msk [vmem:[%s3705_s25 + $0x18] sm:$0xff] %vm362_vm3, %v3052_v28  ;;  %v3069_v52 = vmax.f32 %v5230_v22, 0.0  ;;  %v3070_v3 = vmax.f32 %v5232_v58, 0.0  ;;  %v3071_v5 = vmax.f32 %v5234_v32, 0.0  ;;  %v3072_v42 = vmax.f32 %v5236_v57, 0.0 }
 0x41f   : > { %3085 = vst.msk [vmem:[%s3705_s25 + $0x20] sm:$0xff] %vm362_vm3, %v3053_v17  ;;  %v3073_v20 = vmax.f32 %v5238_v29, 0.0  ;;  %v3074_v25 = vmax.f32 %v5240_v61, 0.0  ;;  %v3075_v7 = vmax.f32 %v5242_v1, 0.0  ;;  %v3076_v43 = vmax.f32 %v5244_v44, 0.0 }
 0x420   : > { %3086 = vst.msk [vmem:[%s3705_s25 + $0x28] sm:$0xff] %vm362_vm3, %v3054_v46  ;;  %v3077_v53 = vmax.f32 %v5246_v0, 0.0  ;;  %v3078_v11 = vmax.f32 %v5248_v19, 0.0  ;;  %v3079_v22 = vmax.f32 %v5250_v49, 0.0  ;;  %v3080_v48 = vmax.f32 %v5252_v2, 0.0 }
 0x421   : > { %3087 = vst.msk [vmem:[%s3705_s25 + $0x30] sm:$0xff] %vm362_vm3, %v3055_v9 }
 0x422   : > { %3088 = vst.msk [vmem:[%s3705_s25 + $0x38] sm:$0xff] %vm362_vm3, %v3056_v54 }
 0x423   : > { %3089 = vst.msk [vmem:[%s3705_s25 + $0x40] sm:$0xff] %vm362_vm3, %v3057_v15 }
 0x424   : > { %3090 = vst.msk [vmem:[%s3705_s25 + $0x48] sm:$0xff] %vm362_vm3, %v3058_v38 }
 0x425   : > { %3091 = vst.msk [vmem:[%s3705_s25 + $0x50] sm:$0xff] %vm362_vm3, %v3059_v45 }
 0x426   : > { %3092 = vst.msk [vmem:[%s3705_s25 + $0x58] sm:$0xff] %vm362_vm3, %v3060_v34 }
 0x427   : > { %3093 = vst.msk [vmem:[%s3705_s25 + $0x60] sm:$0xff] %vm362_vm3, %v3061_v35 }
 0x428   : > { %3094 = vst.msk [vmem:[%s3705_s25 + $0x68] sm:$0xff] %vm362_vm3, %v3062_v41 }
 0x429   : > { %3095 = vst.msk [vmem:[%s3705_s25 + $0x70] sm:$0xff] %vm362_vm3, %v3063_v40 }
 0x42a   : > { %3096 = vst.msk [vmem:[%s3705_s25 + $0x78] sm:$0xff] %vm362_vm3, %v3064_v13 }
 0x42b   : > { %3097 = vst.msk [vmem:[%s3705_s25 + $0x80] sm:$0xff] %vm362_vm3, %v3065_v10 }
 0x42c   : > { %3098 = vst.msk [vmem:[%s3705_s25 + $0x88] sm:$0xff] %vm362_vm3, %v3066_v39 }
 0x42d   : > { %3099 = vst.msk [vmem:[%s3705_s25 + $0x90] sm:$0xff] %vm362_vm3, %v3067_v8 }
 0x42e   : > { %3100 = vst.msk [vmem:[%s3705_s25 + $0x98] sm:$0xff] %vm362_vm3, %v3068_v33 }
 0x42f   : > { %3101 = vst.msk [vmem:[%s3705_s25 + $0xa0] sm:$0xff] %vm362_vm3, %v3069_v52 }
 0x430   : > { %3102 = vst.msk [vmem:[%s3705_s25 + $0xa8] sm:$0xff] %vm362_vm3, %v3070_v3 }
 0x431   : > { %3103 = vst.msk [vmem:[%s3705_s25 + $0xb0] sm:$0xff] %vm362_vm3, %v3071_v5 }
 0x432   : > { %3104 = vst.msk [vmem:[%s3705_s25 + $0xb8] sm:$0xff] %vm362_vm3, %v3072_v42 }
 0x433   : > { %3105 = vst.msk [vmem:[%s3705_s25 + $0xc0] sm:$0xff] %vm362_vm3, %v3073_v20 }
 0x434   : > { %3106 = vst.msk [vmem:[%s3705_s25 + $0xc8] sm:$0xff] %vm362_vm3, %v3074_v25 }
 0x435   : > { %3107 = vst.msk [vmem:[%s3705_s25 + $0xd0] sm:$0xff] %vm362_vm3, %v3075_v7 }
 0x436   : > { %3108 = vst.msk [vmem:[%s3705_s25 + $0xd8] sm:$0xff] %vm362_vm3, %v3076_v43 }
 0x437   : > { %3109 = vst.msk [vmem:[%s3705_s25 + $0xe0] sm:$0xff] %vm362_vm3, %v3077_v53 }
 0x438   : > { %3110 = vst.msk [vmem:[%s3705_s25 + $0xe8] sm:$0xff] %vm362_vm3, %v3078_v11 }
 0x439   : > { %3111 = vst.msk [vmem:[%s3705_s25 + $0xf0] sm:$0xff] %vm362_vm3, %v3079_v22 }
 0x43a   : > { %3112 = vst.msk [vmem:[%s3705_s25 + $0xf8] sm:$0xff] %vm362_vm3, %v3080_v48 }
 0x43b PF: > { %s13_s16 = sadd.s32 1, %s3642_s16   ;;  %s5747_s12 = smov %s3634_s14 }
 0x43c   : > { %p10_p9 = scmp.ge.s32.totalorder %s13_s16, 6   ;;  %s5748_s13 = smov %s3638_s15 }
 0x43d   : > { %s5749_s14 = smov %s5752_s17  ;;  %s5750_s15 = smov %s5756_s18 }
 0x43e   :  { %12 = sbr.rel (!%p10_p9) target bundleno = 3 (0x3), region = 79 }

</bundles_post_ra>
